<compile_context>
chip_gen: v5e
topology: v5e:2x2
jax: 0.10.0
libtpu: 0.0.40
codegen_flags: <defaults>
</compile_context>

<pallas_src>
import functools

import jax
import jax.numpy as jnp
import numpy as np
from jax.experimental import pallas as pl
from jax.experimental.pallas import tpu as pltpu

_LANE = 128          # lane width: Cmid / Cout padded to this
_ROW_AL = 16         # bf16 sublane packing: W / row-tile alignment


def _round_up(x, m):
    return (x + m - 1) // m * m


def _vmem_target_bytes():
    """Generation-aware VMEM budget (v7x: 64 MiB, v5e/v6e: 128 MiB)."""
    try:
        cap = int(pltpu.get_tpu_info().vmem_capacity_bytes)
    except Exception:
        cap = 64 * 1024 * 1024  # conservative fallback (v7x)
    return int(cap * 0.55)


def _bcast_spec(a):
    """Full-array block whose index never changes (weights / biases)."""
    idx = (0,) * a.ndim
    return pl.BlockSpec(a.shape, lambda i, _idx=idx: _idx)


# ---------------------------------------------------------------------------
# Fused bottleneck kernel (one image per grid step)
# ---------------------------------------------------------------------------
def _make_fused_kernel(*, h, w, w_al, dil, fuse_tail, identity_add):
    """conv1+bn1+relu -> in-VMEM im2col -> conv2+bn2+relu
       [-> conv3+bn3 + residual/downsample + relu]   for one image.

    Refs (in order):
      x_ref  : (1, Hp, Wp, Cin)  bf16   spatially zero-padded input
      w1, b1 : (Cin, Cm), (1, Cm)       conv1 (BN scale folded), bias
      w2, b2 : (9*Cm, Cm), (1, Cm)      conv2 im2col weights, bias
      [w3,b3 : (Cm, Co), (1, Co)]       conv3 (only if fuse_tail)
      [wd,bd : (Cin, Co), (1, Co)]      downsample / identity embedding
      o_ref  : (1, H, W_al, Co|Cm) bf16
      h1_scr : (Hp, Wp, Cm)       bf16  VMEM scratch for padded conv1 output
    """

    def kernel(*refs):
        x_ref, w1, b1, w2, b2 = refs[:5]
        i = 5
        if fuse_tail:
            w3, b3 = refs[i:i + 2]
            i += 2
            if not identity_add:
                wd, bd = refs[i:i + 2]
                i += 2
        o_ref, h1_scr = refs[i], refs[i + 1]

        hp, wp, cin = x_ref.shape[1], x_ref.shape[2], x_ref.shape[3]
        cm = w1.shape[1]

        # ---- conv1 (1x1) + bn1 + relu over the padded spatial grid ----
        xp = x_ref[0]                                       # (Hp, Wp, Cin)
        a1 = jnp.dot(xp.reshape(hp * wp, cin), w1[...],
                     preferred_element_type=jnp.float32)
        a1 = jnp.maximum(a1 + b1[...], 0.0).reshape(hp, wp, cm)

        # conv2 zero-pads ITS input (h1), so the halo ring must be 0, not
        # relu(b1): mask everything outside the valid (H, W) interior.
        hi = jax.lax.broadcasted_iota(jnp.int32, (hp, wp, cm), 0)
        wi = jax.lax.broadcasted_iota(jnp.int32, (hp, wp, cm), 1)
        interior = ((hi >= dil) & (hi < dil + h) &
                    (wi >= dil) & (wi < dil + w))
        h1_scr[...] = jnp.where(interior, a1, 0.0).astype(jnp.bfloat16)

        # ---- conv2 (3x3, dilation, stride 1): in-VMEM im2col + one dot ----
        taps = [h1_scr[ky * dil:ky * dil + h, kx * dil:kx * dil + w_al, :]
                for ky in range(3) for kx in range(3)]
        patches = jnp.concatenate(taps, axis=-1).reshape(h * w_al, 9 * cm)
        a2 = jnp.dot(patches, w2[...], preferred_element_type=jnp.float32)
        a2 = jnp.maximum(a2 + b2[...], 0.0).astype(jnp.bfloat16)

        if not fuse_tail:
            o_ref[...] = a2.reshape(1, h, w_al, cm)
            return

        # ---- conv3 (1x1) + bn3 + residual + relu ----
        y = jnp.dot(a2, w3[...], preferred_element_type=jnp.float32) + b3[...]
        xi = x_ref[0, dil:dil + h, dil:dil + w_al, :].reshape(h * w_al, cin)
        if identity_add:
            y = y + xi.astype(jnp.float32)
        else:
            y = y + (jnp.dot(xi, wd[...], preferred_element_type=jnp.float32)
                     + bd[...])
        co = y.shape[-1]
        o_ref[...] = (jnp.maximum(y, 0.0).astype(o_ref.dtype)
                      .reshape(1, h, w_al, co))

    return kernel


def _fused_block_call(x_pad, params, *, h, w, w_al, dil, fuse_tail):
    n, hp, wp, cin = x_pad.shape
    cm = params["w1"].shape[1]
    co = params["w3"].shape[1]
    identity_add = bool(fuse_tail and params["wd"] is None)

    args = [x_pad, params["w1"], params["b1"], params["w2"], params["b2"]]
    if fuse_tail:
        args += [params["w3"], params["b3"]]
        if not identity_add:
            args += [params["wd"], params["bd"]]
    out_c = co if fuse_tail else cm

    in_specs = [pl.BlockSpec((1, hp, wp, cin), lambda i: (i, 0, 0, 0))]
    in_specs += [_bcast_spec(a) for a in args[1:]]

    weight_bytes = sum(int(np.prod(a.shape)) * a.dtype.itemsize
                       for a in args[1:])
    flops = 2 * n * (hp * wp * cin * cm + h * w_al * 9 * cm * cm)
    if fuse_tail:
        flops += 2 * n * h * w_al * co * (cm + (0 if identity_add else cin))
    bytes_accessed = int(x_pad.size * x_pad.dtype.itemsize + weight_bytes
                         + n * h * w_al * out_c * 2)

    kernel = _make_fused_kernel(h=h, w=w, w_al=w_al, dil=dil,
                                fuse_tail=fuse_tail,
                                identity_add=identity_add)
    return pl.pallas_call(
        kernel,
        out_shape=jax.ShapeDtypeStruct((n, h, w_al, out_c), jnp.bfloat16),
        grid=(n,),
        in_specs=in_specs,
        out_specs=pl.BlockSpec((1, h, w_al, out_c), lambda i: (i, 0, 0, 0)),
        scratch_shapes=[pltpu.VMEM((hp, wp, cm), jnp.bfloat16)],
        compiler_params=pltpu.CompilerParams(
            dimension_semantics=("parallel",),
            vmem_limit_bytes=_vmem_target_bytes()),
        cost_estimate=pl.CostEstimate(flops=int(flops), transcendentals=0,
                                      bytes_accessed=bytes_accessed),
    )(*args)


# ---------------------------------------------------------------------------
# Row-tiled conv3 + downsample + residual (used only for stride > 1)
# ---------------------------------------------------------------------------
def _conv3_residual_kernel(h_ref, xs_ref, w3_ref, b3_ref, wd_ref, bd_ref,
                           o_ref):
    y = jnp.dot(h_ref[...], w3_ref[...],
                preferred_element_type=jnp.float32) + b3_ref[...]
    y = y + (jnp.dot(xs_ref[...], wd_ref[...],
                     preferred_element_type=jnp.float32) + bd_ref[...])
    o_ref[...] = jnp.maximum(y, 0.0).astype(o_ref.dtype)


def _conv3_residual_call(h2_flat, xs_flat, params):
    m, cm = h2_flat.shape
    cin = xs_flat.shape[1]
    w3, b3, wd, bd = params["w3"], params["b3"], params["wd"], params["bd"]
    co = w3.shape[1]

    target = _vmem_target_bytes()
    weight_bytes = sum(int(np.prod(a.shape)) * a.dtype.itemsize
                       for a in (w3, b3, wd, bd))
    row_bytes = 2 * (cm + cin + co)                   # bf16 rows
    avail = max(target - 2 * weight_bytes, 1 << 20)   # 2x: double-buffered
    tile = max(_ROW_AL, (avail // (2 * row_bytes)) // _ROW_AL * _ROW_AL)
    tile = min(tile, _round_up(m, _ROW_AL))
    if pl.cdiv(m, tile) < 2 and m > _ROW_AL:
        # keep >= 2 grid steps so v7x can split the grid across its 2 TCs
        tile = _round_up(pl.cdiv(m, 2), _ROW_AL)
    grid = (pl.cdiv(m, tile),)

    return pl.pallas_call(
        _conv3_residual_kernel,
        out_shape=jax.ShapeDtypeStruct((m, co), jnp.bfloat16),
        grid=grid,
        in_specs=[pl.BlockSpec((tile, cm), lambda i: (i, 0)),
                  pl.BlockSpec((tile, cin), lambda i: (i, 0)),
                  _bcast_spec(w3), _bcast_spec(b3),
                  _bcast_spec(wd), _bcast_spec(bd)],
        out_specs=pl.BlockSpec((tile, co), lambda i: (i, 0)),
        compiler_params=pltpu.CompilerParams(
            dimension_semantics=("parallel",),
            vmem_limit_bytes=target),
        cost_estimate=pl.CostEstimate(
            flops=2 * m * (cm + cin) * co, transcendentals=0,
            bytes_accessed=int(2 * m * (cm + cin + co) + weight_bytes)),
    )(h2_flat, xs_flat, w3, b3, wd, bd)


# ---------------------------------------------------------------------------
# Forward pass
# ---------------------------------------------------------------------------
def bottleneck2_forward_nhwc(x_nhwc, params, *, stride=1, dilation=1,
                             out_channels=None):
    """Channels-last forward.  Returns bf16 (padded channels sliced off)."""
    n, h, w, cin = x_nhwc.shape
    cm = params["w1"].shape[1]
    co = params["w3"].shape[1]
    cout = co if out_channels is None else out_channels

    x_bf = x_nhwc.astype(jnp.bfloat16)
    # W is padded to a 16-multiple so in-kernel (H,W,C)<->(H*W,C) reshapes are
    # layout-trivial; the extra right columns are masked / sliced off.
    w_al = _round_up(w, _ROW_AL)
    wp = _round_up(w_al + 2 * dilation, _ROW_AL)
    hp = h + 2 * dilation
    x_pad = jnp.pad(x_bf, ((0, 0),
                           (dilation, hp - h - dilation),
                           (dilation, wp - w - dilation),
                           (0, 0)))

    if stride == 1:
        out = _fused_block_call(x_pad, params, h=h, w=w, w_al=w_al,
                                dil=dilation, fuse_tail=True)
        return out[:, :, :w, :cout]

    # stride > 1: conv1+conv2 at stride 1 (fused, no tail), subsample, then a
    # row-tiled fused conv3 + downsample + residual kernel.
    assert params["wd"] is not None, "stride > 1 requires a downsample branch"
    h2 = _fused_block_call(x_pad, params, h=h, w=w, w_al=w_al,
                           dil=dilation, fuse_tail=False)
    hout = (h - 1) // stride + 1
    wout = (w - 1) // stride + 1
    h2s = h2[:, :(hout - 1) * stride + 1:stride,
             :(wout - 1) * stride + 1:stride, :]
    xs = x_bf[:, :(hout - 1) * stride + 1:stride,
              :(wout - 1) * stride + 1:stride, :]
    m = n * hout * wout
    y = _conv3_residual_call(h2s.reshape(m, cm), xs.reshape(m, cin), params)
    return y.reshape(n, hout, wout, co)[..., :cout]


def bottleneck2_forward(x_nchw, params, *, stride=1, dilation=1,
                        out_channels=None):
    """NCHW public API (PyTorch convention); kernels run channels-last."""
    x = jnp.transpose(x_nchw, (0, 2, 3, 1))
    y = bottleneck2_forward_nhwc(x, params, stride=stride, dilation=dilation,
                                 out_channels=out_channels)
    return jnp.transpose(y, (0, 3, 1, 2)).astype(jnp.float32)


# ---------------------------------------------------------------------------
# Pure-JAX f32 reference (mirrors the PyTorch module, eval-mode BN)
# ---------------------------------------------------------------------------
def _ref_conv(x, w_oihw, stride=1, padding=0, dilation=1):
    return jax.lax.conv_general_dilated(
        x, w_oihw, window_strides=(stride, stride),
        padding=[(padding, padding), (padding, padding)],
        rhs_dilation=(dilation, dilation),
        dimension_numbers=("NCHW", "OIHW", "NCHW"))


def _ref_bn(x, gamma, beta, mean, var, eps=1e-5):
    r = lambda a: a.reshape(1, -1, 1, 1)
    return (x - r(mean)) / jnp.sqrt(r(var) + eps) * r(gamma) + r(beta)


def bottleneck2_reference(x, raw, *, stride=1, dilation=1):
    out = _ref_conv(x, raw["conv1"])
    out = jnp.maximum(_ref_bn(out, *raw["bn1"]), 0.0)
    out = _ref_conv(out, raw["conv2"], stride=stride, padding=dilation,
                    dilation=dilation)
    out = jnp.maximum(_ref_bn(out, *raw["bn2"]), 0.0)
    out = _ref_conv(out, raw["conv3"])
    out = _ref_bn(out, *raw["bn3"])
    if raw.get("convd") is not None:
        identity = _ref_bn(_ref_conv(x, raw["convd"], stride=stride),
                           *raw["bnd"])
    else:
        identity = x
    return jnp.maximum(out + identity, 0.0)


# ---------------------------------------------------------------------------
# Deterministic parameter construction (folded BN, lane-padded, bf16 weights)
# ---------------------------------------------------------------------------
def _fold_bn(gamma, beta, mean, var, eps=1e-5):
    scale = gamma / jnp.sqrt(var + eps)
    return scale, beta - mean * scale


def _make_bn(key, c):
    k1, k2, k3, k4 = jax.random.split(key, 4)
    gamma = 1.0 + 0.1 * jax.random.normal(k1, (c,), jnp.float32)
    beta = 0.1 * jax.random.normal(k2, (c,), jnp.float32)
    mean = 0.1 * jax.random.normal(k3, (c,), jnp.float32)
    var = jax.random.uniform(k4, (c,), jnp.float32, 0.5, 1.5)
    return gamma, beta, mean, var


def _conv_init(key, shape):
    fan_in = shape[1] * shape[2] * shape[3]
    return (0.5 / np.sqrt(fan_in)) * jax.random.normal(key, shape, jnp.float32)


def make_params(key, inplanes, planes, stride):
    mid = planes // 4
    ks = jax.random.split(key, 8)
    raw = {
        "conv1": _conv_init(ks[0], (mid, inplanes, 1, 1)),
        "bn1": _make_bn(ks[1], mid),
        "conv2": _conv_init(ks[2], (mid, mid, 3, 3)),
        "bn2": _make_bn(ks[3], mid),
        "conv3": _conv_init(ks[4], (planes, mid, 1, 1)),
        "bn3": _make_bn(ks[5], planes),
        "convd": None,
        "bnd": None,
    }
    if stride != 1 or inplanes != planes:
        raw["convd"] = _conv_init(ks[6], (planes, inplanes, 1, 1))
        raw["bnd"] = _make_bn(ks[7], planes)

    mid_p = _round_up(mid, _LANE)
    out_p = _round_up(planes, _LANE)
    s1, b1 = _fold_bn(*raw["bn1"])
    s2, b2 = _fold_bn(*raw["bn2"])
    s3, b3 = _fold_bn(*raw["bn3"])

    # BN scales folded into the weights (in f32, then a single bf16 cast);
    # Cmid/Cout zero-padded to lane multiples so kernel outputs are lane-dense.
    w1 = raw["conv1"][:, :, 0, 0].T * s1[None, :]                 # (Cin, mid)
    w1 = jnp.pad(w1, ((0, 0), (0, mid_p - mid)))
    w2 = jnp.transpose(raw["conv2"], (2, 3, 1, 0)) * s2[None, None, None, :]
    w2 = jnp.pad(w2, ((0, 0), (0, 0), (0, mid_p - mid), (0, mid_p - mid)))
    w2 = w2.reshape(9 * mid_p, mid_p)                             # im2col order
    w3 = raw["conv3"][:, :, 0, 0].T * s3[None, :]                 # (mid, Cout)
    w3 = jnp.pad(w3, ((0, mid_p - mid), (0, out_p - planes)))

    params = {
        "w1": w1.astype(jnp.bfloat16),
        "b1": jnp.pad(b1, (0, mid_p - mid)).reshape(1, mid_p),
        "w2": w2.astype(jnp.bfloat16),
        "b2": jnp.pad(b2, (0, mid_p - mid)).reshape(1, mid_p),
        "w3": w3.astype(jnp.bfloat16),
        "b3": jnp.pad(b3, (0, out_p - planes)).reshape(1, out_p),
    }
    if raw["convd"] is not None:
        sd, bd = _fold_bn(*raw["bnd"])
        wd = raw["convd"][:, :, 0, 0].T * sd[None, :]
        wd = jnp.pad(wd, ((0, 0), (0, out_p - planes)))
        params["wd"] = wd.astype(jnp.bfloat16)
        params["bd"] = jnp.pad(bd, (0, out_p - planes)).reshape(1, out_p)
    elif out_p != planes:
        # Identity residual, but Cout is not lane-aligned: add it through an
        # exact (0/1 bf16) identity-embedding matmul into the padded channels.
        params["wd"] = jnp.eye(inplanes, out_p, dtype=jnp.bfloat16)
        params["bd"] = jnp.zeros((1, out_p), jnp.float32)
    else:
        params["wd"] = None
        params["bd"] = None
    return params, raw


# ---------------------------------------------------------------------------
if __name__ == "__main__":
    key = jax.random.PRNGKey(0)
    cases = [
        # (inplanes, planes, stride, dilation, H, W)
        (4, 16, 1, 1, 16, 16),      # channel-change downsample, fully fused
        (16, 16, 1, 2, 16, 16),     # identity residual (lane-padded), dil=2
        (8, 32, 2, 1, 16, 16),      # stride-2 downsample path
        (128, 128, 1, 1, 8, 16),    # identity residual, lane-aligned add
    ]
    for (cin, planes, stride, dil, H, W) in cases:
        kx, kp, key = jax.random.split(key, 3)
        x = jax.random.normal(kx, (2, cin, H, W), jnp.float32)   # NCHW
        params, raw = make_params(kp, cin, planes, stride)

        fwd = jax.jit(functools.partial(bottleneck2_forward, stride=stride,
                                        dilation=dil, out_channels=planes))
        out = jax.block_until_ready(fwd(x, params))
        ref = jax.block_until_ready(
            bottleneck2_reference(x, raw, stride=stride, dilation=dil))

        assert out.shape == ref.shape, (out.shape, ref.shape)
        # bf16 MXU operands / bf16 residual -> relaxed tolerance vs f32 ref.
        np.testing.assert_allclose(np.asarray(out), np.asarray(ref),
                                   rtol=5e-2, atol=5e-2)
    print("KERNEL_OK")
</pallas_src>

<mosaic_0001>
module attributes {stable_mosaic.version = 11 : i64} {
  func.func @kernel(%arg0: i32, %arg1: memref<1x18x32x4xbf16, #tpu.memory_space<vmem>>, %arg2: memref<4x128xbf16, #tpu.memory_space<vmem>>, %arg3: memref<1x128xf32, #tpu.memory_space<vmem>>, %arg4: memref<1152x128xbf16, #tpu.memory_space<vmem>>, %arg5: memref<1x128xf32, #tpu.memory_space<vmem>>, %arg6: memref<128x128xbf16, #tpu.memory_space<vmem>>, %arg7: memref<1x128xf32, #tpu.memory_space<vmem>>, %arg8: memref<4x128xbf16, #tpu.memory_space<vmem>>, %arg9: memref<1x128xf32, #tpu.memory_space<vmem>>, %arg10: memref<1x16x16x128xbf16, #tpu.memory_space<vmem>>, %arg11: memref<18x32x128xbf16, #tpu.memory_space<vmem>>) attributes {dimension_semantics = [#tpu.dimension_semantics<parallel>], iteration_bounds = array<i64: 2>, scalar_prefetch = 0 : i64, scratch_operands = 1 : i64, tpu.core_type = #tpu.core_type<tc>, window_params = [{transform_indices = @transform_0, window_bounds = array<i64: 1, 18, 32, 4>}, {pipeline_mode = #tpu.pipeline_mode<synchronous>, transform_indices = @transform_1, window_bounds = array<i64: 4, 128>}, {pipeline_mode = #tpu.pipeline_mode<synchronous>, transform_indices = @transform_2, window_bounds = array<i64: 1, 128>}, {pipeline_mode = #tpu.pipeline_mode<synchronous>, transform_indices = @transform_3, window_bounds = array<i64: 1152, 128>}, {pipeline_mode = #tpu.pipeline_mode<synchronous>, transform_indices = @transform_4, window_bounds = array<i64: 1, 128>}, {pipeline_mode = #tpu.pipeline_mode<synchronous>, transform_indices = @transform_5, window_bounds = array<i64: 128, 128>}, {pipeline_mode = #tpu.pipeline_mode<synchronous>, transform_indices = @transform_6, window_bounds = array<i64: 1, 128>}, {pipeline_mode = #tpu.pipeline_mode<synchronous>, transform_indices = @transform_7, window_bounds = array<i64: 4, 128>}, {pipeline_mode = #tpu.pipeline_mode<synchronous>, transform_indices = @transform_8, window_bounds = array<i64: 1, 128>}, {transform_indices = @transform_9, window_bounds = array<i64: 1, 16, 16, 128>}]} {
    %c0 = arith.constant 0 : index
    %c0_0 = arith.constant 0 : index
    %c0_1 = arith.constant 0 : index
    %c0_2 = arith.constant 0 : index
    %0 = vector.load %arg1[%c0, %c0_0, %c0_1, %c0_2] : memref<1x18x32x4xbf16, #tpu.memory_space<vmem>>, vector<1x18x32x4xbf16>
    %1 = vector.shape_cast %0 : vector<1x18x32x4xbf16> to vector<18x32x4xbf16>
    %2 = vector.shape_cast %1 : vector<18x32x4xbf16> to vector<576x4xbf16>
    %c0_3 = arith.constant 0 : index
    %c0_4 = arith.constant 0 : index
    %3 = vector.load %arg2[%c0_3, %c0_4] : memref<4x128xbf16, #tpu.memory_space<vmem>>, vector<4x128xbf16>
    %cst = arith.constant dense<0.000000e+00> : vector<576x128xf32>
    %4 = tpu.matmul %2, %3, %cst {dimension_numbers = #tpu.dot_dimension_numbers<[1], [0], [0], [1], [0, 0, 1, 1], [], []>} : vector<576x4xbf16>, vector<4x128xbf16>, vector<576x128xf32> -> vector<576x128xf32>
    %c0_5 = arith.constant 0 : index
    %c0_6 = arith.constant 0 : index
    %5 = vector.load %arg3[%c0_5, %c0_6] : memref<1x128xf32, #tpu.memory_space<vmem>>, vector<1x128xf32>
    %6 = vector.broadcast %5 : vector<1x128xf32> to vector<576x128xf32>
    %7 = arith.addf %4, %6 : vector<576x128xf32>
    %cst_7 = arith.constant 0.000000e+00 : f32
    %8 = vector.broadcast %cst_7 : f32 to vector<576x128xf32>
    %9 = arith.maximumf %7, %8 : vector<576x128xf32>
    %10 = vector.shape_cast %9 : vector<576x128xf32> to vector<18x32x128xf32>
    %11 = tpu.iota {dimensions = array<i32: 0>} : vector<18x32x128xi32>
    %12 = tpu.iota {dimensions = array<i32: 1>} : vector<18x32x128xi32>
    %c1_i32 = arith.constant 1 : i32
    %13 = vector.broadcast %c1_i32 : i32 to vector<18x32x128xi32>
    %14 = arith.cmpi sge, %11, %13 : vector<18x32x128xi32>
    %c17_i32 = arith.constant 17 : i32
    %15 = vector.broadcast %c17_i32 : i32 to vector<18x32x128xi32>
    %16 = arith.cmpi slt, %11, %15 : vector<18x32x128xi32>
    %17 = arith.andi %14, %16 : vector<18x32x128xi1>
    %c1_i32_8 = arith.constant 1 : i32
    %18 = vector.broadcast %c1_i32_8 : i32 to vector<18x32x128xi32>
    %19 = arith.cmpi sge, %12, %18 : vector<18x32x128xi32>
    %20 = arith.andi %17, %19 : vector<18x32x128xi1>
    %c17_i32_9 = arith.constant 17 : i32
    %21 = vector.broadcast %c17_i32_9 : i32 to vector<18x32x128xi32>
    %22 = arith.cmpi slt, %12, %21 : vector<18x32x128xi32>
    %23 = arith.andi %20, %22 : vector<18x32x128xi1>
    %cst_10 = arith.constant 0.000000e+00 : f32
    %24 = vector.broadcast %cst_10 : f32 to vector<18x32x128xf32>
    %25 = arith.select %23, %10, %24 : vector<18x32x128xi1>, vector<18x32x128xf32>
    %26 = arith.truncf %25 : vector<18x32x128xf32> to vector<18x32x128xbf16>
    %c0_11 = arith.constant 0 : index
    %c0_12 = arith.constant 0 : index
    %c0_13 = arith.constant 0 : index
    %27 = vector.load %arg11[%c0_11, %c0_12, %c0_13] : memref<18x32x128xbf16, #tpu.memory_space<vmem>>, vector<18x32x128xbf16>
    tpu.vector_store %arg11[%c0_11, %c0_12, %c0_13], %26 {strides = array<i32>} : memref<18x32x128xbf16, #tpu.memory_space<vmem>>, vector<18x32x128xbf16>,
    %c0_14 = arith.constant 0 : index
    %c0_15 = arith.constant 0 : index
    %c0_16 = arith.constant 0 : index
    %28 = vector.load %arg11[%c0_14, %c0_15, %c0_16] : memref<18x32x128xbf16, #tpu.memory_space<vmem>>, vector<16x16x128xbf16>
    %c0_17 = arith.constant 0 : index
    %c1 = arith.constant 1 : index
    %c0_18 = arith.constant 0 : index
    %29 = vector.load %arg11[%c0_17, %c1, %c0_18] : memref<18x32x128xbf16, #tpu.memory_space<vmem>>, vector<16x16x128xbf16>
    %c0_19 = arith.constant 0 : index
    %c2 = arith.constant 2 : index
    %c0_20 = arith.constant 0 : index
    %30 = vector.load %arg11[%c0_19, %c2, %c0_20] : memref<18x32x128xbf16, #tpu.memory_space<vmem>>, vector<16x16x128xbf16>
    %c1_21 = arith.constant 1 : index
    %c0_22 = arith.constant 0 : index
    %c0_23 = arith.constant 0 : index
    %31 = vector.load %arg11[%c1_21, %c0_22, %c0_23] : memref<18x32x128xbf16, #tpu.memory_space<vmem>>, vector<16x16x128xbf16>
    %c1_24 = arith.constant 1 : index
    %c1_25 = arith.constant 1 : index
    %c0_26 = arith.constant 0 : index
    %32 = vector.load %arg11[%c1_24, %c1_25, %c0_26] : memref<18x32x128xbf16, #tpu.memory_space<vmem>>, vector<16x16x128xbf16>
    %c1_27 = arith.constant 1 : index
    %c2_28 = arith.constant 2 : index
    %c0_29 = arith.constant 0 : index
    %33 = vector.load %arg11[%c1_27, %c2_28, %c0_29] : memref<18x32x128xbf16, #tpu.memory_space<vmem>>, vector<16x16x128xbf16>
    %c2_30 = arith.constant 2 : index
    %c0_31 = arith.constant 0 : index
    %c0_32 = arith.constant 0 : index
    %34 = vector.load %arg11[%c2_30, %c0_31, %c0_32] : memref<18x32x128xbf16, #tpu.memory_space<vmem>>, vector<16x16x128xbf16>
    %c2_33 = arith.constant 2 : index
    %c1_34 = arith.constant 1 : index
    %c0_35 = arith.constant 0 : index
    %35 = vector.load %arg11[%c2_33, %c1_34, %c0_35] : memref<18x32x128xbf16, #tpu.memory_space<vmem>>, vector<16x16x128xbf16>
    %c2_36 = arith.constant 2 : index
    %c2_37 = arith.constant 2 : index
    %c0_38 = arith.constant 0 : index
    %36 = vector.load %arg11[%c2_36, %c2_37, %c0_38] : memref<18x32x128xbf16, #tpu.memory_space<vmem>>, vector<16x16x128xbf16>
    %37 = tpu.concatenate %28, %29, %30, %31, %32, %33, %34, %35, %36 in 2 : vector<16x16x128xbf16>, vector<16x16x128xbf16>, vector<16x16x128xbf16>, vector<16x16x128xbf16>, vector<16x16x128xbf16>, vector<16x16x128xbf16>, vector<16x16x128xbf16>, vector<16x16x128xbf16>, vector<16x16x128xbf16> -> vector<16x16x1152xbf16>
    %38 = vector.shape_cast %37 : vector<16x16x1152xbf16> to vector<256x1152xbf16>
    %c0_39 = arith.constant 0 : index
    %c0_40 = arith.constant 0 : index
    %39 = vector.load %arg4[%c0_39, %c0_40] : memref<1152x128xbf16, #tpu.memory_space<vmem>>, vector<1152x128xbf16>
    %cst_41 = arith.constant dense<0.000000e+00> : vector<256x128xf32>
    %40 = tpu.matmul %38, %39, %cst_41 {dimension_numbers = #tpu.dot_dimension_numbers<[1], [0], [0], [1], [0, 0, 1, 1], [], []>} : vector<256x1152xbf16>, vector<1152x128xbf16>, vector<256x128xf32> -> vector<256x128xf32>
    %c0_42 = arith.constant 0 : index
    %c0_43 = arith.constant 0 : index
    %41 = vector.load %arg5[%c0_42, %c0_43] : memref<1x128xf32, #tpu.memory_space<vmem>>, vector<1x128xf32>
    %42 = vector.broadcast %41 : vector<1x128xf32> to vector<256x128xf32>
    %43 = arith.addf %40, %42 : vector<256x128xf32>
    %cst_44 = arith.constant 0.000000e+00 : f32
    %44 = vector.broadcast %cst_44 : f32 to vector<256x128xf32>
    %45 = arith.maximumf %43, %44 : vector<256x128xf32>
    %46 = arith.truncf %45 : vector<256x128xf32> to vector<256x128xbf16>
    %c0_45 = arith.constant 0 : index
    %c0_46 = arith.constant 0 : index
    %47 = vector.load %arg6[%c0_45, %c0_46] : memref<128x128xbf16, #tpu.memory_space<vmem>>, vector<128x128xbf16>
    %cst_47 = arith.constant dense<0.000000e+00> : vector<256x128xf32>
    %48 = tpu.matmul %46, %47, %cst_47 {dimension_numbers = #tpu.dot_dimension_numbers<[1], [0], [0], [1], [0, 0, 1, 1], [], []>} : vector<256x128xbf16>, vector<128x128xbf16>, vector<256x128xf32> -> vector<256x128xf32>
    %c0_48 = arith.constant 0 : index
    %c0_49 = arith.constant 0 : index
    %49 = vector.load %arg7[%c0_48, %c0_49] : memref<1x128xf32, #tpu.memory_space<vmem>>, vector<1x128xf32>
    %50 = vector.broadcast %49 : vector<1x128xf32> to vector<256x128xf32>
    %51 = arith.addf %48, %50 : vector<256x128xf32>
    %c0_50 = arith.constant 0 : index
    %c1_51 = arith.constant 1 : index
    %c1_52 = arith.constant 1 : index
    %c0_53 = arith.constant 0 : index
    %52 = vector.load %arg1[%c0_50, %c1_51, %c1_52, %c0_53] : memref<1x18x32x4xbf16, #tpu.memory_space<vmem>>, vector<1x16x16x4xbf16>
    %53 = vector.shape_cast %52 : vector<1x16x16x4xbf16> to vector<16x16x4xbf16>
    %54 = vector.shape_cast %53 : vector<16x16x4xbf16> to vector<256x4xbf16>
    %c0_54 = arith.constant 0 : index
    %c0_55 = arith.constant 0 : index
    %55 = vector.load %arg8[%c0_54, %c0_55] : memref<4x128xbf16, #tpu.memory_space<vmem>>, vector<4x128xbf16>
    %cst_56 = arith.constant dense<0.000000e+00> : vector<256x128xf32>
    %56 = tpu.matmul %54, %55, %cst_56 {dimension_numbers = #tpu.dot_dimension_numbers<[1], [0], [0], [1], [0, 0, 1, 1], [], []>} : vector<256x4xbf16>, vector<4x128xbf16>, vector<256x128xf32> -> vector<256x128xf32>
    %c0_57 = arith.constant 0 : index
    %c0_58 = arith.constant 0 : index
    %57 = vector.load %arg9[%c0_57, %c0_58] : memref<1x128xf32, #tpu.memory_space<vmem>>, vector<1x128xf32>
    %58 = vector.broadcast %57 : vector<1x128xf32> to vector<256x128xf32>
    %59 = arith.addf %56, %58 : vector<256x128xf32>
    %60 = arith.addf %51, %59 : vector<256x128xf32>
    %cst_59 = arith.constant 0.000000e+00 : f32
    %61 = vector.broadcast %cst_59 : f32 to vector<256x128xf32>
    %62 = arith.maximumf %60, %61 : vector<256x128xf32>
    %63 = arith.truncf %62 : vector<256x128xf32> to vector<256x128xbf16>
    %64 = vector.shape_cast %63 : vector<256x128xbf16> to vector<1x16x16x128xbf16>
    %c0_60 = arith.constant 0 : index
    %c0_61 = arith.constant 0 : index
    %c0_62 = arith.constant 0 : index
    %c0_63 = arith.constant 0 : index
    %65 = vector.load %arg10[%c0_60, %c0_61, %c0_62, %c0_63] : memref<1x16x16x128xbf16, #tpu.memory_space<vmem>>, vector<1x16x16x128xbf16>
    tpu.vector_store %arg10[%c0_60, %c0_61, %c0_62, %c0_63], %64 {strides = array<i32>} : memref<1x16x16x128xbf16, #tpu.memory_space<vmem>>, vector<1x16x16x128xbf16>,
    return
  }
  func.func @transform_0(%arg0: i32) -> (i32, i32, i32, i32) {
    %c0_i32 = arith.constant 0 : i32
    %c0_i32_0 = arith.constant 0 : i32
    %c0_i32_1 = arith.constant 0 : i32
    %c0_i32_2 = arith.constant 0 : i32
    return %arg0, %c0_i32, %c0_i32_0, %c0_i32_1 : i32, i32, i32, i32
  }
  func.func @transform_1(%arg0: i32) -> (i32, i32) {
    %c0_i32 = arith.constant 0 : i32
    %c0_i32_0 = arith.constant 0 : i32
    %c0_i32_1 = arith.constant 0 : i32
    return %c0_i32, %c0_i32_0 : i32, i32
  }
  func.func @transform_2(%arg0: i32) -> (i32, i32) {
    %c0_i32 = arith.constant 0 : i32
    %c0_i32_0 = arith.constant 0 : i32
    %c0_i32_1 = arith.constant 0 : i32
    return %c0_i32, %c0_i32_0 : i32, i32
  }
  func.func @transform_3(%arg0: i32) -> (i32, i32) {
    %c0_i32 = arith.constant 0 : i32
    %c0_i32_0 = arith.constant 0 : i32
    %c0_i32_1 = arith.constant 0 : i32
    return %c0_i32, %c0_i32_0 : i32, i32
  }
  func.func @transform_4(%arg0: i32) -> (i32, i32) {
    %c0_i32 = arith.constant 0 : i32
    %c0_i32_0 = arith.constant 0 : i32
    %c0_i32_1 = arith.constant 0 : i32
    return %c0_i32, %c0_i32_0 : i32, i32
  }
  func.func @transform_5(%arg0: i32) -> (i32, i32) {
    %c0_i32 = arith.constant 0 : i32
    %c0_i32_0 = arith.constant 0 : i32
    %c0_i32_1 = arith.constant 0 : i32
    return %c0_i32, %c0_i32_0 : i32, i32
  }
  func.func @transform_6(%arg0: i32) -> (i32, i32) {
    %c0_i32 = arith.constant 0 : i32
    %c0_i32_0 = arith.constant 0 : i32
    %c0_i32_1 = arith.constant 0 : i32
    return %c0_i32, %c0_i32_0 : i32, i32
  }
  func.func @transform_7(%arg0: i32) -> (i32, i32) {
    %c0_i32 = arith.constant 0 : i32
    %c0_i32_0 = arith.constant 0 : i32
    %c0_i32_1 = arith.constant 0 : i32
    return %c0_i32, %c0_i32_0 : i32, i32
  }
  func.func @transform_8(%arg0: i32) -> (i32, i32) {
    %c0_i32 = arith.constant 0 : i32
    %c0_i32_0 = arith.constant 0 : i32
    %c0_i32_1 = arith.constant 0 : i32
    return %c0_i32, %c0_i32_0 : i32, i32
  }
  func.func @transform_9(%arg0: i32) -> (i32, i32, i32, i32) {
    %c0_i32 = arith.constant 0 : i32
    %c0_i32_0 = arith.constant 0 : i32
    %c0_i32_1 = arith.constant 0 : i32
    %c0_i32_2 = arith.constant 0 : i32
    return %arg0, %c0_i32, %c0_i32_0, %c0_i32_1 : i32, i32, i32, i32
  }
}

</mosaic_0001>

<bundles_post_ra>
// kernel: bottleneck2_forward.1
= control target key start
LH: loop header
LB: loop body
LE: loop exit
PB: predicated region body
PF: predicated region fallthrough
CT: control target
= control target key end

     0   :  { %s6779_s30 = smov 0   ;;  %s8817_s0 = inlined_call_operand.vmem [shape: bf16[2,18,32,4], index: 0, kind: input, shape index: {}]   ;;  %s8818_s1 = inlined_call_operand.vmem [shape: bf16[4,128], index: 1, kind: input, shape index: {}]   ;;  %s8819_s2 = inlined_call_operand.vmem [shape: f32[1,128], index: 2, kind: input, shape index: {}]   ;;  %s8820_s3 = inlined_call_operand.vmem [shape: bf16[1152,128], index: 3, kind: input, shape index: {}]   ;;  %s8821_s4 = inlined_call_operand.vmem [shape: f32[1,128], index: 4, kind: input, shape index: {}]   ;;  %s8822_s5 = inlined_call_operand.vmem [shape: bf16[128,128], index: 5, kind: input, shape index: {}]   ;;  %s8823_s6 = inlined_call_operand.vmem [shape: f32[1,128], index: 6, kind: input, shape index: {}]   ;;  %s8824_s7 = inlined_call_operand.vmem [shape: bf16[4,128], index: 7, kind: input, shape index: {}]   ;;  %s8825_s8 = inlined_call_operand.vmem [shape: f32[1,128], index: 8, kind: input, shape index: {}]   ;;  %s8826_s9 = inlined_call_operand.vmem [shape: bf16[2,16,16,128], index: 9, kind: output, shape index: {}]  }
   0x1 LB: > { %s5196_s10 = sadd.s32 4294967295, %s6725_s30   ;;  %p5200_p0 = scmp.ge.s32.totalorder %s6725_s30, 1  ;;  %s6725_s30 = sphi %s6779_s30, %s19_s30  }
   0x2   : > { %p287_p1 = scmp.lt.s32.totalorder %s6725_s30, 3 }
   0x4   : > { %p288_p2 = pnand %p5200_p0, %p287_p1 }
   0x6   : > { %291 = sbr.rel (%p288_p2) target bundleno = 1695 (0x69f), region = 56 }
   0xb   : > { %v406_v0 = vld [vmem:[%s8818_s1] sm:$0x3]  ;;  %vm700_vm0 = vcmask 1041408   ;;  %p323_p3 = scmp.lt.s32.totalorder %s5196_s10, 1  ;;  %vm591_vm1 = vcmask 31744   ;;  %v5814_v8 = vld [vmem:[%s8820_s3 + $0x38] sm:$0xff]  ;;  %v965_v30 = vlaneseq }
   0xc   : > { %v702_v1 = vsel %vm700_vm0, %v406_v0, 0  ;;  %3378 = vmatpush.bf16.msra.mxu1 %v5814_v8  ;;  %6578 = vmatpush.bf16.msra.mxu2 %v5814_v8  ;;  %v5813_v10 = vld [vmem:[%s8820_s3 + $0x30] sm:$0xff]  ;;  %v5812_v11 = vld [vmem:[%s8820_s3 + $0x28] sm:$0xff]  ;;  %v5811_v12 = vld [vmem:[%s8820_s3 + $0x20] sm:$0xff]  ;;  %v6727_v18 = vmov 0.0|0.0   ;;  %vm6728_vm3 = vmmov 1  }
   0xd   : > { %711 = vmatpush.bf16.msra.mxu0 %v702_v1  ;;  %s9009_s10 = smov (!%p323_p3, %s5196_s10), 1  ;;  %6579 = vmatpush.bf16.msra.mxu3 %v5814_v8  ;;  %v5810_v13 = vld [vmem:[%s8820_s3 + $0x18] sm:$0xff]  ;;  %v5809_v15 = vld [vmem:[%s8820_s3 + $0x10] sm:$0xff]  ;;  %v5808_v16 = vld [vmem:[%s8820_s3 + $0x8] sm:$0xff]  ;;  %v6839_v19 = vunpack.c.l.bf16 %v6727_v18  ;;  %v6862_v32 = vshrl.u32 %v965_v30, 7  ;;  %vm1805_vm7 = vcmask 1046528  }
   0xe   : > { %s6594_s13 = smul.u32 288, %s9009_s10  ;;  %v5807_v17 = vld [vmem:[%s8820_s3] sm:$0xff]  ;;  %vm1548_vm6 = vsmask.f32 7424  ;;  %v5840_v42 = vld [vmem:[%s8820_s3 + $0x108] sm:$0xff]  ;;  %s5770_s12 = sshll.u32 %s9009_s10, 7 }
   0xf   : > { %8840 = vst [vmem:[#allocation3_spill] sm:$0xff] %v6839_v19  ;;  %v6843_v20 = vpack.c.bf16 %v6839_v19, %v6839_v19  ;;  %v6858_v28 = vld [vmem:[%s8819_s2] ss:$0 sm:$0xff]  ;;  %vm970_vm2 = vcmp.ge.s32.totalorder %v6862_v32, 1  ;;  %v6869_v39 = vadd.s32 16, %v6862_v32  ;;  %s8645_s15 = scalar_lea.vmem %s8826_s9, %s5770_s12 }
  0x10   : > { %s6797_s16 = scalar_lea.vmem %s8817_s0, %s6594_s13  ;;  %3379 = vmatpush.bf16.msra.mxu1 %v5813_v10  ;;  %6580 = vmatpush.bf16.msra.mxu2 %v5813_v10  ;;  %vm6874_vm4 = vmpackc.low %vm6728_vm3, %vm970_vm2  ;;  %vm4433_vm8 = vsmask.f32 3328  ;;  %vm4434_vm9 = vsmask.f32 7440 }
  0x11   : > { %v5771_v2 = vld [vmem:[%s6797_s16] sm:$0xff]  ;;  %v5772_v3 = vld [vmem:[%s6797_s16 + $0x8] sm:$0xff]  ;;  %v5773_v4 = vld [vmem:[%s6797_s16 + $0x10] sm:$0xff]  ;;  %6581 = vmatpush.bf16.msra.mxu3 %v5813_v10  ;;  %5891 = vst [vmem:[#allocation2 + $0xb0] sm:$0xff] %v6843_v20   ;;  %vm984_vm5 = vcmp.lt.s32.totalorder %v6869_v39, 17 }
  0x12   : > { %5348 = vmatmul.msk.bf16.vlgmr.msra.gmra.mxu0 %vm591_vm1, %v5771_v2  ;;  %v5774_v5 = vld [vmem:[%s6797_s16 + $0x18] sm:$0xff]  ;;  %v5775_v6 = vld [vmem:[%s6797_s16 + $0x20] sm:$0xff]  ;;  %v5776_v7 = vld [vmem:[%s6797_s16 + $0x28] sm:$0xff]  ;;  %6339 = vst [vmem:[#allocation2 + $0xd0] sm:$0xff] %v6843_v20  }
  0x13   : > { %v5777_v9 = vld [vmem:[%s6797_s16 + $0x30] sm:$0xff]  ;;  %v5778_v14 = vld [vmem:[%s6797_s16 + $0x38] sm:$0xff]  ;;  %v5779_v21 = vld [vmem:[%s6797_s16 + $0x40] sm:$0xff]  ;;  %6372 = vst [vmem:[#allocation2 + $0x40] sm:$0xff] %v6843_v20  }
  0x14   : > { %3380 = vmatpush.bf16.msra.mxu1 %v5812_v11  ;;  %6582 = vmatpush.bf16.msra.mxu2 %v5812_v11  ;;  %6373 = vst [vmem:[#allocation2 + $0xe8] sm:$0xff] %v6843_v20   ;;  %v5780_v24 = vld [vmem:[%s6797_s16 + $0x48] sm:$0xff]  ;;  %v5781_v27 = vld [vmem:[%s6797_s16 + $0x50] sm:$0xff]  ;;  %v5782_v40 = vld [vmem:[%s6797_s16 + $0x58] sm:$0xff] }
  0x15   : > { %6583 = vmatpush.bf16.msra.mxu3 %v5812_v11  ;;  %8841 = vst [vmem:[#allocation4_spill] sm:$0xff] %v6869_v39  ;;  %v5783_v53 = vld [vmem:[%s6797_s16 + $0x60] sm:$0xff]  ;;  %v5784_v62 = vld [vmem:[%s6797_s16 + $0x68] sm:$0xff]  ;;  %v5838_v10 = vld [vmem:[%s8820_s3 + $0xf8] sm:$0xff] }
  0x16   : > { %v5785_v11 = vld [vmem:[%s6797_s16 + $0x70] sm:$0xff]  ;;  %vm8410_vm10 = vmor %vm4433_vm8, %vm4434_vm9 }
  0x18   : > { %3381 = vmatpush.bf16.msra.mxu1 %v5811_v12  ;;  %6584 = vmatpush.bf16.msra.mxu2 %v5811_v12 }
  0x19   : > { %6585 = vmatpush.bf16.msra.mxu3 %v5811_v12 }
  0x1c   : > { %3382 = vmatpush.bf16.msra.mxu1 %v5810_v13  ;;  %6586 = vmatpush.bf16.msra.mxu2 %v5810_v13 }
  0x1d   : > { %6587 = vmatpush.bf16.msra.mxu3 %v5810_v13  ;;  %v5837_v13 = vld [vmem:[%s8820_s3 + $0xf0] sm:$0xff] }
  0x20   : > { %3383 = vmatpush.bf16.msra.mxu1 %v5809_v15  ;;  %6588 = vmatpush.bf16.msra.mxu2 %v5809_v15 }
  0x21   : > { %6589 = vmatpush.bf16.msra.mxu3 %v5809_v15  ;;  %v5836_v15 = vld [vmem:[%s8820_s3 + $0xe8] sm:$0xff] }
  0x22   : > { %5349 = vmatmul.msk.bf16.gmra.mxu0 %vm591_vm1, %v5772_v3 }
  0x24   : > { %3384 = vmatpush.bf16.msra.mxu1 %v5808_v16  ;;  %6590 = vmatpush.bf16.msra.mxu2 %v5808_v16 }
  0x25   : > { %6591 = vmatpush.bf16.msra.mxu3 %v5808_v16 }
  0x28   : > { %3385 = vmatpush.bf16.msra.mxu1 %v5807_v17  ;;  %6592 = vmatpush.bf16.msra.mxu2 %v5807_v17 }
  0x29   : > { %6593 = vmatpush.bf16.msra.mxu3 %v5807_v17 }
  0x2b   : > { %3386 = vmatmul.bf16.vlgmr.msra.gmra.mxu1 %v6843_v20 }
  0x2c   : > { %3645 = vmatpush.bf16.msrb.mxu1 %v5838_v10 }
  0x30   : > { %3646 = vmatpush.bf16.msrb.mxu1 %v5837_v13 }
  0x32   : > { %5350 = vmatmul.msk.bf16.gmra.mxu0 %vm591_vm1, %v5773_v4 }
  0x34   : > { %3647 = vmatpush.bf16.msrb.mxu1 %v5836_v15  ;;  %v5790_v15 = vld [vmem:[%s6797_s16 + $0x98] sm:$0xff] }
  0x42   : > { %5351 = vmatmul.msk.bf16.gmra.mxu0 %vm591_vm1, %v5774_v5 }
  0x52   : > { %5352 = vmatmul.msk.bf16.gmra.mxu0 %vm591_vm1, %v5775_v6 }
  0x62   : > { %5353 = vmatmul.msk.bf16.gmra.mxu0 %vm591_vm1, %v5776_v7 }
  0x72   : > { %5354 = vmatmul.msk.bf16.gmra.mxu0 %vm591_vm1, %v5777_v9 }
  0x82   : > { %5355 = vmatmul.msk.bf16.gmra.mxu0 %vm591_vm1, %v5778_v14 }
  0x8f   : > { %v713_v22 = vpop.f32.mrf.mxu0 }
  0x92   : > { %5356 = vmatmul.msk.bf16.gmra.mxu0 %vm591_vm1, %v5779_v21  ;;  %v5835_v21 = vld [vmem:[%s8820_s3 + $0xe0] sm:$0xff] }
  0x93   : > { %3648 = vmatpush.bf16.msrb.mxu1 %v5835_v21 }
  0x97   : > { %v715_v23 = vpop.f32.mrf.mxu0 }
  0x9f   : > { %v718_v25 = vpop.f32.mrf.mxu0 }
  0xa0   : > { %v5834_v25 = vld [vmem:[%s8820_s3 + $0xd8] sm:$0xff] }
  0xa1   : > { %3649 = vmatpush.bf16.msrb.mxu1 %v5834_v25 }
  0xa2   : > { %5357 = vmatmul.msk.bf16.gmra.mxu0 %vm591_vm1, %v5780_v24 }
  0xa7   : > { %v720_v26 = vpop.f32.mrf.mxu0 }
  0xa8   : > { %v5786_v26 = vld [vmem:[%s6797_s16 + $0x78] sm:$0xff] }
  0xaf   : > { %v723_v29 = vpop.f32.mrf.mxu0 }
  0xb0   : > { %v724_v31 = vadd.f32 %v6858_v28, %v723_v29 }
  0xb2   : > { %5358 = vmatmul.msk.bf16.gmra.mxu0 %vm591_vm1, %v5781_v27  ;;  %v897_v33 = vmax.f32 %v724_v31, 0.0 }
  0xb4   : > { %v998_v37 = vsel %vm970_vm2, %v897_v33, 0.0 }
  0xb7   : > { %v725_v34 = vpop.f32.mrf.mxu0 }
  0xb8   : > { %v726_v35 = vadd.f32 %v6858_v28, %v725_v34 }
  0xba   : > { %v898_v36 = vmax.f32 %v726_v35, 0.0  ;;  %v5833_v35 = vld [vmem:[%s8820_s3 + $0xd0] sm:$0xff] }
  0xbb   : > { %3650 = vmatpush.bf16.msrb.mxu1 %v5833_v35 }
  0xbc   : > { %v5900_v38 = vpack.c.bf16 %v898_v36, %v998_v37  ;;  %v6878_v43 = vpack.c.bf16 %v898_v36, %v897_v33 }
  0xbe   : > { %6340 = vst [vmem:[#allocation2 + $0x10] sm:$0xff] %v5900_v38   ;;  %v1564_v41 = vshll.u32 %v5900_v38, 16  ;;  %6628 = vmatmul.msk.bf16.gmra.mxu1 %vm6874_vm4, %v6878_v43  ;;  %v1562_v46 = vshrl.u32 %v5900_v38, 16 }
  0xbf   : > { %v728_v44 = vpop.f32.mrf.mxu0 }
  0xc0   : > { %v729_v45 = vadd.f32 %v6858_v28, %v728_v44  ;;  %v1566_v47 = vrot.slane %v1564_v41, 1  ;;  %v5832_v41 = vld [vmem:[%s8820_s3 + $0xc8] sm:$0xff] }
  0xc1   : > { %3651 = vmatpush.bf16.msrb.mxu1 %v5832_v41  ;;  %v5792_v41 = vld [vmem:[%s6797_s16 + $0xa8] sm:$0xff] }
  0xc2   : > { %v899_v48 = vmax.f32 %v729_v45, 0.0  ;;  %5359 = vmatmul.msk.bf16.gmra.mxu0 %vm591_vm1, %v5782_v40  ;;  %v6886_v49 = vor.u32 %v1566_v47, %v1562_v46  ;;  %v5831_v45 = vld [vmem:[%s8820_s3 + $0xc0] sm:$0xff] }
  0xc3   : > { %v5787_v46 = vld [vmem:[%s6797_s16 + $0x80] sm:$0xff] }
  0xc4   : > { %v1000_v50 = vsel %vm984_vm5, %v899_v48, 0.0 }
  0xc5   : > { %v5905_v51 = vpack.c.bf16 %v6839_v19, %v1000_v50  ;;  %3652 = vmatpush.bf16.msrb.mxu1 %v5831_v45 }
  0xc7   : > { %6341 = vst [vmem:[#allocation2 + $0x48] sm:$0xff] %v5905_v51   ;;  %v730_v52 = vpop.f32.mrf.mxu0 }
  0xcf   : > { %v733_v54 = vpop.f32.mrf.mxu0 }
  0xd0   : > { %v734_v55 = vadd.f32 %v6858_v28, %v733_v54 }
  0xd2   : > { %5360 = vmatmul.msk.bf16.gmra.mxu0 %vm591_vm1, %v5783_v53  ;;  %v901_v56 = vmax.f32 %v734_v55, 0.0 }
  0xd4   : > { %v1002_v60 = vsel %vm970_vm2, %v901_v56, 0.0 }
  0xd7   : > { %v735_v57 = vpop.f32.mrf.mxu0 }
  0xd8   : > { %v736_v58 = vadd.f32 %v6858_v28, %v735_v57 }
  0xda   : > { %v902_v59 = vmax.f32 %v736_v58, 0.0 }
  0xdc   : > { %v5910_v61 = vpack.c.bf16 %v902_v59, %v1002_v60  ;;  %v6898_v0 = vpack.c.bf16 %v902_v59, %v901_v56  ;;  %v5788_v56 = vld [vmem:[%s6797_s16 + $0x88] sm:$0xff] }
  0xde   : > { %6342 = vst [vmem:[#allocation2 + $0x108] sm:$0xff] %v5910_v61   ;;  %v1576_v63 = vshll.u32 %v5910_v61, 16  ;;  %6631 = vmatmul.msk.bf16.gmra.mxu1 %vm6874_vm4, %v6898_v0  ;;  %v1574_v3 = vshrl.u32 %v5910_v61, 16 }
  0xdf   : > { %v738_v1 = vpop.f32.mrf.mxu0 }
  0xe0   : > { %v739_v2 = vadd.f32 %v6858_v28, %v738_v1  ;;  %v1578_v4 = vrot.slane %v1576_v63, 1 }
  0xe2   : > { %v903_v5 = vmax.f32 %v739_v2, 0.0  ;;  %5361 = vmatmul.msk.bf16.gmra.mxu0 %vm591_vm1, %v5784_v62  ;;  %v6905_v6 = vor.u32 %v1578_v4, %v1574_v3 }
  0xe4   : > { %v1004_v7 = vsel %vm984_vm5, %v903_v5, 0.0  ;;  %v5789_v5 = vld [vmem:[%s6797_s16 + $0x90] sm:$0xff] }
  0xe5   : > { %v5915_v8 = vpack.c.bf16 %v6839_v19, %v1004_v7 }
  0xe7   : > { %6343 = vst [vmem:[#allocation2 + $0x68] sm:$0xff] %v5915_v8   ;;  %v740_v9 = vpop.f32.mrf.mxu0 }
  0xef   : > { %v743_v12 = vpop.f32.mrf.mxu0 }
  0xf0   : > { %v744_v14 = vadd.f32 %v6858_v28, %v743_v12 }
  0xf2   : > { %5362 = vmatmul.msk.bf16.gmra.mxu0 %vm591_vm1, %v5785_v11  ;;  %v905_v16 = vmax.f32 %v744_v14, 0.0 }
  0xf4   : > { %v1006_v23 = vsel %vm970_vm2, %v905_v16, 0.0 }
  0xf7   : > { %v745_v17 = vpop.f32.mrf.mxu0 }
  0xf8   : > { %v746_v18 = vadd.f32 %v6858_v28, %v745_v17 }
  0xfa   : > { %v906_v22 = vmax.f32 %v746_v18, 0.0 }
  0xfc   : > { %v5920_v24 = vpack.c.bf16 %v906_v22, %v1006_v23  ;;  %v6932_v29 = vpack.c.bf16 %v906_v22, %v905_v16 }
  0xfe   : > { %6344 = vst [vmem:[#allocation2 + $0x30] sm:$0xff] %v5920_v24   ;;  %v1588_v27 = vshll.u32 %v5920_v24, 16  ;;  %6634 = vmatmul.msk.bf16.gmra.mxu1 %vm6874_vm4, %v6932_v29  ;;  %v1586_v33 = vshrl.u32 %v5920_v24, 16 }
  0xff   : > { %v748_v30 = vpop.f32.mrf.mxu0 }
 0x100   : > { %v749_v31 = vadd.f32 %v6858_v28, %v748_v30  ;;  %v1590_v34 = vrot.slane %v1588_v27, 1  ;;  %v5791_v30 = vld [vmem:[%s6797_s16 + $0xa0] sm:$0xff] }
 0x102   : > { %v907_v36 = vmax.f32 %v749_v31, 0.0  ;;  %5363 = vmatmul.msk.bf16.gmra.mxu0 %vm591_vm1, %v5786_v26  ;;  %v6942_v37 = vor.u32 %v1590_v34, %v1586_v33 }
 0x104   : > { %v1008_v38 = vsel %vm984_vm5, %v907_v36, 0.0 }
 0x105   : > { %v5925_v40 = vpack.c.bf16 %v6839_v19, %v1008_v38 }
 0x107   : > { %6345 = vst [vmem:[#allocation2 + $0x18] sm:$0xff] %v5925_v40   ;;  %v750_v44 = vpop.f32.mrf.mxu0 }
 0x10f   : > { %v753_v47 = vpop.f32.mrf.mxu0 }
 0x110   : > { %v754_v48 = vadd.f32 %v6858_v28, %v753_v47 }
 0x112   : > { %5364 = vmatmul.msk.bf16.gmra.mxu0 %vm591_vm1, %v5787_v46  ;;  %v909_v50 = vmax.f32 %v754_v48, 0.0 }
 0x114   : > { %v1010_v54 = vsel %vm970_vm2, %v909_v50, 0.0 }
 0x117   : > { %v755_v51 = vpop.f32.mrf.mxu0 }
 0x118   : > { %v756_v52 = vadd.f32 %v6858_v28, %v755_v51 }
 0x11a   : > { %v910_v53 = vmax.f32 %v756_v52, 0.0 }
 0x11c   : > { %v5930_v55 = vpack.c.bf16 %v910_v53, %v1010_v54  ;;  %v6636_v58 = vpack.c.bf16 %v910_v53, %v909_v50 }
 0x11e   : > { %6346 = vst [vmem:[#allocation2 + $0x80] sm:$0xff] %v5930_v55   ;;  %v1600_v57 = vshll.u32 %v5930_v55, 16  ;;  %6637 = vmatmul.msk.bf16.gmra.mxu1 %vm6874_vm4, %v6636_v58  ;;  %v1598_v61 = vshrl.u32 %v5930_v55, 16  ;;  %v5793_v55 = vld [vmem:[%s6797_s16 + $0xb0] sm:$0xff] }
 0x11f   : > { %v758_v59 = vpop.f32.mrf.mxu0 }
 0x120   : > { %v759_v60 = vadd.f32 %v6858_v28, %v758_v59  ;;  %v1602_v62 = vrot.slane %v1600_v57, 1 }
 0x122   : > { %v911_v63 = vmax.f32 %v759_v60, 0.0  ;;  %5365 = vmatmul.msk.bf16.gmra.mxu0 %vm591_vm1, %v5788_v56  ;;  %v6964_v1 = vor.u32 %v1602_v62, %v1598_v61 }
 0x124   : > { %v1012_v2 = vsel %vm984_vm5, %v911_v63, 0.0 }
 0x125   : > { %v5935_v3 = vpack.c.bf16 %v6839_v19, %v1012_v2  ;;  %v5794_v2 = vld [vmem:[%s6797_s16 + $0xb8] sm:$0xff] }
 0x127   : > { %6347 = vst [vmem:[#allocation2 + $0x110] sm:$0xff] %v5935_v3   ;;  %v760_v4 = vpop.f32.mrf.mxu0 }
 0x12e   : > { %6640 = vmatmul.msk.bf16.vlgmr.msrb.gmra.mxu1 %vm6874_vm4, %v6878_v43 }
 0x12f   : > { %v763_v7 = vpop.f32.mrf.mxu0 }
 0x130   : > { %v764_v8 = vadd.f32 %v6858_v28, %v763_v7 }
 0x132   : > { %5366 = vmatmul.msk.bf16.gmra.mxu0 %vm591_vm1, %v5789_v5  ;;  %v913_v9 = vmax.f32 %v764_v8, 0.0 }
 0x134   : > { %v1014_v13 = vsel %vm970_vm2, %v913_v9, 0.0 }
 0x137   : > { %v765_v10 = vpop.f32.mrf.mxu0 }
 0x138   : > { %v766_v11 = vadd.f32 %v6858_v28, %v765_v10 }
 0x13a   : > { %v914_v12 = vmax.f32 %v766_v11, 0.0  ;;  %v5822_v11 = vld [vmem:[%s8820_s3 + $0x78] sm:$0xff] }
 0x13b   : > { %3467 = vmatpush.bf16.msrb.mxu2 %v5822_v11 }
 0x13c   : > { %v5940_v14 = vpack.c.bf16 %v914_v12, %v1014_v13  ;;  %v6642_v17 = vpack.c.bf16 %v914_v12, %v913_v9  ;;  %v5795_v12 = vld [vmem:[%s6797_s16 + $0xc0] sm:$0xff] }
 0x13e   : > { %6348 = vst [vmem:[#allocation2 + $0x118] sm:$0xff] %v5940_v14   ;;  %v1612_v16 = vshll.u32 %v5940_v14, 16  ;;  %6643 = vmatmul.msk.bf16.vlgmr.msra.gmra.mxu2 %vm6874_vm4, %v6642_v17  ;;  %6646 = vmatmul.msk.bf16.gmra.mxu1 %vm6874_vm4, %v6898_v0  ;;  %v1610_v21 = vshrl.u32 %v5940_v14, 16  ;;  %v5821_v14 = vld [vmem:[%s8820_s3 + $0x70] sm:$0xff] }
 0x13f   : > { %v768_v43 = vpop.f32.mrf.mxu0  ;;  %3468 = vmatpush.bf16.msrb.mxu2 %v5821_v14 }
 0x140   : > { %v769_v18 = vadd.f32 %v6858_v28, %v768_v43  ;;  %v1614_v22 = vrot.slane %v1612_v16, 1  ;;  %v7044_v16 = vpop.f32.mrf.mxu1 }
 0x142   : > { %v915_v23 = vmax.f32 %v769_v18, 0.0  ;;  %5367 = vmatmul.msk.bf16.gmra.mxu0 %vm591_vm1, %v5790_v15  ;;  %v6986_v24 = vor.u32 %v1614_v22, %v1610_v21  ;;  %v5819_v22 = vld [vmem:[%s8820_s3 + $0x60] sm:$0xff] }
 0x144   : > { %v1016_v25 = vsel %vm984_vm5, %v915_v23, 0.0 }
 0x145   : > { %v5945_v26 = vpack.c.bf16 %v6839_v19, %v1016_v25 }
 0x147   : > { %6349 = vst [vmem:[#allocation2 + $0x98] sm:$0xff] %v5945_v26   ;;  %v770_v27 = vpop.f32.mrf.mxu0 }
 0x148   : > { %v5818_v27 = vld [vmem:[%s8820_s3 + $0x58] sm:$0xff] }
 0x14e   : > { %6649 = vmatmul.msk.bf16.gmra.mxu1 %vm6874_vm4, %v6932_v29 }
 0x14f   : > { %v773_v0 = vpop.f32.mrf.mxu0 }
 0x150   : > { %v774_v31 = vadd.f32 %v6858_v28, %v773_v0  ;;  %v5796_v0 = vld [vmem:[%s6797_s16 + $0xc8] sm:$0xff] }
 0x152   : > { %5368 = vmatmul.msk.bf16.gmra.mxu0 %vm591_vm1, %v5791_v30  ;;  %v917_v33 = vmax.f32 %v774_v31, 0.0  ;;  %v7060_v30 = vpop.f32.mrf.mxu1 }
 0x154   : > { %v1018_v38 = vsel %vm970_vm2, %v917_v33, 0.0 }
 0x157   : > { %v775_v34 = vpop.f32.mrf.mxu0 }
 0x158   : > { %v776_v35 = vadd.f32 %v6858_v28, %v775_v34 }
 0x15a   : > { %v918_v36 = vmax.f32 %v776_v35, 0.0  ;;  %v5817_v35 = vld [vmem:[%s8820_s3 + $0x50] sm:$0xff] }
 0x15c   : > { %v5950_v40 = vpack.c.bf16 %v918_v36, %v1018_v38  ;;  %v6651_v45 = vpack.c.bf16 %v918_v36, %v917_v33 }
 0x15e   : > { %6350 = vst [vmem:[#allocation2 + $0xf8] sm:$0xff] %v5950_v40   ;;  %v1624_v44 = vshll.u32 %v5950_v40, 16  ;;  %6652 = vmatmul.msk.bf16.gmra.mxu2 %vm6874_vm4, %v6651_v45  ;;  %6655 = vmatmul.msk.bf16.gmra.mxu1 %vm6874_vm4, %v6636_v58  ;;  %v1622_v47 = vshrl.u32 %v5950_v40, 16 }
 0x15f   : > { %v778_v29 = vpop.f32.mrf.mxu0 }
 0x160   : > { %v779_v46 = vadd.f32 %v6858_v28, %v778_v29  ;;  %v1626_v48 = vrot.slane %v1624_v44, 1  ;;  %v5797_v29 = vld [vmem:[%s6797_s16 + $0xd0] sm:$0xff] }
 0x162   : > { %v919_v50 = vmax.f32 %v779_v46, 0.0  ;;  %5369 = vmatmul.msk.bf16.gmra.mxu0 %vm591_vm1, %v5792_v41  ;;  %v7007_v51 = vor.u32 %v1626_v48, %v1622_v47  ;;  %v5816_v41 = vld [vmem:[%s8820_s3 + $0x48] sm:$0xff]  ;;  %v7085_v48 = vpop.f32.mrf.mxu1 }
 0x164   : > { %v1020_v52 = vsel %vm984_vm5, %v919_v50, 0.0 }
 0x165   : > { %v5955_v53 = vpack.c.bf16 %v6839_v19, %v1020_v52 }
 0x167   : > { %6351 = vst [vmem:[#allocation2 + $0x38] sm:$0xff] %v5955_v53   ;;  %v780_v54 = vpop.f32.mrf.mxu0 }
 0x168   : > { %v1242_v54 = vld [vmem:[#allocation2 + $0xd0] sm:$0x1] }
 0x16e   : > { %6658 = vmatmul.msk.bf16.gmra.mxu1 %vm6874_vm4, %v6642_v17  ;;  %v5820_v17 = vld [vmem:[%s8820_s3 + $0x68] sm:$0xff] }
 0x16f   : > { %v783_v56 = vpop.f32.mrf.mxu0  ;;  %3469 = vmatpush.bf16.msrb.mxu2 %v5820_v17 }
 0x170   : > { %v784_v57 = vadd.f32 %v6858_v28, %v783_v56 }
 0x172   : > { %5370 = vmatmul.msk.bf16.gmra.mxu0 %vm591_vm1, %v5793_v55  ;;  %v921_v58 = vmax.f32 %v784_v57, 0.0  ;;  %v1516_v57 = vunpack.c.l.b16 %v1242_v54 }
 0x173   : > { %3470 = vmatpush.bf16.msrb.mxu2 %v5819_v22 }
 0x174   : > { %v1022_v62 = vsel %vm970_vm2, %v921_v58, 0.0 }
 0x177   : > { %v785_v59 = vpop.f32.mrf.mxu0  ;;  %3471 = vmatpush.bf16.msrb.mxu2 %v5818_v27 }
 0x178   : > { %v786_v60 = vadd.f32 %v6858_v28, %v785_v59  ;;  %v7092_v59 = vpop.f32.mrf.mxu1 }
 0x17a   : > { %v922_v61 = vmax.f32 %v786_v60, 0.0  ;;  %v5798_v60 = vld [vmem:[%s6797_s16 + $0xd8] sm:$0xff] }
 0x17b   : > { %3472 = vmatpush.bf16.msrb.mxu2 %v5817_v35  ;;  %v1244_v35 = vld [vmem:[#allocation2 + $0x68] sm:$0x1] }
 0x17c   : > { %v7020_v63 = vpack.c.bf16 %v922_v61, %v1022_v62  ;;  %v6660_v3 = vpack.c.bf16 %v922_v61, %v921_v58  ;;  %v1552_v62 = vshll.u32 %v6843_v20, 16 }
 0x17e   : > { %6352 = vst [vmem:[#allocation2 + $0x8] sm:$0xff] %v7020_v63   ;;  %6661 = vmatmul.msk.bf16.gmra.mxu2 %vm6874_vm4, %v6660_v3  ;;  %6664 = vmatmul.msk.bf16.gmra.mxu1 %vm6874_vm4, %v6651_v45  ;;  %v5815_v45 = vld [vmem:[%s8820_s3 + $0x40] sm:$0xff] }
 0x17f   : > { %v788_v4 = vpop.f32.mrf.mxu0  ;;  %3473 = vmatpush.bf16.msrb.mxu2 %v5816_v41  ;;  %v1518_v41 = vunpack.c.l.b16 %v1244_v35 }
 0x180   : > { %v789_v5 = vadd.f32 %v6858_v28, %v788_v4 }
 0x182   : > { %v923_v7 = vmax.f32 %v789_v5, 0.0  ;;  %5371 = vmatmul.msk.bf16.gmra.mxu0 %vm591_vm1, %v5794_v2 }
 0x183   : > { %3474 = vmatpush.bf16.msrb.mxu2 %v5815_v45 }
 0x184   : > { %v1024_v8 = vsel %vm984_vm5, %v923_v7, 0.0  ;;  %v1550_v7 = vshrl.u32 %v6843_v20, 16 }
 0x185   : > { %v5965_v9 = vpack.c.bf16 %v6839_v19, %v1024_v8  ;;  %v1554_v8 = vrot.slane %v1552_v62, 1 }
 0x187   : > { %6353 = vst [vmem:[#allocation2 + $0x78] sm:$0xff] %v5965_v9   ;;  %v790_v10 = vpop.f32.mrf.mxu0 }
 0x18e   : > { %6667 = vmatmul.msk.bf16.gmra.mxu1 %vm6874_vm4, %v6660_v3  ;;  %v7101_v3 = vpack.c.b16 %v1516_v57, %v1516_v57 }
 0x18f   : > { %v793_v13 = vpop.f32.mrf.mxu0 }
 0x190   : > { %v794_v15 = vadd.f32 %v6858_v28, %v793_v13  ;;  %v1557_v9 = vshll.u32 %v7101_v3, 16 }
 0x192   : > { %5372 = vmatmul.msk.bf16.gmra.mxu0 %vm591_vm1, %v5795_v12  ;;  %v925_v43 = vmax.f32 %v794_v15, 0.0  ;;  %v1555_v12 = vor.u32 %v1554_v8, %v1550_v7  ;;  %v1559_v14 = vrot.slane %v1557_v9, 1  ;;  %v1243_v15 = vld [vmem:[#allocation2 + $0x48] sm:$0x1] }
 0x194   : > { %v1026_v25 = vsel %vm970_vm2, %v925_v43, 0.0  ;;  %v1560_v17 = vsel %vm1548_vm6, %v1555_v12, %v1559_v14 }
 0x197   : > { %v795_v18 = vpop.f32.mrf.mxu0 }
 0x198   : > { %v796_v21 = vadd.f32 %v6858_v28, %v795_v18  ;;  %v5799_v18 = vld [vmem:[%s6797_s16 + $0xe0] sm:$0xff] }
 0x19a   : > { %v926_v23 = vmax.f32 %v796_v21, 0.0 }
 0x19c   : > { %v7055_v26 = vpack.c.bf16 %v926_v23, %v1026_v25  ;;  %v6669_v31 = vpack.c.bf16 %v926_v23, %v925_v43  ;;  %v1517_v43 = vunpack.c.l.b16 %v1243_v15  ;;  %v7116_v23 = vpop.f32.mrf.mxu1 }
 0x19e   : > { %6354 = vst [vmem:[#allocation2 + $0x20] sm:$0xff] %v7055_v26   ;;  %6670 = vmatmul.msk.bf16.gmra.mxu2 %vm6874_vm4, %v6669_v31  ;;  %6673 = vmatmul.msk.bf16.gmra.mxu1 %vm6874_vm4, %v6669_v31  ;;  %v7112_v21 = vpack.c.b16 %v1517_v43, %v1517_v43 }
 0x19f   : > { %v798_v33 = vpop.f32.mrf.mxu0 }
 0x1a0   : > { %v799_v34 = vadd.f32 %v6858_v28, %v798_v33  ;;  %v1569_v25 = vshll.u32 %v7112_v21, 16 }
 0x1a2   : > { %v927_v36 = vmax.f32 %v799_v34, 0.0  ;;  %5373 = vmatmul.msk.bf16.gmra.mxu0 %vm591_vm1, %v5796_v0  ;;  %v1571_v33 = vrot.slane %v1569_v25, 1  ;;  %v5802_v25 = vld [vmem:[%s6797_s16 + $0xf8] sm:$0xff] }
 0x1a4   : > { %v1028_v38 = vsel %vm984_vm5, %v927_v36, 0.0 }
 0x1a5   : > { %v5975_v40 = vpack.c.bf16 %v6839_v19, %v1028_v38 }
 0x1a7   : > { %6355 = vst [vmem:[#allocation2 + $0xc8] sm:$0xff] %v5975_v40   ;;  %v800_v44 = vpop.f32.mrf.mxu0  ;;  %v1572_v40 = vsel %vm1548_vm6, %v6886_v49, %v1571_v33 }
 0x1a8   : > { %v5800_v44 = vld [vmem:[%s6797_s16 + $0xe8] sm:$0xff] }
 0x1af   : > { %v803_v46 = vpop.f32.mrf.mxu0 }
 0x1b0   : > { %v804_v47 = vadd.f32 %v6858_v28, %v803_v46 }
 0x1b2   : > { %5374 = vmatmul.msk.bf16.gmra.mxu0 %vm591_vm1, %v5797_v29  ;;  %v929_v50 = vmax.f32 %v804_v47, 0.0  ;;  %v7130_v29 = vpop.f32.mrf.mxu1 }
 0x1b4   : > { %v1030_v56 = vsel %vm970_vm2, %v929_v50, 0.0 }
 0x1b7   : > { %v805_v52 = vpop.f32.mrf.mxu0 }
 0x1b8   : > { %v806_v53 = vadd.f32 %v6858_v28, %v805_v52 }
 0x1ba   : > { %v930_v55 = vmax.f32 %v806_v53, 0.0  ;;  %v7149_v8 = vpop.f32.mrf.mxu1 }
 0x1bc   : > { %v7090_v58 = vpack.c.bf16 %v930_v55, %v1030_v56  ;;  %v6675_v61 = vpack.c.bf16 %v930_v55, %v929_v50  ;;  %v7135_v50 = vpack.c.b16 %v1518_v41, %v1518_v41 }
 0x1be   : > { %6356 = vst [vmem:[#allocation2 + $0x90] sm:$0xff] %v7090_v58   ;;  %6676 = vmatmul.msk.bf16.gmra.mxu2 %vm6874_vm4, %v6675_v61  ;;  %6679 = vmatmul.msk.bf16.gmra.mxu1 %vm6874_vm4, %v6675_v61  ;;  %v1581_v55 = vshll.u32 %v7135_v50, 16 }
 0x1bf   : > { %v808_v2 = vpop.f32.mrf.mxu0 }
 0x1c0   : > { %v809_v4 = vadd.f32 %v6858_v28, %v808_v2  ;;  %v1583_v57 = vrot.slane %v1581_v55, 1  ;;  %v5801_v2 = vld [vmem:[%s6797_s16 + $0xf0] sm:$0xff]  ;;  %v5803_v55 = vld [vmem:[%s6797_s16 + $0x100] sm:$0xff] }
 0x1c2   : > { %v931_v5 = vmax.f32 %v809_v4, 0.0  ;;  %5375 = vmatmul.msk.bf16.gmra.mxu0 %vm591_vm1, %v5798_v60  ;;  %v1245_v60 = vld [vmem:[#allocation2 + $0x18] sm:$0x1]  ;;  %v1584_v61 = vsel %vm1548_vm6, %v6905_v6, %v1583_v57 }
 0x1c3   : > { %v1519_v62 = vunpack.c.l.b16 %v1245_v60 }
 0x1c4   : > { %v1032_v10 = vsel %vm984_vm5, %v931_v5, 0.0 }
 0x1c5   : > { %v5985_v11 = vpack.c.bf16 %v6839_v19, %v1032_v10  ;;  %v7145_v5 = vpack.c.b16 %v1519_v62, %v1519_v62 }
 0x1c7   : > { %6357 = vst [vmem:[#allocation2 + $0xa0] sm:$0xff] %v5985_v11   ;;  %v810_v13 = vpop.f32.mrf.mxu0  ;;  %v1593_v9 = vshll.u32 %v7145_v5, 16 }
 0x1c8   : > { %v7153_v13 = vpop.f32.mrf.mxu2 }
 0x1c9   : > { %v1595_v14 = vrot.slane %v1593_v9, 1 }
 0x1ce   : > { %3475 = vmatmul.bf16.vlgmr.msrb.gmra.mxu2 %v1560_v17  ;;  %v1246_v17 = vld [vmem:[#allocation2 + $0x110] sm:$0x1] }
 0x1cf   : > { %v813_v20 = vpop.f32.mrf.mxu0 }
 0x1d0   : > { %v814_v22 = vadd.f32 %v6858_v28, %v813_v20  ;;  %v1596_v20 = vsel %vm1548_vm6, %v6942_v37, %v1595_v14  ;;  %v1248_v14 = vld [vmem:[#allocation2 + $0x38] sm:$0x1] }
 0x1d2   : > { %5376 = vmatmul.msk.bf16.gmra.mxu0 %vm591_vm1, %v5799_v18  ;;  %v933_v27 = vmax.f32 %v814_v22, 0.0  ;;  %v1520_v22 = vunpack.c.l.b16 %v1246_v17 }
 0x1d4   : > { %v1034_v36 = vsel %vm970_vm2, %v933_v27, 0.0 }
 0x1d7   : > { %v815_v0 = vpop.f32.mrf.mxu0 }
 0x1d8   : > { %v816_v31 = vadd.f32 %v6858_v28, %v815_v0  ;;  %v7165_v0 = vpop.f32.mrf.mxu1 }
 0x1da   : > { %v934_v34 = vmax.f32 %v816_v31, 0.0 }
 0x1dc   : > { %v7122_v38 = vpack.c.bf16 %v934_v34, %v1034_v36  ;;  %v6681_v45 = vpack.c.bf16 %v934_v34, %v933_v27  ;;  %v7170_v34 = vpack.c.b16 %v1520_v22, %v1520_v22  ;;  %v7173_v36 = vpop.f32.mrf.mxu2  ;;  %v1522_v22 = vunpack.c.l.b16 %v1248_v14 }
 0x1dd   : > { %8844 = vst [vmem:[#allocation5_spill] sm:$0xff] %v7173_v36 }
 0x1de   : > { %6358 = vst [vmem:[#allocation2 + $0x70] sm:$0xff] %v7122_v38   ;;  %6682 = vmatmul.msk.bf16.vlgmr.msra.gmra.mxu3 %vm6874_vm4, %v6681_v45  ;;  %3480 = vmatmul.bf16.gmra.mxu2 %v1572_v40 }
 0x1df   : > { %v818_v46 = vpop.f32.mrf.mxu0  ;;  %6685 = vmatmul.msk.bf16.gmra.mxu1 %vm6874_vm4, %v6681_v45 }
 0x1e0   : > { %v819_v47 = vadd.f32 %v6858_v28, %v818_v46  ;;  %v7191_v62 = vpop.f32.mrf.mxu1 }
 0x1e2   : > { %v935_v52 = vmax.f32 %v819_v47, 0.0  ;;  %5377 = vmatmul.msk.bf16.gmra.mxu0 %vm591_vm1, %v5800_v44  ;;  %v1605_v44 = vshll.u32 %v7170_v34, 16  ;;  %v1247_v47 = vld [vmem:[#allocation2 + $0x98] sm:$0x1] }
 0x1e4   : > { %v1036_v53 = vsel %vm984_vm5, %v935_v52, 0.0  ;;  %v1607_v46 = vrot.slane %v1605_v44, 1  ;;  %v7179_v52 = vpop.f32.mrf.mxu2 }
 0x1e5   : > { %v5995_v54 = vpack.c.bf16 %v6839_v19, %v1036_v53 }
 0x1e6   : > { %v1608_v53 = vsel %vm1548_vm6, %v6964_v1, %v1607_v46 }
 0x1e7   : > { %6359 = vst [vmem:[#allocation2 + $0x58] sm:$0xff] %v5995_v54   ;;  %v820_v56 = vpop.f32.mrf.mxu0  ;;  %v1521_v54 = vunpack.c.l.b16 %v1247_v47 }
 0x1e9   : > { %v7184_v57 = vpack.c.b16 %v1521_v54, %v1521_v54 }
 0x1ee   : > { %3485 = vmatmul.bf16.gmra.mxu2 %v1584_v61  ;;  %v5830_v61 = vld [vmem:[%s8820_s3 + $0xb8] sm:$0xff] }
 0x1ef   : > { %v823_v4 = vpop.f32.mrf.mxu0  ;;  %3556 = vmatpush.bf16.msrb.mxu3 %v5830_v61 }
 0x1f0   : > { %v824_v7 = vadd.f32 %v6858_v28, %v823_v4  ;;  %v1617_v4 = vshll.u32 %v7184_v57, 16 }
 0x1f2   : > { %5378 = vmatmul.msk.bf16.gmra.mxu0 %vm591_vm1, %v5801_v2  ;;  %v937_v10 = vmax.f32 %v824_v7, 0.0  ;;  %v7193_v2 = vpop.f32.mrf.mxu2 }
 0x1f3   : > { %8845 = vst [vmem:[#allocation6_spill] sm:$0xff] %v7193_v2  ;;  %v1252_v2 = vld [vmem:[#allocation2 + $0x58] sm:$0x1] }
 0x1f4   : > { %v1038_v43 = vsel %vm970_vm2, %v937_v10, 0.0 }
 0x1f7   : > { %v825_v11 = vpop.f32.mrf.mxu0 }
 0x1f8   : > { %v826_v12 = vadd.f32 %v6858_v28, %v825_v11  ;;  %v1619_v11 = vrot.slane %v1617_v4, 1 }
 0x1fa   : > { %v938_v15 = vmax.f32 %v826_v12, 0.0 }
 0x1fc   : > { %v7157_v18 = vpack.c.bf16 %v938_v15, %v1038_v43  ;;  %v6687_v27 = vpack.c.bf16 %v938_v15, %v937_v10 }
 0x1fe   : > { %6360 = vst [vmem:[#allocation2 + $0xe0] sm:$0xff] %v7157_v18   ;;  %6688 = vmatmul.msk.bf16.gmra.mxu3 %vm6874_vm4, %v6687_v27  ;;  %3490 = vmatmul.bf16.gmra.mxu2 %v1596_v20  ;;  %v1620_v20 = vsel %vm1548_vm6, %v6986_v24, %v1619_v11  ;;  %v1636_v11 = vshll.u32 %v7020_v63, 16 }
 0x1ff   : > { %v828_v31 = vpop.f32.mrf.mxu0  ;;  %6691 = vmatmul.msk.bf16.gmra.mxu1 %vm6874_vm4, %v6687_v27  ;;  %v7208_v27 = vpop.f32.mrf.mxu1 }
 0x200   : > { %v829_v33 = vadd.f32 %v6858_v28, %v828_v31  ;;  %8846 = vst [vmem:[#allocation7_spill] sm:$0xff] %v7208_v27 }
 0x201   : > { %v7201_v43 = vpop.f32.mrf.mxu2 }
 0x202   : > { %v939_v35 = vmax.f32 %v829_v33, 0.0  ;;  %5379 = vmatmul.msk.bf16.gmra.mxu0 %vm591_vm1, %v5802_v25 }
 0x204   : > { %v1040_v40 = vsel %vm984_vm5, %v939_v35, 0.0  ;;  %v7213_v35 = vpack.c.b16 %v1522_v22, %v1522_v22 }
 0x205   : > { %v6005_v41 = vpack.c.bf16 %v6839_v19, %v1040_v40 }
 0x207   : > { %6361 = vst [vmem:[#allocation2 + $0x60] sm:$0xff] %v6005_v41   ;;  %v830_v45 = vpop.f32.mrf.mxu0 }
 0x208   : > { %v1629_v45 = vshll.u32 %v7213_v35, 16 }
 0x209   : > { %v7219_v46 = vpop.f32.mrf.mxu2 }
 0x20a   : > { %8847 = vst [vmem:[#allocation8_spill] sm:$0xff] %v7219_v46  ;;  %v1631_v54 = vrot.slane %v1629_v45, 1  ;;  %v1250_v45 = vld [vmem:[#allocation2 + $0xc8] sm:$0x1] }
 0x20e   : > { %3495 = vmatmul.bf16.gmra.mxu2 %v1608_v53  ;;  %v5829_v53 = vld [vmem:[%s8820_s3 + $0xb0] sm:$0xff] }
 0x20f   : > { %v833_v56 = vpop.f32.mrf.mxu0  ;;  %3557 = vmatpush.bf16.msrb.mxu3 %v5829_v53 }
 0x210   : > { %v834_v60 = vadd.f32 %v6858_v28, %v833_v56  ;;  %v1249_v56 = vld [vmem:[#allocation2 + $0x78] sm:$0x1] }
 0x211   : > { %v1523_v61 = vunpack.c.l.b16 %v1249_v56  ;;  %v1524_v56 = vunpack.c.l.b16 %v1250_v45  ;;  %v5826_v45 = vld [vmem:[%s8820_s3 + $0x98] sm:$0xff] }
 0x212   : > { %5380 = vmatmul.msk.bf16.gmra.mxu0 %vm591_vm1, %v5803_v55  ;;  %v941_v7 = vmax.f32 %v834_v60, 0.0  ;;  %v5828_v55 = vld [vmem:[%s8820_s3 + $0xa8] sm:$0xff]  ;;  %v1632_v60 = vsel %vm1548_vm6, %v7007_v51, %v1631_v54 }
 0x213   : > { %3558 = vmatpush.bf16.msrb.mxu3 %v5828_v55 }
 0x214   : > { %v1042_v15 = vsel %vm970_vm2, %v941_v7, 0.0 }
 0x217   : > { %v835_v9 = vpop.f32.mrf.mxu0 }
 0x218   : > { %v836_v10 = vadd.f32 %v6858_v28, %v835_v9  ;;  %v7231_v9 = vpop.f32.mrf.mxu1 }
 0x219   : > { %8848 = vst [vmem:[#allocation9_spill] sm:$0xff] %v7231_v9 }
 0x21a   : > { %v942_v12 = vmax.f32 %v836_v10, 0.0  ;;  %v7233_v10 = vpack.c.b16 %v1523_v61, %v1523_v61 }
 0x21c   : > { %v7199_v17 = vpack.c.bf16 %v942_v12, %v1042_v15  ;;  %v6693_v25 = vpack.c.bf16 %v942_v12, %v941_v7  ;;  %v1641_v14 = vshll.u32 %v7233_v10, 16  ;;  %v1638_v15 = vrot.slane %v1636_v11, 1 }
 0x21e   : > { %6362 = vst [vmem:[#allocation2 + $0xa8] sm:$0xff] %v7199_v17   ;;  %6694 = vmatmul.msk.bf16.gmra.mxu3 %vm6874_vm4, %v6693_v25  ;;  %3500 = vmatmul.bf16.gmra.mxu2 %v1620_v20 }
 0x21f   : > { %v838_v31 = vpop.f32.mrf.mxu0  ;;  %6697 = vmatmul.msk.bf16.gmra.mxu1 %vm6874_vm4, %v6693_v25 }
 0x220   : > { %v839_v33 = vadd.f32 %v6858_v28, %v838_v31  ;;  %v1634_v31 = vshrl.u32 %v7020_v63, 16 }
 0x221   : > { %v7229_v4 = vpop.f32.mrf.mxu2 }
 0x222   : > { %v943_v40 = vmax.f32 %v839_v33, 0.0 }
 0x224   : > { %v1044_v41 = vsel %vm984_vm5, %v943_v40, 0.0  ;;  %v1643_v40 = vrot.slane %v1641_v14, 1 }
 0x225   : > { %v6015_v44 = vpack.c.bf16 %v6839_v19, %v1044_v41  ;;  %v7242_v41 = vpop.f32.mrf.mxu1 }
 0x226   : > { %8850 = vst [vmem:[#allocation11_spill] sm:$0xff] %v7242_v41 }
 0x227   : > { %6363 = vst [vmem:[#allocation2 + $0x88] sm:$0xff] %v6015_v44   ;;  %v840_v47 = vpop.f32.mrf.mxu0 }
 0x228   : > { %v7244_v47 = vor.u32 %v1638_v15, %v1634_v31  ;;  %v1648_v15 = vshll.u32 %v7055_v26, 16 }
 0x229   : > { %v7240_v33 = vpop.f32.mrf.mxu2 }
 0x22a   : > { %8849 = vst [vmem:[#allocation10_spill] sm:$0xff] %v7240_v33  ;;  %v1644_v55 = vsel %vm1548_vm6, %v7244_v47, %v1643_v40  ;;  %v1650_v40 = vrot.slane %v1648_v15, 1 }
 0x22e   : > { %3505 = vmatmul.bf16.gmra.mxu2 %v1632_v60  ;;  %v5827_v60 = vld [vmem:[%s8820_s3 + $0xa0] sm:$0xff]  ;;  %v1254_v9 = vld [vmem:[#allocation2 + $0x88] sm:$0x1] }
 0x22f   : > { %v843_v7 = vpop.f32.mrf.mxu0  ;;  %3559 = vmatpush.bf16.msrb.mxu3 %v5827_v60 }
 0x230   : > { %v844_v12 = vadd.f32 %v6858_v28, %v843_v7 }
 0x232   : > { %v945_v20 = vmax.f32 %v844_v12, 0.0  ;;  %v7263_v12 = vpack.c.b16 %v1524_v56, %v1524_v56 }
 0x233   : > { %3560 = vmatpush.bf16.msrb.mxu3 %v5826_v45 }
 0x234   : > { %v1046_v53 = vsel %vm970_vm2, %v945_v20, 0.0  ;;  %v1653_v31 = vshll.u32 %v7263_v12, 16 }
 0x236   : > { %v1655_v56 = vrot.slane %v1653_v31, 1 }
 0x237   : > { %v845_v22 = vpop.f32.mrf.mxu0 }
 0x238   : > { %v846_v25 = vadd.f32 %v6858_v28, %v845_v22 }
 0x23a   : > { %v946_v44 = vmax.f32 %v846_v25, 0.0 }
 0x23c   : > { %v7248_v54 = vpack.c.bf16 %v946_v44, %v1046_v53  ;;  %v6699_v63 = vpack.c.bf16 %v946_v44, %v945_v20  ;;  %v7266_v20 = vpop.f32.mrf.mxu1  ;;  %v1646_v53 = vshrl.u32 %v7055_v26, 16 }
 0x23d   : > { %8851 = vst [vmem:[#allocation12_spill] sm:$0xff] %v7266_v20 }
 0x23e   : > { %6364 = vst [vmem:[#allocation2 + $0xd8] sm:$0xff] %v7248_v54   ;;  %6700 = vmatmul.msk.bf16.gmra.mxu3 %vm6874_vm4, %v6699_v63  ;;  %3510 = vmatmul.bf16.gmra.mxu2 %v1644_v55  ;;  %v7278_v60 = vor.u32 %v1650_v40, %v1646_v53  ;;  %v5825_v53 = vld [vmem:[%s8820_s3 + $0x90] sm:$0xff] }
 0x23f   : > { %v848_v61 = vpop.f32.mrf.mxu0  ;;  %6703 = vmatmul.msk.bf16.gmra.mxu1 %vm6874_vm4, %v6699_v63  ;;  %v1251_v63 = vld [vmem:[#allocation2 + $0xa0] sm:$0x1]  ;;  %3561 = vmatpush.bf16.msrb.mxu3 %v5825_v53 }
 0x240   : > { %v849_v7 = vadd.f32 %v6858_v28, %v848_v61  ;;  %v7283_v61 = vld [vmem:[%s8821_s4] ss:$0 sm:$0xff] }
 0x241   : > { %v7261_v11 = vpop.f32.mrf.mxu2  ;;  %v3388_v15 = vadd.f32 %v7283_v61, %v7044_v16 }
 0x242   : > { %v947_v14 = vmax.f32 %v849_v7, 0.0  ;;  %v1656_v7 = vsel %vm1548_vm6, %v7278_v60, %v1655_v56 }
 0x244   : > { %v1048_v22 = vsel %vm984_vm5, %v947_v14, 0.0  ;;  %v1525_v14 = vunpack.c.l.b16 %v1251_v63  ;;  %v7289_v26 = vpop.f32.mrf.mxu1 }
 0x245   : > { %v6025_v25 = vpack.c.bf16 %v6839_v19, %v1048_v22  ;;  %8852 = vst [vmem:[#allocation13_spill] sm:$0xff] %v7289_v26 }
 0x246   : > { %v7291_v31 = vpack.c.b16 %v1525_v14, %v1525_v14 }
 0x247   : > { %6365 = vst [vmem:[#allocation2 + $0xc0] sm:$0xff] %v6025_v25   ;;  %v850_v44 = vpop.f32.mrf.mxu0 }
 0x248   : > { %v1660_v44 = vshll.u32 %v7090_v58, 16  ;;  %v1665_v56 = vshll.u32 %v7291_v31, 16 }
 0x249   : > { %v7276_v55 = vpop.f32.mrf.mxu2 }
 0x24a   : > { %v1662_v16 = vrot.slane %v1660_v44, 1  ;;  %v1667_v46 = vrot.slane %v1665_v56, 1 }
 0x24c   : > { %v7301_v33 = vpop.f32.mrf.mxu1 }
 0x24d   : > { %8853 = vst [vmem:[#allocation14_spill] sm:$0xff] %v7301_v33 }
 0x24e   : > { %3515 = vmatmul.bf16.gmra.mxu2 %v1656_v7 }
 0x24f   : > { %v853_v22 = vpop.f32.mrf.mxu0 }
 0x250   : > { %v854_v45 = vadd.f32 %v6858_v28, %v853_v22 }
 0x251   : > { %v3476_v25 = vpop.f32.mrf.mxu2 }
 0x252   : > { %v7293_v40 = vadd.f32 %v3476_v25, %v3388_v15  ;;  %v949_v63 = vmax.f32 %v854_v45, 0.0  ;;  %v1658_v15 = vshrl.u32 %v7090_v58, 16  ;;  %v1526_v45 = vunpack.c.l.b16 %v1252_v2  ;;  %v5824_v58 = vld [vmem:[%s8820_s3 + $0x88] sm:$0xff] }
 0x253   : > { %3562 = vmatpush.bf16.msrb.mxu3 %v5824_v58  ;;  %v1670_v58 = vshrl.u32 %v7122_v38, 16 }
 0x254   : > { %v7307_v26 = vor.u32 %v1662_v16, %v1658_v15  ;;  %v1050_v36 = vsel %vm970_vm2, %v949_v63, 0.0  ;;  %v7326_v16 = vpack.c.b16 %v1526_v45, %v1526_v45  ;;  %v5823_v45 = vld [vmem:[%s8820_s3 + $0x80] sm:$0xff] }
 0x256   : > { %v1668_v44 = vsel %vm1548_vm6, %v7307_v26, %v1667_v46 }
 0x257   : > { %v855_v7 = vpop.f32.mrf.mxu0  ;;  %3563 = vmatpush.bf16.msrb.mxu3 %v5823_v45 }
 0x258   : > { %v856_v14 = vadd.f32 %v6858_v28, %v855_v7 }
 0x259   : > { %v7305_v25 = vpop.f32.mrf.mxu2 }
 0x25a   : > { %v950_v22 = vmax.f32 %v856_v14, 0.0 }
 0x25c   : > { %v7311_v53 = vpack.c.bf16 %v950_v22, %v1050_v36  ;;  %v6705_v7 = vpack.c.bf16 %v950_v22, %v949_v63  ;;  %v3393_v36 = vadd.f32 %v7283_v61, %v7085_v48  ;;  %v7328_v63 = vpop.f32.mrf.mxu1  ;;  %v1672_v22 = vshll.u32 %v7122_v38, 16 }
 0x25d   : > { %8854 = vst [vmem:[#allocation15_spill] sm:$0xff] %v7328_v63  ;;  %v1677_v48 = vshll.u32 %v7326_v16, 16  ;;  %v3398_v38 = vadd.f32 %v7283_v61, %v7116_v23  ;;  %v5846_v23 = vld [vmem:[%s8820_s3 + $0x138] sm:$0xff] }
 0x25e   : > { %6366 = vst [vmem:[#allocation2 + $0x50] sm:$0xff] %v7311_v53   ;;  %6706 = vmatmul.msk.bf16.gmra.mxu3 %vm6874_vm4, %v6705_v7  ;;  %3520 = vmatmul.bf16.gmra.mxu2 %v1668_v44  ;;  %v1674_v33 = vrot.slane %v1672_v22, 1 }
 0x25f   : > { %v858_v56 = vpop.f32.mrf.mxu0  ;;  %6709 = vmatmul.msk.bf16.gmra.mxu1 %vm6874_vm4, %v6705_v7  ;;  %3734 = vmatpush.bf16.msra.mxu2 %v5846_v23  ;;  %v5859_v23 = vld [vmem:[%s8820_s3 + $0x1a0] sm:$0xff] }
 0x260   : > { %v859_v2 = vadd.f32 %v6858_v28, %v858_v56 }
 0x261   : > { %v3481_v46 = vpop.f32.mrf.mxu2 }
 0x262   : > { %v951_v14 = vmax.f32 %v859_v2, 0.0  ;;  %v7330_v15 = vadd.f32 %v3481_v46, %v3393_v36  ;;  %v1679_v36 = vrot.slane %v1677_v48, 1  ;;  %v1253_v2 = vld [vmem:[#allocation2 + $0x60] sm:$0x1]  ;;  %v7343_v46 = vor.u32 %v1674_v33, %v1670_v58  ;;  %v5861_v58 = vld [vmem:[%s8820_s3 + $0x1b0] sm:$0xff] }
 0x264   : > { %v1052_v44 = vsel %vm984_vm5, %v951_v14, 0.0  ;;  %8855 = vst [vmem:[#allocation16_spill] sm:$0xff] %v7343_v46  ;;  %v7345_v14 = vpop.f32.mrf.mxu1  ;;  %v1680_v22 = vsel %vm1548_vm6, %v7343_v46, %v1679_v36  ;;  %v1684_v36 = vshll.u32 %v7157_v18, 16  ;;  %v1682_v46 = vshrl.u32 %v7157_v18, 16 }
 0x265   : > { %v6035_v7 = vpack.c.bf16 %v6839_v19, %v1052_v44  ;;  %8856 = vst [vmem:[#allocation17_spill] sm:$0xff] %v7345_v14  ;;  %v1527_v44 = vunpack.c.l.b16 %v1253_v2  ;;  %v7365_v2 = vld [vmem:[%s8819_s2] ss:$0 sm:$0xff] }
 0x267   : > { %6367 = vst [vmem:[#allocation2 + $0xf0] sm:$0xff] %v6035_v7   ;;  %v860_v28 = vpop.f32.mrf.mxu0  ;;  %v5862_v7 = vld [vmem:[%s8820_s3 + $0x1b8] sm:$0xff]  ;;  %v7354_v45 = vpack.c.b16 %v1527_v44, %v1527_v44 }
 0x268   : > { %3912 = vmatpush.bf16.msra.mxu1 %v5862_v7  ;;  %v5854_v44 = vld [vmem:[%s8820_s3 + $0x178] sm:$0xff] }
 0x269   : > { %v7341_v56 = vpop.f32.mrf.mxu2  ;;  %v1689_v7 = vshll.u32 %v7354_v45, 16  ;;  %3823 = vmatpush.bf16.msra.mxu3 %v5854_v44 }
 0x26c   : > { %3913 = vmatpush.bf16.msra.mxu1 %v5861_v58  ;;  %v1691_v58 = vrot.slane %v1689_v7, 1 }
 0x26e   : > { %3525 = vmatmul.bf16.gmra.mxu2 %v1680_v22 }
 0x26f   : > { %v863_v28 = vpop.f32.mrf.mxu0 }
 0x270   : > { %v864_v22 = vadd.f32 %v7365_v2, %v863_v28  ;;  %v1686_v28 = vrot.slane %v1684_v36, 1 }
 0x271   : > { %v3486_v48 = vpop.f32.mrf.mxu2 }
 0x272   : > { %v7356_v33 = vadd.f32 %v3486_v48, %v3398_v38  ;;  %v7375_v38 = vpop.f32.mrf.mxu1  ;;  %v5860_v48 = vld [vmem:[%s8820_s3 + $0x1a8] sm:$0xff]  ;;  %v953_v14 = vmax.f32 %v864_v22, 0.0  ;;  %v7387_v44 = vor.u32 %v1686_v28, %v1682_v46  ;;  %v5858_v46 = vld [vmem:[%s8820_s3 + $0x198] sm:$0xff] }
 0x273   : > { %8857 = vst [vmem:[#allocation18_spill] sm:$0xff] %v7375_v38  ;;  %3914 = vmatpush.bf16.msra.mxu1 %v5860_v48  ;;  %v3403_v48 = vadd.f32 %v7283_v61, %v7149_v8  ;;  %v1696_v38 = vshll.u32 %v7199_v17, 16 }
 0x274   : > { %8858 = vst [vmem:[#allocation19_spill] sm:$0xff] %v7387_v44  ;;  %v1054_v36 = vsel %vm970_vm2, %v953_v14, 0.0  ;;  %v1692_v18 = vsel %vm1548_vm6, %v7387_v44, %v1691_v58  ;;  %v1255_v44 = vld [vmem:[#allocation2 + $0xc0] sm:$0x1] }
 0x277   : > { %v865_v63 = vpop.f32.mrf.mxu0  ;;  %3915 = vmatpush.bf16.msra.mxu1 %v5859_v23 }
 0x278   : > { %v866_v20 = vadd.f32 %v7365_v2, %v865_v63  ;;  %v1528_v63 = vunpack.c.l.b16 %v1254_v9 }
 0x279   : > { %v7382_v41 = vpop.f32.mrf.mxu2 }
 0x27a   : > { %v954_v27 = vmax.f32 %v866_v20, 0.0  ;;  %v7405_v28 = vpop.f32.mrf.mxu1  ;;  %v7408_v23 = vpack.c.b16 %v1528_v63, %v1528_v63 }
 0x27b   : > { %8859 = vst [vmem:[#allocation20_spill] sm:$0xff] %v7405_v28  ;;  %3916 = vmatpush.bf16.msra.mxu1 %v5858_v46  ;;  %v5856_v46 = vld [vmem:[%s8820_s3 + $0x188] sm:$0xff] }
 0x27c   : > { %v7391_v22 = vpack.c.bf16 %v954_v27, %v1054_v36  ;;  %v6711_v20 = vpack.c.bf16 %v954_v27, %v953_v14  ;;  %v6419_v27 = vld [vmem:[#allocation2 + $0xb0] sm:$0xf0]  ;;  %v6420_v14 = vld [vmem:[#allocation2 + $0xb0] sm:$0xe] }
 0x27d   : > { %v6421_v8 = vor.u32 %v6420_v14, %v6419_v27  ;;  %v1807_v14 = vrot.slane %v7101_v3, 1  ;;  %v5845_v3 = vld [vmem:[%s8820_s3 + $0x130] sm:$0xff] }
 0x27e   : > { %6368 = vst [vmem:[#allocation2 + $0xb8] sm:$0xff] %v7391_v22   ;;  %6712 = vmatmul.msk.bf16.gmra.mxu3 %vm6874_vm4, %v6711_v20  ;;  %3530 = vmatmul.bf16.gmra.mxu2 %v1692_v18 }
 0x27f   : > { %v868_v7 = vpop.f32.mrf.mxu0  ;;  %6715 = vmatmul.msk.bf16.gmra.mxu1 %vm6874_vm4, %v6711_v20  ;;  %v5857_v20 = vld [vmem:[%s8820_s3 + $0x190] sm:$0xff]  ;;  %v1806_v27 = vrot.slane %v6421_v8, 1  ;;  %3735 = vmatpush.bf16.msra.mxu2 %v5845_v3 }
 0x280   : > { %v869_v9 = vadd.f32 %v7365_v2, %v868_v7  ;;  %3917 = vmatpush.bf16.msra.mxu1 %v5857_v20  ;;  %v1701_v7 = vshll.u32 %v7408_v23, 16  ;;  %v6423_v3 = vld [vmem:[#allocation2 + $0x10] sm:$0xe] }
 0x281   : > { %v3491_v58 = vpop.f32.mrf.mxu2 }
 0x282   : > { %v955_v36 = vmax.f32 %v869_v9, 0.0  ;;  %v7410_v18 = vadd.f32 %v3491_v58, %v3403_v48  ;;  %v4820_v48 = vld [vmem:[%s8824_s7] sm:$0x3]  ;;  %v1698_v9 = vrot.slane %v1696_v38, 1  ;;  %v1703_v39 = vrot.slane %v1701_v7, 1  ;;  %v5853_v7 = vld [vmem:[%s8820_s3 + $0x170] sm:$0xff] }
 0x283   : > { %v5855_v38 = vld [vmem:[%s8820_s3 + $0x180] sm:$0xff]  ;;  %3824 = vmatpush.bf16.msra.mxu3 %v5853_v7 }
 0x284   : > { %v1056_v28 = vsel %vm984_vm5, %v955_v36, 0.0  ;;  %3918 = vmatpush.bf16.msra.mxu1 %v5856_v46  ;;  %v1694_v36 = vshrl.u32 %v7199_v17, 16  ;;  %v1808_v17 = vsel %vm1805_vm7, %v1806_v27, %v1807_v14 }
 0x285   : > { %v6045_v63 = vpack.c.bf16 %v6839_v19, %v1056_v28  ;;  %v4922_v28 = vsel %vm700_vm0, %v4820_v48, 0  ;;  %v7431_v19 = vpop.f32.mrf.mxu1 }
 0x286   : > { %8860 = vst [vmem:[#allocation21_spill] sm:$0xff] %v7431_v19  ;;  %v7439_v8 = vor.u32 %v1698_v9, %v1694_v36  ;;  %v3408_v9 = vadd.f32 %v7283_v61, %v7191_v62 }
 0x287   : > { %6369 = vst [vmem:[#allocation2 + $0x28] sm:$0xff] %v6045_v63   ;;  %v870_v58 = vpop.f32.mrf.mxu0  ;;  %v1529_v63 = vunpack.c.l.b16 %v1255_v44  ;;  %v1708_v44 = vshll.u32 %v7248_v54, 16 }
 0x288   : > { %8861 = vst [vmem:[#allocation22_spill] sm:$0xff] %v7439_v8  ;;  %3919 = vmatpush.bf16.msra.mxu1 %v5855_v38  ;;  %v1704_v46 = vsel %vm1548_vm6, %v7439_v8, %v1703_v39  ;;  %v5844_v39 = vld [vmem:[%s8820_s3 + $0x128] sm:$0xff]  ;;  %v6422_v38 = vld [vmem:[#allocation2 + $0x10] sm:$0xf0] }
 0x289   : > { %v7428_v20 = vpop.f32.mrf.mxu2  ;;  %v7450_v14 = vpack.c.b16 %v1529_v63, %v1529_v63  ;;  %3736 = vmatpush.bf16.msra.mxu2 %v5844_v39  ;;  %v6424_v63 = vor.u32 %v6423_v3, %v6422_v38  ;;  %v1256_v39 = vld [vmem:[#allocation2 + $0xf0] sm:$0x1] }
 0x28a   : > { %v1530_v3 = vunpack.c.l.b16 %v1256_v39  ;;  %v7497_v39 = vpop.f32.mrf.mxu3 }
 0x28b   : > { %v1809_v38 = vrot.slane %v6424_v63, 1 }
 0x28c   : > { %4931 = vmatpush.bf16.msrb.mxu1 %v4922_v28 }
 0x28d   : > { %v7458_v28 = vpop.f32.mrf.mxu1 }
 0x28e   : > { %3535 = vmatmul.bf16.gmra.mxu2 %v1704_v46  ;;  %3564 = vmatmul.bf16.vlgmr.msrb.gmra.mxu3 %v1808_v17  ;;  %8863 = vst [vmem:[#allocation24_spill] sm:$0xff] %v7458_v28  ;;  %v1713_v17 = vshll.u32 %v7450_v14, 16  ;;  %v1710_v46 = vrot.slane %v1708_v44, 1  ;;  %v1810_v28 = vrot.slane %v7112_v21, 1  ;;  %v5842_v21 = vld [vmem:[%s8820_s3 + $0x118] sm:$0xff] }
 0x28f   : > { %v873_v48 = vpop.f32.mrf.mxu0 }
 0x290   : > { %v874_v58 = vadd.f32 %v7365_v2, %v873_v48  ;;  %v1715_v8 = vrot.slane %v1713_v17, 1 }
 0x291   : > { %v3496_v27 = vpop.f32.mrf.mxu2 }
 0x292   : > { %v7452_v36 = vadd.f32 %v3496_v27, %v3408_v9  ;;  %v957_v62 = vmax.f32 %v874_v58, 0.0  ;;  %v1706_v9 = vshrl.u32 %v7248_v54, 16  ;;  %v5843_v58 = vld [vmem:[%s8820_s3 + $0x120] sm:$0xff]  ;;  %v1811_v54 = vsel %vm1805_vm7, %v1809_v38, %v1810_v28 }
 0x293   : > { %3737 = vmatpush.bf16.msra.mxu2 %v5843_v58  ;;  %v7485_v28 = vpack.c.b16 %v1530_v3, %v1530_v3  ;;  %v1813_v3 = vrot.slane %v7135_v50, 1  ;;  %v5852_v50 = vld [vmem:[%s8820_s3 + $0x168] sm:$0xff] }
 0x294   : > { %8862 = vst [vmem:[#allocation23_spill] sm:$0xff] %v7452_v36  ;;  %v1058_v27 = vsel %vm970_vm2, %v957_v62, 0.0  ;;  %v7471_v44 = vor.u32 %v1710_v46, %v1706_v9  ;;  %v1720_v9 = vshll.u32 %v7311_v53, 16  ;;  %3825 = vmatpush.bf16.msra.mxu3 %v5852_v50  ;;  %v1816_v50 = vrot.slane %v7145_v5, 1  ;;  %v5886_v5 = vld [vmem:[%s8822_s5 + $0x38] sm:$0xff] }
 0x295   : > { %v7476_v17 = vpop.f32.mrf.mxu1  ;;  %4295 = vmatpush.bf16.msrb.mxu0 %v5886_v5 }
 0x296   : > { %v1716_v32 = vsel %vm1548_vm6, %v7471_v44, %v1715_v8  ;;  %8864 = vst [vmem:[#allocation25_spill] sm:$0xff] %v7476_v17  ;;  %v6437_v17 = vld [vmem:[#allocation2 + $0xf8] sm:$0xf0] }
 0x297   : > { %v875_v7 = vpop.f32.mrf.mxu0  ;;  %3738 = vmatpush.bf16.msra.mxu2 %v5842_v21  ;;  %v1257_v21 = vld [vmem:[#allocation2 + $0x28] sm:$0x1] }
 0x298   : > { %v876_v48 = vadd.f32 %v7365_v2, %v875_v7  ;;  %v3413_v7 = vadd.f32 %v7283_v61, %v7153_v13  ;;  %v1725_v13 = vshll.u32 %v7485_v28, 16 }
 0x299   : > { %v7465_v19 = vpop.f32.mrf.mxu2 }
 0x29a   : > { %v958_v36 = vmax.f32 %v876_v48, 0.0  ;;  %v5841_v48 = vld [vmem:[%s8820_s3 + $0x110] sm:$0xff] }
 0x29b   : > { %3739 = vmatpush.bf16.msra.mxu2 %v5841_v48 }
 0x29c   : > { %v6050_v2 = vpack.c.bf16 %v958_v36, %v1058_v27  ;;  %v6717_v46 = vpack.c.bf16 %v958_v36, %v957_v62  ;;  %v6425_v27 = vld [vmem:[#allocation2 + $0x108] sm:$0xf0]  ;;  %v6426_v36 = vld [vmem:[#allocation2 + $0x108] sm:$0xe]  ;;  %v1722_v62 = vrot.slane %v1720_v9, 1 }
 0x29d   : > { %v6427_v58 = vor.u32 %v6426_v36, %v6425_v27  ;;  %v7499_v38 = vpop.f32.mrf.mxu1  ;;  %v6196_v27 = vld [vmem:[#allocation2 + $0x108] sm:$0xff]   ;;  %v3418_v36 = vadd.f32 %v7283_v61, %v7179_v52  ;;  %v1730_v52 = vshrl.u32 %v7391_v22, 16 }
 0x29e   : > { %6370 = vst [vmem:[#allocation2 + $0x100] sm:$0xff] %v6050_v2   ;;  %3540 = vmatmul.bf16.gmra.mxu2 %v1716_v32  ;;  %3569 = vmatmul.bf16.gmra.mxu3 %v1811_v54  ;;  %v1718_v2 = vshrl.u32 %v7311_v53, 16  ;;  %v1727_v54 = vrot.slane %v1725_v13, 1  ;;  %v1531_v53 = vunpack.c.l.b16 %v1257_v21  ;;  %v6429_v21 = vld [vmem:[#allocation2 + $0x30] sm:$0xe] }
 0x29f   : > { %6718 = vmatmul.msk.bf16.gmra.mxu1 %vm6874_vm4, %v6717_v46  ;;  %8865 = vst [vmem:[#allocation26_spill] sm:$0xff] %v7499_v38  ;;  %3740 = vmatpush.bf16.msra.mxu2 %v5840_v42  ;;  %v5839_v46 = vld [vmem:[%s8820_s3 + $0x100] sm:$0xff]  ;;  %v7518_v42 = vpop.f32.mrf.mxu3 }
 0x2a0   : > { %8866 = vst [vmem:[#allocation27_spill] sm:$0xff] %v7518_v42 }
 0x2a1   : > { %v3501_v8 = vpop.f32.mrf.mxu2 }
 0x2a2   : > { %v7487_v63 = vadd.f32 %v3501_v8, %v3413_v7  ;;  %v7508_v7 = vor.u32 %v1722_v62, %v1718_v2  ;;  %v1812_v8 = vrot.slane %v6427_v58, 1  ;;  %v7520_v62 = vpack.c.b16 %v1531_v53, %v1531_v53 }
 0x2a3   : > { %3741 = vmatpush.bf16.msra.mxu2 %v5839_v46 }
 0x2a4   : > { %v1728_v48 = vsel %vm1548_vm6, %v7508_v7, %v1727_v54  ;;  %v1814_v9 = vsel %vm1805_vm7, %v1812_v8, %v1813_v3  ;;  %v1732_v54 = vshll.u32 %v7391_v22, 16  ;;  %v6428_v3 = vld [vmem:[#allocation2 + $0x30] sm:$0xf0]  ;;  %v1737_v46 = vshll.u32 %v7520_v62, 16 }
 0x2a5   : > { %v7522_v58 = vpop.f32.mrf.mxu1  ;;  %v6404_v22 = vld [vmem:[#allocation2 + $0x30] sm:$0xff]  }
 0x2a6   : > { %8867 = vst [vmem:[#allocation28_spill] sm:$0xff] %v7522_v58  ;;  %v1734_v8 = vrot.slane %v1732_v54, 1  ;;  %v1739_v53 = vrot.slane %v1737_v46, 1  ;;  %v1307_v58 = vld [vmem:[#allocation2 + $0x48] sm:$0x1] }
 0x2a9   : > { %v7502_v32 = vpop.f32.mrf.mxu2 }
 0x2ad   : > { %v7536_v42 = vpop.f32.mrf.mxu1 }
 0x2ae   : > { %3545 = vmatmul.bf16.gmra.mxu2 %v1728_v48  ;;  %3574 = vmatmul.bf16.gmra.mxu3 %v1814_v9  ;;  %v6430_v48 = vor.u32 %v6429_v21, %v6428_v3  ;;  %v7529_v9 = vpop.f32.mrf.mxu3  ;;  %8869 = vst [vmem:[#allocation30_spill] sm:$0xff] %v7536_v42  ;;  %v1982_v3 = vunpack.c.l.b16 %v1307_v58  ;;  %v3423_v21 = vadd.f32 %v7283_v61, %v7201_v43  ;;  %v6431_v58 = vld [vmem:[#allocation2 + $0x80] sm:$0xf0]  ;;  %v1308_v42 = vld [vmem:[#allocation2 + $0x68] sm:$0x1] }
 0x2af   : > { %3920 = vmatmul.bf16.vlgmr.msra.gmra.mxu1 %v6196_v27 }
 0x2b1   : > { %v3506_v13 = vpop.f32.mrf.mxu2 }
 0x2b2   : > { %v7524_v2 = vadd.f32 %v3506_v13, %v3418_v36  ;;  %v7534_v36 = vor.u32 %v1734_v8, %v1730_v52  ;;  %v1815_v13 = vrot.slane %v6430_v48, 1  ;;  %v7546_v8 = vpack.c.b16 %v1982_v3, %v1982_v3 }
 0x2b4   : > { %8868 = vst [vmem:[#allocation29_spill] sm:$0xff] %v7534_v36  ;;  %v1740_v38 = vsel %vm1548_vm6, %v7534_v36, %v1739_v53  ;;  %v1817_v54 = vsel %vm1805_vm7, %v1815_v13, %v1816_v50  ;;  %v2022_v53 = vshll.u32 %v7546_v8, 16 }
 0x2b5   : > { %v7553_v50 = vpop.f32.mrf.mxu1 }
 0x2b6   : > { %v7550_v52 = vpop.f32.mrf.mxu3  ;;  %8871 = vst [vmem:[#allocation32_spill] sm:$0xff] %v7553_v50  ;;  %v2024_v43 = vrot.slane %v2022_v53, 1 }
 0x2b7   : > { %8870 = vst [vmem:[#allocation31_spill] sm:$0xff] %v7550_v52  ;;  %v1983_v52 = vunpack.c.l.b16 %v1308_v42  ;;  %v6435_v42 = vld [vmem:[#allocation2 + $0x118] sm:$0xe] }
 0x2b9   : > { %v7531_v27 = vpop.f32.mrf.mxu2 }
 0x2bd   : > { %v7563_v36 = vpop.f32.mrf.mxu1 }
 0x2be   : > { %3550 = vmatmul.bf16.gmra.mxu2 %v1740_v38  ;;  %3579 = vmatmul.bf16.gmra.mxu3 %v1817_v54  ;;  %v6432_v38 = vld [vmem:[#allocation2 + $0x80] sm:$0xe]  ;;  %v7558_v3 = vpop.f32.mrf.mxu3  ;;  %8872 = vst [vmem:[#allocation33_spill] sm:$0xff] %v7563_v36 }
 0x2bf   : > { %3925 = vmatmul.bf16.gmra.mxu1 %v6404_v22  ;;  %v6433_v13 = vor.u32 %v6432_v38, %v6431_v58  ;;  %v1819_v22 = vrot.slane %v7170_v34, 1  ;;  %v6405_v58 = vld [vmem:[#allocation2 + $0x80] sm:$0xff]   ;;  %v3428_v38 = vadd.f32 %v7283_v61, %v7229_v4 }
 0x2c0   : > { %v5851_v34 = vld [vmem:[%s8820_s3 + $0x160] sm:$0xff] }
 0x2c1   : > { %v3511_v46 = vpop.f32.mrf.mxu2  ;;  %v1818_v5 = vrot.slane %v6433_v13, 1  ;;  %3826 = vmatpush.bf16.msra.mxu3 %v5851_v34  ;;  %v7570_v13 = vpack.c.b16 %v1983_v52, %v1983_v52  ;;  %v1309_v34 = vld [vmem:[#allocation2 + $0x18] sm:$0x1] }
 0x2c2   : > { %v7548_v48 = vadd.f32 %v3511_v46, %v3423_v21  ;;  %v2025_v46 = vsel %vm1548_vm6, %v6886_v49, %v2024_v43  ;;  %v6434_v49 = vld [vmem:[#allocation2 + $0x118] sm:$0xf0] }
 0x2c3   : > { %v1820_v21 = vsel %vm1805_vm7, %v1818_v5, %v1819_v22  ;;  %v2034_v5 = vshll.u32 %v7570_v13, 16 }
 0x2c5   : > { %v2036_v4 = vrot.slane %v2034_v5, 1 }
 0x2c6   : > { %v7574_v43 = vpop.f32.mrf.mxu3 }
 0x2c7   : > { %8873 = vst [vmem:[#allocation34_spill] sm:$0xff] %v7574_v43  ;;  %v1984_v43 = vunpack.c.l.b16 %v1309_v34  ;;  %v3435_v34 = vadd.f32 %v7283_v61, %v7276_v55 }
 0x2c9   : > { %v7555_v54 = vpop.f32.mrf.mxu2  ;;  %v7591_v5 = vpack.c.b16 %v1984_v43, %v1984_v43 }
 0x2cb   : > { %8876 = vst [vmem:[#allocation37_spill] sm:$0xff] %v7591_v5 }
 0x2ce   : > { %3584 = vmatmul.bf16.gmra.mxu3 %v1820_v21  ;;  %3742 = vmatmul.bf16.vlgmr.msra.gmra.mxu2 %v2025_v46  ;;  %v6436_v21 = vor.u32 %v6435_v42, %v6434_v49  ;;  %v7577_v46 = vpop.f32.mrf.mxu1  ;;  %v7582_v52 = vpop.f32.mrf.mxu3  ;;  %v6406_v49 = vld [vmem:[#allocation2 + $0x118] sm:$0xff]   ;;  %v3433_v42 = vadd.f32 %v7283_v61, %v7261_v11  ;;  %v1825_v11 = vrot.slane %v7213_v35, 1 }
 0x2cf   : > { %3930 = vmatmul.bf16.gmra.mxu1 %v6405_v58  ;;  %8874 = vst [vmem:[#allocation35_spill] sm:$0xff] %v7577_v46  ;;  %v1822_v58 = vrot.slane %v7184_v57, 1  ;;  %v5850_v35 = vld [vmem:[%s8820_s3 + $0x158] sm:$0xff] }
 0x2d0   : > { %v1821_v50 = vrot.slane %v6436_v21, 1  ;;  %3827 = vmatpush.bf16.msra.mxu3 %v5850_v35 }
 0x2d1   : > { %v3516_v53 = vpop.f32.mrf.mxu2 }
 0x2d2   : > { %v7572_v22 = vadd.f32 %v3516_v53, %v3428_v38  ;;  %v1823_v38 = vsel %vm1805_vm7, %v1821_v50, %v1822_v58  ;;  %v2037_v53 = vsel %vm1548_vm6, %v6905_v6, %v2036_v4  ;;  %v6438_v50 = vld [vmem:[#allocation2 + $0xf8] sm:$0xe]  ;;  %v2046_v58 = vshll.u32 %v7591_v5, 16 }
 0x2d3   : > { %v6439_v4 = vor.u32 %v6438_v50, %v6437_v17  ;;  %v6407_v17 = vld [vmem:[#allocation2 + $0xf8] sm:$0xff]   ;;  %v3438_v50 = vadd.f32 %v7283_v61, %v7497_v39 }
 0x2d6   : > { %v7589_v46 = vpop.f32.mrf.mxu1  ;;  %v7596_v6 = vpop.f32.mrf.mxu3 }
 0x2d7   : > { %8875 = vst [vmem:[#allocation36_spill] sm:$0xff] %v7589_v46 }
 0x2d8   : > { %8877 = vst [vmem:[#allocation38_spill] sm:$0xff] %v7596_v6 }
 0x2d9   : > { %v7579_v36 = vpop.f32.mrf.mxu2 }
 0x2de   : > { %3589 = vmatmul.bf16.gmra.mxu3 %v1823_v38  ;;  %3747 = vmatmul.bf16.gmra.mxu2 %v2037_v53  ;;  %v2048_v53 = vrot.slane %v2046_v58, 1 }
 0x2df   : > { %3935 = vmatmul.bf16.gmra.mxu1 %v6406_v49  ;;  %v7601_v49 = vpop.f32.mrf.mxu1 }
 0x2e0   : > { %8878 = vst [vmem:[#allocation39_spill] sm:$0xff] %v7601_v49  ;;  %v2049_v5 = vsel %vm1548_vm6, %v6942_v37, %v2048_v53 }
 0x2e1   : > { %v3521_v57 = vpop.f32.mrf.mxu2  ;;  %v7611_v55 = vpop.f32.mrf.mxu3 }
 0x2e2   : > { %v7593_v21 = vadd.f32 %v3521_v57, %v3433_v42  ;;  %v1310_v42 = vld [vmem:[#allocation2 + $0x110] sm:$0x1]  ;;  %v1824_v57 = vrot.slane %v6439_v4, 1 }
 0x2e3   : > { %v1985_v6 = vunpack.c.l.b16 %v1310_v42 }
 0x2e4   : > { %v1826_v46 = vsel %vm1805_vm7, %v1824_v57, %v1825_v11  ;;  %v1828_v57 = vrot.slane %v7233_v10, 1 }
 0x2e5   : > { %v7615_v4 = vpack.c.b16 %v1985_v6, %v1985_v6 }
 0x2e9   : > { %v3523_v38 = vpop.f32.mrf.mxu2  ;;  %v7622_v53 = vpop.f32.mrf.mxu3 }
 0x2ea   : > { %v7603_v43 = vadd.f32 %v3523_v38, %v3435_v34  ;;  %v7617_v34 = vpop.f32.mrf.mxu1  ;;  %v2058_v38 = vshll.u32 %v7615_v4, 16  ;;  %8880 = vst [vmem:[#allocation41_spill] sm:$0xff] %v7622_v53  ;;  %v6443_v53 = vld [vmem:[#allocation2 + $0x20] sm:$0xf0] }
 0x2eb   : > { %8879 = vst [vmem:[#allocation40_spill] sm:$0xff] %v7617_v34 }
 0x2ec   : > { %v2060_v39 = vrot.slane %v2058_v38, 1 }
 0x2ee   : > { %3594 = vmatmul.bf16.gmra.mxu3 %v1826_v46  ;;  %3752 = vmatmul.bf16.gmra.mxu2 %v2049_v5  ;;  %v6440_v46 = vld [vmem:[#allocation2 + $0x8] sm:$0xf0]  ;;  %v6441_v5 = vld [vmem:[#allocation2 + $0x8] sm:$0xe] }
 0x2ef   : > { %3940 = vmatmul.bf16.gmra.mxu1 %v6407_v17  ;;  %v6442_v11 = vor.u32 %v6441_v5, %v6440_v46  ;;  %v1311_v17 = vld [vmem:[#allocation2 + $0x98] sm:$0x1]  ;;  %v6408_v46 = vld [vmem:[#allocation2 + $0x8] sm:$0xff]   ;;  %v3443_v5 = vadd.f32 %v7283_v61, %v7529_v9 }
 0x2f0   : > { %v1986_v34 = vunpack.c.l.b16 %v1311_v17 }
 0x2f1   : > { %v3526_v58 = vpop.f32.mrf.mxu2  ;;  %v1827_v35 = vrot.slane %v6442_v11, 1 }
 0x2f2   : > { %v7619_v37 = vadd.f32 %v3526_v58, %v3438_v50  ;;  %v7627_v6 = vpop.f32.mrf.mxu1  ;;  %v2061_v58 = vsel %vm1548_vm6, %v6964_v1, %v2060_v39  ;;  %v7636_v11 = vpack.c.b16 %v1986_v34, %v1986_v34  ;;  %v5804_v1 = vld [vmem:[%s6797_s16 + $0x108] sm:$0xff]  ;;  %v5885_v39 = vld [vmem:[%s8822_s5 + $0x30] sm:$0xff] }
 0x2f3   : > { %8881 = vst [vmem:[#allocation42_spill] sm:$0xff] %v7627_v6  ;;  %v1829_v50 = vsel %vm1805_vm7, %v1827_v35, %v1828_v57  ;;  %v6444_v35 = vld [vmem:[#allocation2 + $0x20] sm:$0xe]  ;;  %5381 = vmatmul.msk.bf16.gmra.mxu0 %vm591_vm1, %v5804_v1 }
 0x2f4   : > { %8882 = vst [vmem:[#allocation43_spill] sm:$0xff] %v7636_v11  ;;  %v2070_v17 = vshll.u32 %v7636_v11, 16  ;;  %v6445_v9 = vor.u32 %v6444_v35, %v6443_v53  ;;  %4296 = vmatpush.bf16.msrb.mxu0 %v5885_v39  ;;  %v6409_v53 = vld [vmem:[#allocation2 + $0x20] sm:$0xff]   ;;  %v5849_v35 = vld [vmem:[%s8820_s3 + $0x150] sm:$0xff] }
 0x2f5   : > { %3828 = vmatpush.bf16.msra.mxu3 %v5849_v35  ;;  %v1834_v35 = vrot.slane %v7291_v31, 1 }
 0x2f9   : > { %v7624_v42 = vpop.f32.mrf.mxu2 }
 0x2fa   : > { %v7640_v57 = vpop.f32.mrf.mxu1 }
 0x2fb   : > { %8884 = vst [vmem:[#allocation45_spill] sm:$0xff] %v7640_v57 }
 0x2fe   : > { %3599 = vmatmul.bf16.gmra.mxu3 %v1829_v50  ;;  %3757 = vmatmul.bf16.gmra.mxu2 %v2061_v58  ;;  %v1831_v58 = vrot.slane %v7263_v12, 1  ;;  %v3448_v12 = vadd.f32 %v7283_v61, %v7558_v3 }
 0x2ff   : > { %3945 = vmatmul.bf16.gmra.mxu1 %v6408_v46  ;;  %v2072_v46 = vrot.slane %v2070_v17, 1 }
 0x301   : > { %v7634_v10 = vpop.f32.mrf.mxu3  ;;  %v3531_v38 = vpop.f32.mrf.mxu2  ;;  %v2073_v49 = vsel %vm1548_vm6, %v6986_v24, %v2072_v46 }
 0x302   : > { %v7638_v6 = vadd.f32 %v3531_v38, %v3443_v5  ;;  %v1312_v5 = vld [vmem:[#allocation2 + $0x38] sm:$0x1]  ;;  %v1830_v38 = vrot.slane %v6445_v9, 1  ;;  %v7656_v11 = vpop.f32.mrf.mxu1 }
 0x303   : > { %8885 = vst [vmem:[#allocation46_spill] sm:$0xff] %v7656_v11 }
 0x304   : > { %8883 = vst [vmem:[#allocation44_spill] sm:$0xff] %v7638_v6  ;;  %v1832_v57 = vsel %vm1805_vm7, %v1830_v38, %v1831_v58  ;;  %v1987_v6 = vunpack.c.l.b16 %v1312_v5  ;;  %v6447_v58 = vld [vmem:[#allocation2 + $0x90] sm:$0xe] }
 0x306   : > { %v7663_v17 = vpack.c.b16 %v1987_v6, %v1987_v6 }
 0x308   : > { %8886 = vst [vmem:[#allocation47_spill] sm:$0xff] %v7663_v17  ;;  %v2082_v46 = vshll.u32 %v7663_v17, 16 }
 0x309   : > { %v7648_v50 = vpop.f32.mrf.mxu3  ;;  %v7650_v34 = vpop.f32.mrf.mxu2 }
 0x30a   : > { %v7673_v5 = vpop.f32.mrf.mxu1 }
 0x30e   : > { %3604 = vmatmul.bf16.gmra.mxu3 %v1832_v57  ;;  %3762 = vmatmul.bf16.gmra.mxu2 %v2073_v49  ;;  %v3390_v49 = vadd.f32 %v7283_v61, %v7060_v30  ;;  %v6446_v57 = vld [vmem:[#allocation2 + $0x90] sm:$0xf0] }
 0x30f   : > { %3950 = vmatmul.bf16.gmra.mxu1 %v6409_v53  ;;  %v6448_v3 = vor.u32 %v6447_v58, %v6446_v57  ;;  %v6410_v57 = vld [vmem:[#allocation2 + $0x90] sm:$0xff]  }
 0x310   : > { %v3479_v38 = vadd.f32 %v7305_v25, %v3390_v49  ;;  %v3453_v25 = vadd.f32 %v7283_v61, %v7582_v52 }
 0x311   : > { %v3536_v1 = vpop.f32.mrf.mxu2  ;;  %v3565_v39 = vpop.f32.mrf.mxu3 }
 0x312   : > { %v7665_v24 = vadd.f32 %v3536_v1, %v3448_v12  ;;  %v7668_v9 = vadd.f32 %v3565_v39, %v7293_v40  ;;  %v2084_v12 = vrot.slane %v2082_v46, 1  ;;  %v1313_v1 = vld [vmem:[#allocation2 + $0x78] sm:$0x1]  ;;  %v1833_v39 = vrot.slane %v6448_v3, 1  ;;  %v7686_v49 = vpop.f32.mrf.mxu1 }
 0x313   : > { %v1988_v17 = vunpack.c.l.b16 %v1313_v1 }
 0x314   : > { %v1835_v30 = vsel %vm1805_vm7, %v1833_v39, %v1834_v35  ;;  %v2085_v11 = vsel %vm1548_vm6, %v7007_v51, %v2084_v12  ;;  %v6449_v51 = vld [vmem:[#allocation2 + $0x70] sm:$0xf0]  ;;  %v3395_v35 = vadd.f32 %v7283_v61, %v7092_v59 }
 0x315   : > { %v7688_v46 = vpack.c.b16 %v1988_v17, %v1988_v17 }
 0x316   : > { %v3484_v52 = vadd.f32 %v7341_v56, %v3395_v35  ;;  %v6411_v56 = vld [vmem:[#allocation2 + $0x70] sm:$0xff]  }
 0x319   : > { %v7676_v53 = vpop.f32.mrf.mxu2  ;;  %v3567_v6 = vpop.f32.mrf.mxu3 }
 0x31a   : > { %v7679_v40 = vadd.f32 %v3567_v6, %v3479_v38  ;;  %v6450_v6 = vld [vmem:[#allocation2 + $0x70] sm:$0xe]  ;;  %v7699_v1 = vpop.f32.mrf.mxu1 }
 0x31b   : > { %v6451_v12 = vor.u32 %v6450_v6, %v6449_v51  ;;  %8887 = vst [vmem:[#allocation48_spill] sm:$0xff] %v7699_v1  ;;  %v5848_v6 = vld [vmem:[%s8820_s3 + $0x148] sm:$0xff] }
 0x31c   : > { %3829 = vmatpush.bf16.msra.mxu3 %v5848_v6 }
 0x31e   : > { %3609 = vmatmul.bf16.gmra.mxu3 %v1835_v30  ;;  %3767 = vmatmul.bf16.gmra.mxu2 %v2085_v11  ;;  %v2094_v11 = vshll.u32 %v7688_v46, 16  ;;  %v1837_v30 = vrot.slane %v7326_v16, 1  ;;  %v3458_v16 = vadd.f32 %v7283_v61, %v7611_v55 }
 0x31f   : > { %3955 = vmatmul.bf16.gmra.mxu1 %v6410_v57 }
 0x320   : > { %v2096_v57 = vrot.slane %v2094_v11, 1 }
 0x321   : > { %v3541_v31 = vpop.f32.mrf.mxu2  ;;  %v3570_v58 = vpop.f32.mrf.mxu3 }
 0x322   : > { %v7690_v3 = vadd.f32 %v3541_v31, %v3453_v25  ;;  %v7693_v38 = vadd.f32 %v3570_v58, %v7330_v15  ;;  %v1314_v25 = vld [vmem:[#allocation2 + $0xc8] sm:$0x1]  ;;  %v1836_v31 = vrot.slane %v6451_v12, 1  ;;  %v2097_v59 = vsel %vm1548_vm6, %v7244_v47, %v2096_v57  ;;  %v6453_v57 = vld [vmem:[#allocation2 + $0xe0] sm:$0xe] }
 0x323   : > { %v1989_v51 = vunpack.c.l.b16 %v1314_v25 }
 0x324   : > { %v1838_v58 = vsel %vm1805_vm7, %v1836_v31, %v1837_v30  ;;  %v6452_v30 = vld [vmem:[#allocation2 + $0xe0] sm:$0xf0]  ;;  %v3400_v31 = vadd.f32 %v7283_v61, %v7130_v29 }
 0x325   : > { %v7714_v12 = vpack.c.b16 %v1989_v51, %v1989_v51  ;;  %v6454_v55 = vor.u32 %v6453_v57, %v6452_v30 }
 0x327   : > { %v2106_v25 = vshll.u32 %v7714_v12, 16 }
 0x329   : > { %v7701_v39 = vpop.f32.mrf.mxu2  ;;  %v3572_v17 = vpop.f32.mrf.mxu3  ;;  %v2108_v6 = vrot.slane %v2106_v25, 1 }
 0x32a   : > { %v7704_v15 = vadd.f32 %v3572_v17, %v3484_v52  ;;  %v7716_v52 = vpop.f32.mrf.mxu1 }
 0x32b   : > { %8888 = vst [vmem:[#allocation49_spill] sm:$0xff] %v7716_v52  ;;  %v2109_v29 = vsel %vm1548_vm6, %v7278_v60, %v2108_v6  ;;  %v6455_v60 = vld [vmem:[#allocation2 + $0xa8] sm:$0xf0]  ;;  %v3405_v6 = vadd.f32 %v7283_v61, %v7165_v0 }
 0x32e   : > { %3614 = vmatmul.bf16.gmra.mxu3 %v1838_v58  ;;  %3772 = vmatmul.bf16.gmra.mxu2 %v2097_v59  ;;  %v3489_v58 = vadd.f32 %v7382_v41, %v3400_v31  ;;  %v6412_v41 = vld [vmem:[#allocation2 + $0xe0] sm:$0xff]  }
 0x32f   : > { %3960 = vmatmul.bf16.gmra.mxu1 %v6411_v56  ;;  %v1840_v56 = vrot.slane %v7354_v45, 1  ;;  %v3463_v45 = vadd.f32 %v7283_v61, %v7634_v10  ;;  %v3494_v10 = vadd.f32 %v7428_v20, %v3405_v6 }
 0x331   : > { %v3546_v11 = vpop.f32.mrf.mxu2  ;;  %v3575_v35 = vpop.f32.mrf.mxu3 }
 0x332   : > { %v7718_v47 = vadd.f32 %v3546_v11, %v3458_v16  ;;  %v7721_v17 = vadd.f32 %v3575_v35, %v7356_v33  ;;  %v7730_v16 = vpop.f32.mrf.mxu1  ;;  %v1315_v11 = vld [vmem:[#allocation2 + $0xa0] sm:$0x1]  ;;  %v1839_v35 = vrot.slane %v6454_v55, 1 }
 0x333   : > { %8889 = vst [vmem:[#allocation50_spill] sm:$0xff] %v7730_v16  ;;  %v1990_v30 = vunpack.c.l.b16 %v1315_v11 }
 0x334   : > { %v1841_v52 = vsel %vm1805_vm7, %v1839_v35, %v1840_v56  ;;  %v6456_v56 = vld [vmem:[#allocation2 + $0xa8] sm:$0xe]  ;;  %v3465_v35 = vadd.f32 %v7283_v61, %v7648_v50 }
 0x335   : > { %v7739_v31 = vpack.c.b16 %v1990_v30, %v1990_v30  ;;  %v6457_v11 = vor.u32 %v6456_v56, %v6455_v60  ;;  %v6413_v50 = vld [vmem:[#allocation2 + $0xa8] sm:$0xff]  }
 0x336   : > { %v5884_v56 = vld [vmem:[%s8822_s5 + $0x28] sm:$0xff] }
 0x337   : > { %4297 = vmatpush.bf16.msrb.mxu0 %v5884_v56 }
 0x339   : > { %v7727_v59 = vpop.f32.mrf.mxu2  ;;  %v3577_v51 = vpop.f32.mrf.mxu3 }
 0x33a   : > { %v7732_v33 = vadd.f32 %v3577_v51, %v3489_v58  ;;  %v7746_v51 = vpop.f32.mrf.mxu1 }
 0x33b   : > { %8890 = vst [vmem:[#allocation51_spill] sm:$0xff] %v7746_v51  ;;  %v1842_v51 = vrot.slane %v6457_v11, 1 }
 0x33e   : > { %3619 = vmatmul.bf16.gmra.mxu3 %v1841_v52  ;;  %3777 = vmatmul.bf16.gmra.mxu2 %v2109_v29  ;;  %v2118_v52 = vshll.u32 %v7739_v31, 16 }
 0x33f   : > { %3965 = vmatmul.bf16.gmra.mxu1 %v6412_v41 }
 0x340   : > { %v2120_v41 = vrot.slane %v2118_v52, 1  ;;  %v8892_v52 = vld [vmem:[#allocation9_spill] sm:$0xff] }
 0x341   : > { %v3551_v57 = vpop.f32.mrf.mxu2  ;;  %v3580_v25 = vpop.f32.mrf.mxu3  ;;  %v3655_v6 = vadd.f32 %v8892_v52, %v7668_v9 }
 0x342   : > { %v7741_v58 = vadd.f32 %v3551_v57, %v3463_v45  ;;  %v7744_v55 = vadd.f32 %v3580_v25, %v7410_v18  ;;  %v1843_v18 = vrot.slane %v7408_v23, 1  ;;  %v1316_v25 = vld [vmem:[#allocation2 + $0x58] sm:$0x1]  ;;  %v7759_v16 = vpop.f32.mrf.mxu1  ;;  %v2121_v20 = vsel %vm1548_vm6, %v7307_v26, %v2120_v41  ;;  %v5847_v23 = vld [vmem:[%s8820_s3 + $0x140] sm:$0xff] }
 0x343   : > { %8891 = vst [vmem:[#allocation52_spill] sm:$0xff] %v7759_v16  ;;  %v1991_v60 = vunpack.c.l.b16 %v1316_v25  ;;  %3830 = vmatpush.bf16.msra.mxu3 %v5847_v23  ;;  %v8894_v25 = vld [vmem:[#allocation7_spill] sm:$0xff] }
 0x344   : > { %v1844_v0 = vsel %vm1805_vm7, %v1842_v51, %v1843_v18  ;;  %v6459_v18 = vld [vmem:[#allocation2 + $0xd8] sm:$0xe]  ;;  %v1317_v16 = vld [vmem:[#allocation2 + $0x60] sm:$0x1] }
 0x345   : > { %v7772_v26 = vpack.c.b16 %v1991_v60, %v1991_v60  ;;  %v8896_v60 = vld [vmem:[#allocation11_spill] sm:$0xff] }
 0x346   : > { %v3657_v23 = vadd.f32 %v8896_v60, %v7679_v40  ;;  %v6414_v40 = vld [vmem:[#allocation2 + $0xd8] sm:$0xff]  }
 0x347   : > { %v2130_v41 = vshll.u32 %v7772_v26, 16 }
 0x349   : > { %v3553_v29 = vpop.f32.mrf.mxu2  ;;  %v3582_v30 = vpop.f32.mrf.mxu3 }
 0x34a   : > { %v7755_v45 = vadd.f32 %v3553_v29, %v3465_v35  ;;  %v7757_v57 = vadd.f32 %v3582_v30, %v3494_v10  ;;  %v8893_v10 = vld [vmem:[#allocation23_spill] sm:$0xff]  ;;  %v6458_v30 = vld [vmem:[#allocation2 + $0xd8] sm:$0xf0] }
 0x34b   : > { %v6460_v9 = vor.u32 %v6459_v18, %v6458_v30 }
 0x34d   : > { %v1845_v1 = vrot.slane %v6460_v9, 1 }
 0x34e   : > { %3624 = vmatmul.bf16.gmra.mxu3 %v1844_v0  ;;  %3782 = vmatmul.bf16.gmra.mxu2 %v2121_v20  ;;  %v3410_v0 = vadd.f32 %v7283_v61, %v8894_v25  ;;  %v7782_v20 = vpop.f32.mrf.mxu1  ;;  %v8897_v25 = vld [vmem:[#allocation16_spill] sm:$0xff] }
 0x34f   : > { %3970 = vmatmul.bf16.gmra.mxu1 %v6413_v50  ;;  %8895 = vst [vmem:[#allocation9_spill] sm:$0xff] %v7782_v20 }
 0x350   : > { %v3499_v50 = vadd.f32 %v7465_v19, %v3410_v0  ;;  %v1992_v19 = vunpack.c.l.b16 %v1317_v16  ;;  %v6462_v16 = vld [vmem:[#allocation2 + $0x50] sm:$0xe] }
 0x351   : > { %v3585_v51 = vpop.f32.mrf.mxu3  ;;  %v3743_v11 = vpop.f32.mrf.mxu2 }
 0x352   : > { %v7775_v35 = vadd.f32 %v3585_v51, %v8893_v10  ;;  %v7777_v29 = vadd.f32 %v3743_v11, %v3655_v6  ;;  %v1846_v6 = vrot.slane %v7450_v14, 1  ;;  %v2132_v51 = vrot.slane %v2130_v41, 1  ;;  %v8899_v14 = vld [vmem:[#allocation12_spill] sm:$0xff] }
 0x353   : > { %v3660_v41 = vadd.f32 %v8899_v14, %v7693_v38  ;;  %v7799_v60 = vpack.c.b16 %v1992_v19, %v1992_v19 }
 0x354   : > { %v1847_v61 = vsel %vm1805_vm7, %v1845_v1, %v1846_v6  ;;  %v2133_v30 = vsel %vm1548_vm6, %v8897_v25, %v2132_v51  ;;  %v8900_v6 = vld [vmem:[#allocation5_spill] sm:$0xff] }
 0x356   : > { %v7795_v18 = vpop.f32.mrf.mxu1 }
 0x357   : > { %8898 = vst [vmem:[#allocation23_spill] sm:$0xff] %v7795_v18 }
 0x359   : > { %v3587_v56 = vpop.f32.mrf.mxu3  ;;  %v3745_v52 = vpop.f32.mrf.mxu2 }
 0x35a   : > { %v7788_v11 = vadd.f32 %v3587_v56, %v3499_v50  ;;  %v7790_v10 = vadd.f32 %v3745_v52, %v3657_v23  ;;  %v6461_v23 = vld [vmem:[#allocation2 + $0x50] sm:$0xf0]  ;;  %v2142_v56 = vshll.u32 %v7799_v60, 16  ;;  %v7810_v52 = vld [vmem:[%s8821_s4] ss:$0 sm:$0xff] }
 0x35b   : > { %v3415_v38 = vadd.f32 %v7810_v52, %v8900_v6  ;;  %v6463_v51 = vor.u32 %v6462_v16, %v6461_v23 }
 0x35c   : > { %v2144_v14 = vrot.slane %v2142_v56, 1  ;;  %v5878_v56 = vld [vmem:[%s8820_s3 + $0x238] sm:$0xff] }
 0x35d   : > { %v1848_v20 = vrot.slane %v6463_v51, 1  ;;  %4090 = vmatpush.bf16.msrb.mxu3 %v5878_v56  ;;  %v1852_v56 = vrot.slane %v7520_v62, 1  ;;  %v8910_v62 = vld [vmem:[#allocation17_spill] sm:$0xff] }
 0x35e   : > { %3629 = vmatmul.bf16.gmra.mxu3 %v1847_v61  ;;  %3787 = vmatmul.bf16.gmra.mxu2 %v2133_v30  ;;  %v3504_v61 = vadd.f32 %v7502_v32, %v3415_v38  ;;  %v7822_v18 = vpop.f32.mrf.mxu1  ;;  %v5870_v32 = vld [vmem:[%s8820_s3 + $0x1f8] sm:$0xff] }
 0x35f   : > { %3975 = vmatmul.bf16.gmra.mxu1 %v6414_v40  ;;  %v1849_v40 = vrot.slane %v7485_v28, 1  ;;  %8902 = vst [vmem:[#allocation7_spill] sm:$0xff] %v7822_v18  ;;  %v6415_v28 = vld [vmem:[#allocation2 + $0x50] sm:$0xff]   ;;  %4001 = vmatpush.bf16.msrb.mxu2 %v5870_v32  ;;  %v8904_v38 = vld [vmem:[#allocation14_spill] sm:$0xff] }
 0x360   : > { %v3665_v51 = vadd.f32 %v8904_v38, %v7721_v17  ;;  %v8906_v32 = vld [vmem:[#allocation6_spill] sm:$0xff] }
 0x361   : > { %v3590_v0 = vpop.f32.mrf.mxu3  ;;  %v3748_v50 = vpop.f32.mrf.mxu2  ;;  %v1850_v23 = vsel %vm1805_vm7, %v1848_v20, %v1849_v40  ;;  %v6465_v40 = vld [vmem:[#allocation2 + $0xb8] sm:$0xe] }
 0x362   : > { %v7802_v9 = vadd.f32 %v3590_v0, %v7487_v63  ;;  %v7804_v1 = vadd.f32 %v3748_v50, %v3660_v41  ;;  %v8901_v63 = vld [vmem:[#allocation13_spill] sm:$0xff]  ;;  %v1318_v50 = vld [vmem:[#allocation2 + $0x88] sm:$0x1] }
 0x363   : > { %v3662_v25 = vadd.f32 %v8901_v63, %v7704_v15  ;;  %v8903_v15 = vld [vmem:[#allocation19_spill] sm:$0xff]  ;;  %v1993_v6 = vunpack.c.l.b16 %v1318_v50 }
 0x364   : > { %v2145_v16 = vsel %vm1548_vm6, %v8903_v15, %v2144_v14 }
 0x365   : > { %v7835_v20 = vpack.c.b16 %v1993_v6, %v1993_v6 }
 0x366   : > { %v7842_v14 = vpop.f32.mrf.mxu1 }
 0x367   : > { %8905 = vst [vmem:[#allocation11_spill] sm:$0xff] %v7842_v14  ;;  %v2154_v50 = vshll.u32 %v7835_v20, 16 }
 0x369   : > { %v3592_v30 = vpop.f32.mrf.mxu3  ;;  %v3750_v19 = vpop.f32.mrf.mxu2  ;;  %v2156_v38 = vrot.slane %v2154_v50, 1  ;;  %v3670_v50 = vadd.f32 %v8910_v62, %v7744_v55  ;;  %v8913_v55 = vld [vmem:[#allocation8_spill] sm:$0xff] }
 0x36a   : > { %v7818_v41 = vadd.f32 %v3592_v30, %v3504_v61  ;;  %v7820_v0 = vadd.f32 %v3750_v19, %v3662_v25  ;;  %v6464_v19 = vld [vmem:[#allocation2 + $0xb8] sm:$0xf0] }
 0x36b   : > { %v6466_v17 = vor.u32 %v6465_v40, %v6464_v19 }
 0x36d   : > { %v1851_v14 = vrot.slane %v6466_v17, 1 }
 0x36e   : > { %3634 = vmatmul.bf16.gmra.mxu3 %v1850_v23  ;;  %3792 = vmatmul.bf16.gmra.mxu2 %v2145_v16  ;;  %v3420_v23 = vadd.f32 %v7810_v52, %v8906_v32  ;;  %v8907_v16 = vld [vmem:[#allocation15_spill] sm:$0xff]  ;;  %v8908_v32 = vld [vmem:[#allocation22_spill] sm:$0xff]  ;;  %v7858_v40 = vpop.f32.mrf.mxu1 }
 0x36f   : > { %3980 = vmatmul.bf16.gmra.mxu1 %v6415_v28  ;;  %v3667_v6 = vadd.f32 %v8907_v16, %v7732_v33  ;;  %v1853_v18 = vsel %vm1805_vm7, %v1851_v14, %v1852_v56  ;;  %v2157_v19 = vsel %vm1548_vm6, %v8908_v32, %v2156_v38  ;;  %v6416_v33 = vld [vmem:[#allocation2 + $0xb8] sm:$0xff]   ;;  %8909 = vst [vmem:[#allocation16_spill] sm:$0xff] %v7858_v40  ;;  %v6610_v56 = vld [vmem:[%s8819_s2] ss:$0 sm:$0xff] }
 0x370   : > { %v3509_v15 = vadd.f32 %v7531_v27, %v3420_v23 }
 0x371   : > { %v3595_v61 = vpop.f32.mrf.mxu3  ;;  %v3753_v63 = vpop.f32.mrf.mxu2 }
 0x372   : > { %v7838_v25 = vadd.f32 %v3595_v61, %v7524_v2  ;;  %v7840_v30 = vadd.f32 %v3753_v63, %v3665_v51  ;;  %v1319_v63 = vld [vmem:[#allocation2 + $0xc0] sm:$0x1] }
 0x373   : > { %v1994_v27 = vunpack.c.l.b16 %v1319_v63  ;;  %v3425_v63 = vadd.f32 %v7810_v52, %v8913_v55  ;;  %v5877_v55 = vld [vmem:[%s8820_s3 + $0x230] sm:$0xff] }
 0x374   : > { %4091 = vmatpush.bf16.msrb.mxu3 %v5877_v55 }
 0x375   : > { %v7862_v16 = vpack.c.b16 %v1994_v27, %v1994_v27  ;;  %v8914_v27 = vld [vmem:[#allocation18_spill] sm:$0xff] }
 0x377   : > { %8911 = vst [vmem:[#allocation12_spill] sm:$0xff] %v7862_v16 }
 0x379   : > { %v3597_v28 = vpop.f32.mrf.mxu3  ;;  %v3755_v2 = vpop.f32.mrf.mxu2 }
 0x37a   : > { %v7851_v51 = vadd.f32 %v3597_v28, %v3509_v15  ;;  %v7853_v61 = vadd.f32 %v3755_v2, %v3667_v6  ;;  %v6467_v6 = vld [vmem:[#allocation2 + $0x10] sm:$0xf0]  ;;  %v6468_v28 = vld [vmem:[#allocation2 + $0x10] sm:$0xe]  ;;  %v2166_v2 = vshll.u32 %v7862_v16, 16 }
 0x37b   : > { %v6469_v32 = vor.u32 %v6468_v28, %v6467_v6  ;;  %v8916_v6 = vld [vmem:[#allocation3_spill] sm:$0xff] }
 0x37e   : > { %3639 = vmatmul.bf16.gmra.mxu3 %v1853_v18  ;;  %3797 = vmatmul.bf16.gmra.mxu2 %v2157_v19  ;;  %v878_v18 = vpop.f32.mrf.mxu0 }
 0x37f   : > { %3985 = vmatmul.bf16.gmra.mxu1 %v6416_v33  ;;  %v879_v38 = vadd.f32 %v6610_v56, %v878_v18  ;;  %v3672_v33 = vadd.f32 %v8914_v27, %v7757_v57  ;;  %v1320_v56 = vld [vmem:[#allocation2 + $0xf0] sm:$0x1] }
 0x381   : > { %v3600_v23 = vpop.f32.mrf.mxu3  ;;  %v3758_v15 = vpop.f32.mrf.mxu2  ;;  %v959_v19 = vmax.f32 %v879_v38, 0.0  ;;  %v2270_v38 = vrot.slane %v6469_v32, 1 }
 0x382   : > { %v7865_v17 = vadd.f32 %v3600_v23, %v7548_v48  ;;  %v7867_v14 = vadd.f32 %v3758_v15, %v3670_v50  ;;  %v3514_v48 = vadd.f32 %v7555_v54, %v3425_v63  ;;  %v2168_v23 = vrot.slane %v2166_v2, 1  ;;  %v5869_v54 = vld [vmem:[%s8820_s3 + $0x1f0] sm:$0xff] }
 0x383   : > { %v2271_v15 = vrot.slane %v7546_v8, 1  ;;  %v1060_v16 = vsel %vm984_vm5, %v959_v19, 0.0  ;;  %v1995_v2 = vunpack.c.l.b16 %v1320_v56  ;;  %4002 = vmatpush.bf16.msrb.mxu2 %v5869_v54 }
 0x384   : > { %8912 = vst [vmem:[#allocation5_spill] sm:$0xff] %v7867_v14  ;;  %v6055_v28 = vpack.c.bf16 %v8916_v6, %v1060_v16  ;;  %v2169_v8 = vsel %vm1548_vm6, %v7471_v44, %v2168_v23  ;;  %v8917_v16 = vld [vmem:[#allocation20_spill] sm:$0xff] }
 0x385   : > { %v2272_v40 = vsel %vm1805_vm7, %v2270_v38, %v2271_v15  ;;  %v3675_v63 = vadd.f32 %v8917_v16, %v7775_v35  ;;  %v5883_v35 = vld [vmem:[%s8822_s5 + $0x20] sm:$0xff]  ;;  %v8918_v15 = vld [vmem:[#allocation10_spill] sm:$0xff]  ;;  %v1321_v16 = vld [vmem:[#allocation2 + $0x28] sm:$0x1] }
 0x386   : > { %6371 = vst [vmem:[#allocation2] sm:$0xff] %v6055_v28   ;;  %v880_v57 = vpop.f32.mrf.mxu0  ;;  %v3430_v56 = vadd.f32 %v7810_v52, %v8918_v15  ;;  %4298 = vmatpush.bf16.msrb.mxu0 %v5883_v35  ;;  %v8919_v28 = vld [vmem:[#allocation21_spill] sm:$0xff] }
 0x387   : > { %v3677_v38 = vadd.f32 %v8919_v28, %v7788_v11 }
 0x388   : > { %v3519_v6 = vadd.f32 %v7579_v36, %v3430_v56  ;;  %v5865_v56 = vld [vmem:[%s8820_s3 + $0x1d0] sm:$0xff] }
 0x389   : > { %v3602_v62 = vpop.f32.mrf.mxu3  ;;  %v3760_v50 = vpop.f32.mrf.mxu2 }
 0x38a   : > { %v7881_v14 = vadd.f32 %v3602_v62, %v3514_v48  ;;  %v7883_v18 = vadd.f32 %v3760_v50, %v3672_v33  ;;  %v7897_v48 = vpack.c.b16 %v1995_v2, %v1995_v2  ;;  %v6470_v33 = vld [vmem:[#allocation2 + $0x108] sm:$0xf0]  ;;  %v6471_v62 = vld [vmem:[#allocation2 + $0x108] sm:$0xe] }
 0x38b   : > { %v5868_v50 = vld [vmem:[%s8820_s3 + $0x1e8] sm:$0xff] }
 0x38c   : > { %v2178_v23 = vshll.u32 %v7897_v48, 16  ;;  %4003 = vmatpush.bf16.msrb.mxu2 %v5868_v50 }
 0x38e   : > { %3802 = vmatmul.bf16.gmra.mxu2 %v2169_v8  ;;  %3831 = vmatmul.bf16.vlgmr.msra.gmra.mxu3 %v2272_v40  ;;  %v2180_v8 = vrot.slane %v2178_v23, 1  ;;  %v2274_v40 = vrot.slane %v7570_v13, 1  ;;  %v5866_v13 = vld [vmem:[%s8820_s3 + $0x1d8] sm:$0xff] }
 0x390   : > { %v2181_v36 = vsel %vm1548_vm6, %v7508_v7, %v2180_v8 }
 0x391   : > { %v3605_v32 = vpop.f32.mrf.mxu3  ;;  %v3763_v19 = vpop.f32.mrf.mxu2 }
 0x392   : > { %v7900_v44 = vadd.f32 %v3605_v32, %v7572_v22  ;;  %v7902_v27 = vadd.f32 %v3763_v19, %v3675_v63  ;;  %v6472_v22 = vor.u32 %v6471_v62, %v6470_v33  ;;  %v5867_v63 = vld [vmem:[%s8820_s3 + $0x1e0] sm:$0xff]  ;;  %v1996_v19 = vunpack.c.l.b16 %v1321_v16  ;;  %v8920_v33 = vld [vmem:[#allocation24_spill] sm:$0xff] }
 0x393   : > { %4004 = vmatpush.bf16.msrb.mxu2 %v5867_v63  ;;  %v3680_v62 = vadd.f32 %v8920_v33, %v7802_v9  ;;  %v5864_v9 = vld [vmem:[%s8820_s3 + $0x1c8] sm:$0xff]  ;;  %v8922_v63 = vld [vmem:[#allocation37_spill] sm:$0xff] }
 0x394   : > { %v2273_v32 = vrot.slane %v6472_v22, 1  ;;  %v7932_v23 = vpack.c.b16 %v1996_v19, %v1996_v19  ;;  %v6473_v22 = vld [vmem:[#allocation2 + $0x30] sm:$0xf0]  ;;  %v5863_v19 = vld [vmem:[%s8820_s3 + $0x1c0] sm:$0xff] }
 0x396   : > { %v2275_v11 = vsel %vm1805_vm7, %v2273_v32, %v2274_v40  ;;  %v2190_v28 = vshll.u32 %v7932_v23, 16  ;;  %v2277_v32 = vrot.slane %v8922_v63, 1  ;;  %v6477_v63 = vld [vmem:[#allocation2 + $0x80] sm:$0xe] }
 0x397   : > { %4005 = vmatpush.bf16.msrb.mxu2 %v5866_v13 }
 0x398   : > { %v2192_v16 = vrot.slane %v2190_v28, 1 }
 0x399   : > { %v3607_v54 = vpop.f32.mrf.mxu3  ;;  %v3765_v57 = vpop.f32.mrf.mxu2 }
 0x39a   : > { %v7917_v2 = vadd.f32 %v3607_v54, %v3519_v6  ;;  %v7919_v55 = vadd.f32 %v3765_v57, %v3677_v38  ;;  %v6474_v6 = vld [vmem:[#allocation2 + $0x30] sm:$0xe]  ;;  %v1322_v57 = vld [vmem:[#allocation2] sm:$0x1] }
 0x39b   : > { %4006 = vmatpush.bf16.msrb.mxu2 %v5865_v56  ;;  %v6475_v38 = vor.u32 %v6474_v6, %v6473_v22  ;;  %v8921_v54 = vld [vmem:[#allocation25_spill] sm:$0xff]  ;;  %v1997_v33 = vunpack.c.l.b16 %v1322_v57  ;;  %v8924_v6 = vld [vmem:[#allocation26_spill] sm:$0xff] }
 0x39d   : > { %v2276_v13 = vrot.slane %v6475_v38, 1  ;;  %v7963_v22 = vpack.c.b16 %v1997_v33, %v1997_v33 }
 0x39e   : > { %3807 = vmatmul.bf16.gmra.mxu2 %v2181_v36  ;;  %3836 = vmatmul.bf16.gmra.mxu3 %v2275_v11 }
 0x39f   : > { %4007 = vmatpush.bf16.msrb.mxu2 %v5864_v9  ;;  %v3685_v9 = vadd.f32 %v8924_v6, %v7838_v25 }
 0x3a1   : > { %v3610_v50 = vpop.f32.mrf.mxu3  ;;  %v3768_v35 = vpop.f32.mrf.mxu2 }
 0x3a2   : > { %v7935_v15 = vadd.f32 %v3610_v50, %v7593_v21  ;;  %v7937_v7 = vadd.f32 %v3768_v35, %v3680_v62  ;;  %v3682_v21 = vadd.f32 %v8921_v54, %v7818_v41  ;;  %v8923_v41 = vld [vmem:[#allocation29_spill] sm:$0xff]  ;;  %v2278_v50 = vsel %vm1805_vm7, %v2276_v13, %v2277_v32  ;;  %v6611_v35 = vld [vmem:[#allocation2 + $0x100] sm:$0xff] }
 0x3a3   : > { %4008 = vmatpush.bf16.msrb.mxu2 %v5863_v19  ;;  %v2193_v62 = vsel %vm1548_vm6, %v8923_v41, %v2192_v16  ;;  %v2197_v56 = vshll.u32 %v6611_v35, 16  ;;  %v2195_v57 = vshrl.u32 %v6611_v35, 16  ;;  %v6476_v16 = vld [vmem:[#allocation2 + $0x80] sm:$0xf0]  ;;  %v2280_v35 = vrot.slane %v7615_v4, 1  ;;  %v8929_v4 = vld [vmem:[#allocation44_spill] sm:$0xff] }
 0x3a4   : > { %v8925_v32 = vld [vmem:[#allocation27_spill] sm:$0xff]  ;;  %v6478_v25 = vor.u32 %v6477_v63, %v6476_v16 }
 0x3a5   : > { %v3440_v19 = vadd.f32 %v7810_v52, %v8925_v32 }
 0x3a7   : > { %v3529_v41 = vadd.f32 %v7624_v42, %v3440_v19  ;;  %v8927_v42 = vld [vmem:[#allocation30_spill] sm:$0xff] }
 0x3a9   : > { %v3612_v8 = vpop.f32.mrf.mxu3  ;;  %v3770_v40 = vpop.f32.mrf.mxu2 }
 0x3aa   : > { %v7950_v36 = vadd.f32 %v3612_v8, %v7603_v43  ;;  %v7952_v11 = vadd.f32 %v3770_v40, %v3682_v21  ;;  %v5876_v43 = vld [vmem:[%s8820_s3 + $0x228] sm:$0xff]  ;;  %v2199_v8 = vrot.slane %v2197_v56, 1  ;;  %v2202_v40 = vshll.u32 %v7963_v22, 16 }
 0x3ab   : > { %4092 = vmatpush.bf16.msrb.mxu3 %v5876_v43 }
 0x3ac   : > { %v2200_v13 = vor.u32 %v2199_v8, %v2195_v57  ;;  %v2204_v33 = vrot.slane %v2202_v40, 1 }
 0x3ae   : > { %3812 = vmatmul.bf16.gmra.mxu2 %v2193_v62  ;;  %3841 = vmatmul.bf16.gmra.mxu3 %v2278_v50  ;;  %v8926_v62 = vld [vmem:[#allocation28_spill] sm:$0xff] }
 0x3b1   : > { %v3615_v28 = vpop.f32.mrf.mxu3  ;;  %v3773_v38 = vpop.f32.mrf.mxu2 }
 0x3b2   : > { %v7968_v54 = vadd.f32 %v3615_v28, %v7619_v37  ;;  %v7970_v21 = vadd.f32 %v3773_v38, %v3685_v9  ;;  %v3687_v37 = vadd.f32 %v8926_v62, %v7851_v51  ;;  %v1372_v9 = vld [vmem:[#allocation2 + $0x68] sm:$0x1]  ;;  %v2205_v28 = vsel %vm1548_vm6, %v2200_v13, %v2204_v33  ;;  %v6479_v33 = vld [vmem:[#allocation2 + $0x118] sm:$0xf0] }
 0x3b3   : > { %v2279_v38 = vrot.slane %v6478_v25, 1  ;;  %v2446_v8 = vunpack.c.l.b16 %v1372_v9  ;;  %v3690_v51 = vadd.f32 %v8927_v42, %v7865_v17  ;;  %v6480_v25 = vld [vmem:[#allocation2 + $0x118] sm:$0xe]  ;;  %v8932_v9 = vld [vmem:[#allocation32_spill] sm:$0xff]  ;;  %v8933_v42 = vld [vmem:[#allocation43_spill] sm:$0xff] }
 0x3b4   : > { %v6481_v17 = vor.u32 %v6480_v25, %v6479_v33 }
 0x3b5   : > { %v2281_v57 = vsel %vm1805_vm7, %v2279_v38, %v2280_v35  ;;  %v7987_v63 = vpack.c.b16 %v2446_v8, %v2446_v8 }
 0x3b7   : > { %8928 = vst [vmem:[#allocation13_spill] sm:$0xff] %v7987_v63  ;;  %v2486_v62 = vshll.u32 %v7987_v63, 16  ;;  %v1373_v63 = vld [vmem:[#allocation2 + $0x18] sm:$0x1] }
 0x3b8   : > { %v2447_v33 = vunpack.c.l.b16 %v1373_v63  ;;  %v6613_v63 = vld [vmem:[#allocation2 + $0x30] sm:$0xff]  }
 0x3b9   : > { %v3617_v50 = vpop.f32.mrf.mxu3  ;;  %v3775_v43 = vpop.f32.mrf.mxu2 }
 0x3ba   : > { %v7979_v56 = vadd.f32 %v3617_v50, %v3529_v41  ;;  %v7981_v6 = vadd.f32 %v3775_v43, %v3687_v37  ;;  %v6612_v41 = vld [vmem:[#allocation2 + $0x108] sm:$0xff]   ;;  %v8931_v37 = vld [vmem:[#allocation31_spill] sm:$0xff] }
 0x3bb   : > { %v2481_v13 = vshll.u32 %v6612_v41, 16  ;;  %v3445_v50 = vadd.f32 %v7810_v52, %v8931_v37  ;;  %v2479_v38 = vshrl.u32 %v6612_v41, 16  ;;  %v2282_v37 = vrot.slane %v6481_v17, 1  ;;  %v8934_v41 = vld [vmem:[#allocation33_spill] sm:$0xff] }
 0x3bc   : > { %v3695_v25 = vadd.f32 %v8934_v41, %v7900_v44 }
 0x3bd   : > { %v2483_v43 = vrot.slane %v2481_v13, 1  ;;  %v3534_v35 = vadd.f32 %v7650_v34, %v3445_v50 }
 0x3be   : > { %3817 = vmatmul.bf16.gmra.mxu2 %v2205_v28  ;;  %3846 = vmatmul.bf16.gmra.mxu3 %v2281_v57  ;;  %v3692_v28 = vadd.f32 %v8932_v9, %v7881_v14  ;;  %v5875_v14 = vld [vmem:[%s8820_s3 + $0x220] sm:$0xff]  ;;  %v6482_v9 = vld [vmem:[#allocation2 + $0xf8] sm:$0xf0] }
 0x3bf   : > { %4093 = vmatpush.bf16.msrb.mxu3 %v5875_v14  ;;  %v8939_v14 = vld [vmem:[#allocation47_spill] sm:$0xff] }
 0x3c0   : > { %v2286_v41 = vrot.slane %v8939_v14, 1  ;;  %v8943_v14 = vld [vmem:[#allocation38_spill] sm:$0xff] }
 0x3c1   : > { %v3620_v40 = vpop.f32.mrf.mxu3  ;;  %v3778_v16 = vpop.f32.mrf.mxu2 }
 0x3c2   : > { %v7990_v32 = vadd.f32 %v3620_v40, %v8929_v4  ;;  %v7992_v19 = vadd.f32 %v3778_v16, %v3690_v51  ;;  %v2283_v51 = vrot.slane %v8933_v42, 1  ;;  %v2488_v40 = vrot.slane %v2486_v62, 1 }
 0x3c4   : > { %8930 = vst [vmem:[#allocation19_spill] sm:$0xff] %v7992_v19  ;;  %v2484_v19 = vor.u32 %v2483_v43, %v2479_v38  ;;  %v2284_v13 = vsel %vm1805_vm7, %v2282_v37, %v2283_v51  ;;  %v8019_v38 = vpop.f32.mrf.mxu1 }
 0x3c6   : > { %v2489_v34 = vsel %vm1548_vm6, %v2484_v19, %v2488_v40  ;;  %v2493_v19 = vshll.u32 %v6613_v63, 16 }
 0x3c8   : > { %v2495_v42 = vrot.slane %v2493_v19, 1 }
 0x3c9   : > { %v3622_v57 = vpop.f32.mrf.mxu3  ;;  %v3780_v8 = vpop.f32.mrf.mxu2 }
 0x3ca   : > { %v8001_v16 = vadd.f32 %v3622_v57, %v3534_v35  ;;  %v8003_v4 = vadd.f32 %v3780_v8, %v3692_v28  ;;  %v8012_v35 = vpack.c.b16 %v2447_v33, %v2447_v33  ;;  %v6483_v28 = vld [vmem:[#allocation2 + $0xf8] sm:$0xe] }
 0x3cb   : > { %v8937_v8 = vld [vmem:[#allocation34_spill] sm:$0xff]  ;;  %v6484_v51 = vor.u32 %v6483_v28, %v6482_v9 }
 0x3cc   : > { %8935 = vst [vmem:[#allocation14_spill] sm:$0xff] %v8012_v35  ;;  %v2498_v57 = vshll.u32 %v8012_v35, 16  ;;  %v3450_v44 = vadd.f32 %v7810_v52, %v8937_v8  ;;  %v1374_v35 = vld [vmem:[#allocation2 + $0x110] sm:$0x1]  ;;  %v8039_v28 = vpop.f32.mrf.mxu1 }
 0x3cd   : > { %v2285_v8 = vrot.slane %v6484_v51, 1  ;;  %v2448_v9 = vunpack.c.l.b16 %v1374_v35 }
 0x3ce   : > { %3851 = vmatmul.bf16.gmra.mxu3 %v2284_v13  ;;  %4009 = vmatmul.bf16.vlgmr.msrb.gmra.mxu2 %v2489_v34  ;;  %v3539_v40 = vadd.f32 %v7676_v53, %v3450_v44  ;;  %v2491_v13 = vshrl.u32 %v6613_v63, 16  ;;  %v5882_v63 = vld [vmem:[%s8822_s5 + $0x18] sm:$0xff] }
 0x3cf   : > { %v2287_v19 = vsel %vm1805_vm7, %v2285_v8, %v2286_v41  ;;  %4299 = vmatpush.bf16.msrb.mxu0 %v5882_v63  ;;  %v3455_v41 = vadd.f32 %v7810_v52, %v8943_v14 }
 0x3d1   : > { %v3625_v62 = vpop.f32.mrf.mxu3  ;;  %v3783_v50 = vpop.f32.mrf.mxu2  ;;  %v3544_v8 = vadd.f32 %v7701_v39, %v3455_v41 }
 0x3d2   : > { %v8015_v43 = vadd.f32 %v3625_v62, %v7665_v24  ;;  %v8017_v17 = vadd.f32 %v3783_v50, %v3695_v25  ;;  %v8938_v24 = vld [vmem:[#allocation35_spill] sm:$0xff]  ;;  %v2500_v25 = vrot.slane %v2498_v57, 1  ;;  %v8940_v57 = vld [vmem:[#allocation36_spill] sm:$0xff] }
 0x3d3   : > { %v3697_v37 = vadd.f32 %v8938_v24, %v7917_v2  ;;  %v8034_v2 = vld [vmem:[#allocation2 + $0x100] sm:$0xff]   ;;  %v3700_v44 = vadd.f32 %v8940_v57, %v7935_v15  ;;  %v2289_v57 = vrot.slane %v7688_v46, 1  ;;  %v8945_v46 = vld [vmem:[#allocation40_spill] sm:$0xff] }
 0x3d4   : > { %8936 = vst [vmem:[#allocation6_spill] sm:$0xff] %v8017_v17  ;;  %v2496_v17 = vor.u32 %v2495_v42, %v2491_v13  ;;  %3990 = vmatmul.bf16.gmra.mxu1 %v8034_v2  ;;  %v6614_v24 = vld [vmem:[#allocation2 + $0x80] sm:$0xff]   ;;  %v6485_v13 = vld [vmem:[#allocation2 + $0x8] sm:$0xf0] }
 0x3d6   : > { %v2501_v53 = vsel %vm1548_vm6, %v2496_v17, %v2500_v25  ;;  %v8044_v17 = vpack.c.b16 %v2448_v9, %v2448_v9 }
 0x3d8   : > { %8941 = vst [vmem:[#allocation15_spill] sm:$0xff] %v8044_v17 }
 0x3d9   : > { %v3627_v34 = vpop.f32.mrf.mxu3  ;;  %v3785_v33 = vpop.f32.mrf.mxu2 }
 0x3da   : > { %v8028_v62 = vadd.f32 %v3627_v34, %v3539_v40  ;;  %v8030_v50 = vadd.f32 %v3785_v33, %v3697_v37  ;;  %v2505_v37 = vshll.u32 %v6614_v24, 16  ;;  %v6486_v34 = vld [vmem:[#allocation2 + $0x8] sm:$0xe]  ;;  %v2510_v33 = vshll.u32 %v8044_v17, 16  ;;  %v1375_v17 = vld [vmem:[#allocation2 + $0x98] sm:$0x1] }
 0x3db   : > { %v6487_v25 = vor.u32 %v6486_v34, %v6485_v13  ;;  %v2449_v13 = vunpack.c.l.b16 %v1375_v17  ;;  %v6615_v17 = vld [vmem:[#allocation2 + $0x118] sm:$0xff]  }
 0x3dc   : > { %v2507_v15 = vrot.slane %v2505_v37, 1 }
 0x3dd   : > { %v2288_v14 = vrot.slane %v6487_v25, 1  ;;  %v8069_v41 = vpack.c.b16 %v2449_v13, %v2449_v13  ;;  %v2292_v13 = vrot.slane %v7714_v12, 1 }
 0x3de   : > { %3856 = vmatmul.bf16.gmra.mxu3 %v2287_v19  ;;  %4014 = vmatmul.bf16.gmra.mxu2 %v2501_v53  ;;  %v8944_v19 = vld [vmem:[#allocation39_spill] sm:$0xff] }
 0x3df   : > { %v3702_v53 = vadd.f32 %v8944_v19, %v7950_v36  ;;  %v2290_v37 = vsel %vm1805_vm7, %v2288_v14, %v2289_v57  ;;  %v5874_v36 = vld [vmem:[%s8820_s3 + $0x218] sm:$0xff]  ;;  %v6489_v19 = vld [vmem:[#allocation2 + $0x20] sm:$0xe] }
 0x3e0   : > { %4094 = vmatpush.bf16.msrb.mxu3 %v5874_v36 }
 0x3e1   : > { %v3630_v42 = vpop.f32.mrf.mxu3  ;;  %v3788_v51 = vpop.f32.mrf.mxu2 }
 0x3e2   : > { %v8047_v35 = vadd.f32 %v3630_v42, %v7690_v3  ;;  %v8049_v40 = vadd.f32 %v3788_v51, %v3700_v44  ;;  %v2503_v3 = vshrl.u32 %v6614_v24, 16  ;;  %v2512_v44 = vrot.slane %v2510_v33, 1 }
 0x3e3   : > { %v3705_v24 = vadd.f32 %v8945_v46, %v7968_v54 }
 0x3e4   : > { %8942 = vst [vmem:[#allocation22_spill] sm:$0xff] %v8049_v40  ;;  %v2508_v40 = vor.u32 %v2507_v15, %v2503_v3  ;;  %v8946_v3 = vld [vmem:[#allocation41_spill] sm:$0xff] }
 0x3e6   : > { %v2513_v39 = vsel %vm1548_vm6, %v2508_v40, %v2512_v44  ;;  %v2517_v40 = vshll.u32 %v6615_v17, 16  ;;  %v8947_v44 = vld [vmem:[#allocation42_spill] sm:$0xff] }
 0x3e7   : > { %v3707_v14 = vadd.f32 %v8947_v44, %v7979_v56  ;;  %v8948_v56 = vld [vmem:[#allocation45_spill] sm:$0xff] }
 0x3e8   : > { %v2519_v54 = vrot.slane %v2517_v40, 1  ;;  %v6492_v44 = vld [vmem:[#allocation2 + $0x90] sm:$0xe] }
 0x3e9   : > { %v3632_v9 = vpop.f32.mrf.mxu3  ;;  %v3790_v63 = vpop.f32.mrf.mxu2 }
 0x3ea   : > { %v8058_v42 = vadd.f32 %v3632_v9, %v3544_v8  ;;  %v8060_v51 = vadd.f32 %v3790_v63, %v3702_v53  ;;  %v6488_v8 = vld [vmem:[#allocation2 + $0x20] sm:$0xf0]  ;;  %v2522_v53 = vshll.u32 %v8069_v41, 16  ;;  %v3460_v9 = vadd.f32 %v7810_v52, %v8946_v3 }
 0x3eb   : > { %v6490_v63 = vor.u32 %v6489_v19, %v6488_v8 }
 0x3ec   : > { %v3549_v57 = vadd.f32 %v7727_v59, %v3460_v9  ;;  %v2524_v36 = vrot.slane %v2522_v53, 1 }
 0x3ed   : > { %v2291_v52 = vrot.slane %v6490_v63, 1 }
 0x3ee   : > { %3861 = vmatmul.bf16.gmra.mxu3 %v2290_v37  ;;  %4019 = vmatmul.bf16.gmra.mxu2 %v2513_v39 }
 0x3ef   : > { %v2293_v40 = vsel %vm1805_vm7, %v2291_v52, %v2292_v13 }
 0x3f1   : > { %v3635_v34 = vpop.f32.mrf.mxu3  ;;  %v3793_v33 = vpop.f32.mrf.mxu2 }
 0x3f2   : > { %v8072_v15 = vadd.f32 %v3635_v34, %v7718_v47  ;;  %v8074_v25 = vadd.f32 %v3793_v33, %v3705_v24  ;;  %v2515_v47 = vshrl.u32 %v6615_v17, 16  ;;  %v1376_v34 = vld [vmem:[#allocation2 + $0x38] sm:$0x1]  ;;  %v3710_v17 = vadd.f32 %v8948_v56, %v7990_v32 }
 0x3f3   : > { %v2450_v8 = vunpack.c.l.b16 %v1376_v34 }
 0x3f4   : > { %v2520_v33 = vor.u32 %v2519_v54, %v2515_v47  ;;  %v6616_v54 = vld [vmem:[#allocation2 + $0xf8] sm:$0xff]  }
 0x3f5   : > { %v8091_v53 = vpack.c.b16 %v2450_v8, %v2450_v8  ;;  %v2529_v63 = vshll.u32 %v6616_v54, 16  ;;  %v2527_v13 = vshrl.u32 %v6616_v54, 16 }
 0x3f6   : > { %v2525_v59 = vsel %vm1548_vm6, %v2520_v33, %v2524_v36  ;;  %v2295_v33 = vrot.slane %v7739_v31, 1  ;;  %v5873_v31 = vld [vmem:[%s8820_s3 + $0x210] sm:$0xff] }
 0x3f7   : > { %v2531_v47 = vrot.slane %v2529_v63, 1  ;;  %4095 = vmatpush.bf16.msrb.mxu3 %v5873_v31 }
 0x3f9   : > { %v3637_v37 = vpop.f32.mrf.mxu3  ;;  %v3795_v39 = vpop.f32.mrf.mxu2  ;;  %v2532_v8 = vor.u32 %v2531_v47, %v2527_v13 }
 0x3fa   : > { %v8083_v46 = vadd.f32 %v3637_v37, %v3549_v57  ;;  %v8085_v24 = vadd.f32 %v3795_v39, %v3707_v14  ;;  %v6491_v57 = vld [vmem:[#allocation2 + $0x90] sm:$0xf0]  ;;  %v2534_v14 = vshll.u32 %v8091_v53, 16  ;;  %v8949_v39 = vld [vmem:[#allocation46_spill] sm:$0xff] }
 0x3fb   : > { %v6493_v37 = vor.u32 %v6492_v44, %v6491_v57  ;;  %v3712_v32 = vadd.f32 %v8949_v39, %v8001_v16  ;;  %v6494_v39 = vld [vmem:[#allocation2 + $0x70] sm:$0xf0] }
 0x3fd   : > { %v2294_v56 = vrot.slane %v6493_v37, 1  ;;  %v8121_v37 = vpop.f32.mrf.mxu1 }
 0x3fe   : > { %3866 = vmatmul.bf16.gmra.mxu3 %v2293_v40  ;;  %4024 = vmatmul.bf16.gmra.mxu2 %v2525_v59  ;;  %v1377_v59 = vld [vmem:[#allocation2 + $0x78] sm:$0x1] }
 0x401   : > { %v3640_v19 = vpop.f32.mrf.mxu3  ;;  %v3798_v12 = vpop.f32.mrf.mxu2 }
 0x402   : > { %v8094_v3 = vadd.f32 %v3640_v19, %v7741_v58  ;;  %v8096_v9 = vadd.f32 %v3798_v12, %v3710_v17  ;;  %v2536_v58 = vrot.slane %v2534_v14, 1  ;;  %v2296_v17 = vsel %vm1805_vm7, %v2294_v56, %v2295_v33  ;;  %v6617_v14 = vld [vmem:[#allocation2 + $0x8] sm:$0xff]  }
 0x403   : > { %v2451_v12 = vunpack.c.l.b16 %v1377_v59  ;;  %v2541_v47 = vshll.u32 %v6617_v14, 16  ;;  %v2298_v59 = vrot.slane %v7772_v26, 1  ;;  %v8950_v26 = vld [vmem:[#allocation48_spill] sm:$0xff] }
 0x404   : > { %v2537_v19 = vsel %vm1548_vm6, %v2532_v8, %v2536_v58 }
 0x405   : > { %v8114_v63 = vpack.c.b16 %v2451_v12, %v2451_v12 }
 0x407   : > { %v2546_v13 = vshll.u32 %v8114_v63, 16 }
 0x409   : > { %v3642_v36 = vpop.f32.mrf.mxu3  ;;  %v3800_v34 = vpop.f32.mrf.mxu2 }
 0x40a   : > { %v8103_v52 = vadd.f32 %v3642_v36, %v7755_v45  ;;  %v8105_v40 = vadd.f32 %v3800_v34, %v3712_v32  ;;  %v3715_v45 = vadd.f32 %v7673_v5, %v8015_v43  ;;  %v6495_v32 = vld [vmem:[#allocation2 + $0x70] sm:$0xe]  ;;  %v2543_v36 = vrot.slane %v2541_v47, 1 }
 0x40b   : > { %v6496_v5 = vor.u32 %v6495_v32, %v6494_v39  ;;  %v3717_v43 = vadd.f32 %v7686_v49, %v8028_v62  ;;  %v2539_v34 = vshrl.u32 %v6617_v14, 16  ;;  %v8134_v49 = vpop.f32.mrf.mxu1  ;;  %v3720_v62 = vadd.f32 %v8950_v26, %v8047_v35  ;;  %v5881_v32 = vld [vmem:[%s8822_s5 + $0x10] sm:$0xff]  ;;  %v1379_v26 = vld [vmem:[#allocation2 + $0xa0] sm:$0x1] }
 0x40c   : > { %4300 = vmatpush.bf16.msrb.mxu0 %v5881_v32 }
 0x40d   : > { %v2297_v12 = vrot.slane %v6496_v5, 1  ;;  %v6497_v5 = vld [vmem:[#allocation2 + $0xe0] sm:$0xf0] }
 0x40e   : > { %3871 = vmatmul.bf16.gmra.mxu3 %v2296_v17  ;;  %4029 = vmatmul.bf16.gmra.mxu2 %v2537_v19  ;;  %v1378_v17 = vld [vmem:[#allocation2 + $0xc8] sm:$0x1]  ;;  %v2544_v19 = vor.u32 %v2543_v36, %v2539_v34 }
 0x40f   : > { %v2299_v31 = vsel %vm1805_vm7, %v2297_v12, %v2298_v59  ;;  %v8952_v59 = vld [vmem:[#allocation49_spill] sm:$0xff]  ;;  %v2301_v12 = vrot.slane %v7799_v60, 1  ;;  %v5872_v60 = vld [vmem:[%s8820_s3 + $0x208] sm:$0xff] }
 0x410   : > { %4096 = vmatpush.bf16.msrb.mxu3 %v5872_v60 }
 0x411   : > { %v3803_v16 = vpop.f32.mrf.mxu2  ;;  %v3832_v54 = vpop.f32.mrf.mxu3 }
 0x412   : > { %v8116_v57 = vadd.f32 %v3803_v16, %v3715_v45  ;;  %v8119_v44 = vadd.f32 %v3832_v54, %v7777_v29  ;;  %v2548_v29 = vrot.slane %v2546_v13, 1  ;;  %v2452_v16 = vunpack.c.l.b16 %v1378_v17  ;;  %v6618_v13 = vld [vmem:[#allocation2 + $0x20] sm:$0xff]  }
 0x413   : > { %v2553_v36 = vshll.u32 %v6618_v13, 16 }
 0x414   : > { %v2549_v45 = vsel %vm1548_vm6, %v2544_v19, %v2548_v29  ;;  %v8138_v47 = vpack.c.b16 %v2452_v16, %v2452_v16  ;;  %v3722_v29 = vadd.f32 %v8952_v59, %v8058_v42  ;;  %v8953_v42 = vld [vmem:[#allocation50_spill] sm:$0xff]  ;;  %v6619_v59 = vld [vmem:[#allocation2 + $0x90] sm:$0xff]  }
 0x415   : > { %v2555_v34 = vrot.slane %v2553_v36, 1  ;;  %v2453_v36 = vunpack.c.l.b16 %v1379_v26 }
 0x416   : > { %v2558_v35 = vshll.u32 %v8138_v47, 16 }
 0x419   : > { %v3805_v33 = vpop.f32.mrf.mxu2  ;;  %v3834_v58 = vpop.f32.mrf.mxu3 }
 0x41a   : > { %v8127_v8 = vadd.f32 %v3805_v33, %v3717_v43  ;;  %v8130_v56 = vadd.f32 %v3834_v58, %v7790_v10  ;;  %v6498_v43 = vld [vmem:[#allocation2 + $0xe0] sm:$0xe]  ;;  %v8149_v58 = vpop.f32.mrf.mxu1 }
 0x41b   : > { %v6499_v33 = vor.u32 %v6498_v43, %v6497_v5  ;;  %8951 = vst [vmem:[#allocation17_spill] sm:$0xff] %v8149_v58  ;;  %v8166_v43 = vpack.c.b16 %v2453_v36, %v2453_v36 }
 0x41e   : > { %3876 = vmatmul.bf16.gmra.mxu3 %v2299_v31  ;;  %4034 = vmatmul.bf16.gmra.mxu2 %v2549_v45  ;;  %v2560_v31 = vrot.slane %v2558_v35, 1 }
 0x421   : > { %v3808_v54 = vpop.f32.mrf.mxu2  ;;  %v3837_v14 = vpop.f32.mrf.mxu3 }
 0x422   : > { %v8140_v10 = vadd.f32 %v3808_v54, %v3720_v62  ;;  %v8143_v39 = vadd.f32 %v3837_v14, %v7804_v1  ;;  %v2551_v1 = vshrl.u32 %v6618_v13, 16  ;;  %v2300_v54 = vrot.slane %v6499_v33, 1  ;;  %v8168_v35 = vpop.f32.mrf.mxu1 }
 0x423   : > { %v3725_v13 = vadd.f32 %v8953_v42, %v8072_v15  ;;  %8954 = vst [vmem:[#allocation8_spill] sm:$0xff] %v8168_v35  ;;  %v1380_v42 = vld [vmem:[#allocation2 + $0x58] sm:$0x1] }
 0x424   : > { %v2556_v62 = vor.u32 %v2555_v34, %v2551_v1  ;;  %v2302_v14 = vsel %vm1805_vm7, %v2300_v54, %v2301_v12  ;;  %v6500_v1 = vld [vmem:[#allocation2 + $0xa8] sm:$0xf0] }
 0x426   : > { %v2561_v32 = vsel %vm1548_vm6, %v2556_v62, %v2560_v31  ;;  %v8955_v31 = vld [vmem:[#allocation51_spill] sm:$0xff]  ;;  %v2563_v62 = vshrl.u32 %v6619_v59, 16 }
 0x427   : > { %v3727_v26 = vadd.f32 %v8955_v31, %v8083_v46 }
 0x429   : > { %v3810_v17 = vpop.f32.mrf.mxu2  ;;  %v3839_v19 = vpop.f32.mrf.mxu3 }
 0x42a   : > { %v8154_v45 = vadd.f32 %v3810_v17, %v3722_v29  ;;  %v8157_v16 = vadd.f32 %v3839_v19, %v7820_v0  ;;  %v2565_v29 = vshll.u32 %v6619_v59, 16  ;;  %v6501_v17 = vld [vmem:[#allocation2 + $0xa8] sm:$0xe]  ;;  %v2570_v19 = vshll.u32 %v8166_v43, 16 }
 0x42b   : > { %v6502_v15 = vor.u32 %v6501_v17, %v6500_v1  ;;  %v2454_v59 = vunpack.c.l.b16 %v1380_v42 }
 0x42c   : > { %v2567_v12 = vrot.slane %v2565_v29, 1  ;;  %v2572_v36 = vrot.slane %v2570_v19, 1 }
 0x42d   : > { %v8190_v31 = vpack.c.b16 %v2454_v59, %v2454_v59 }
 0x42e   : > { %3881 = vmatmul.bf16.gmra.mxu3 %v2302_v14  ;;  %4039 = vmatmul.bf16.gmra.mxu2 %v2561_v32  ;;  %v2304_v32 = vrot.slane %v7835_v20, 1  ;;  %v8957_v20 = vld [vmem:[#allocation52_spill] sm:$0xff] }
 0x42f   : > { %v3730_v1 = vadd.f32 %v8957_v20, %v8094_v3  ;;  %v8960_v3 = vld [vmem:[#allocation9_spill] sm:$0xff]  ;;  %v8961_v20 = vld [vmem:[#allocation12_spill] sm:$0xff] }
 0x431   : > { %v3813_v0 = vpop.f32.mrf.mxu2  ;;  %v3842_v5 = vpop.f32.mrf.mxu3 }
 0x432   : > { %v8170_v34 = vadd.f32 %v3813_v0, %v3725_v13  ;;  %v8173_v33 = vadd.f32 %v3842_v5, %v7840_v30  ;;  %v2568_v13 = vor.u32 %v2567_v12, %v2563_v62  ;;  %v2303_v0 = vrot.slane %v6502_v15, 1  ;;  %v8184_v5 = vpop.f32.mrf.mxu1  ;;  %v8958_v12 = vld [vmem:[#allocation5_spill] sm:$0xff] }
 0x433   : > { %8956 = vst [vmem:[#allocation18_spill] sm:$0xff] %v8184_v5  ;;  %v1381_v5 = vld [vmem:[#allocation2 + $0x60] sm:$0x1] }
 0x434   : > { %v2305_v29 = vsel %vm1805_vm7, %v2303_v0, %v2304_v32  ;;  %v2573_v46 = vsel %vm1548_vm6, %v2568_v13, %v2572_v36  ;;  %v2582_v32 = vshll.u32 %v8190_v31, 16  ;;  %v3732_v0 = vadd.f32 %v8960_v3, %v8103_v52  ;;  %v5871_v52 = vld [vmem:[%s8820_s3 + $0x200] sm:$0xff] }
 0x435   : > { %4097 = vmatpush.bf16.msrb.mxu3 %v5871_v52  ;;  %v2310_v52 = vrot.slane %v7897_v48, 1  ;;  %v8966_v48 = vld [vmem:[#allocation11_spill] sm:$0xff] }
 0x439   : > { %v3815_v54 = vpop.f32.mrf.mxu2  ;;  %v3844_v14 = vpop.f32.mrf.mxu3 }
 0x43a   : > { %v8179_v60 = vadd.f32 %v3815_v54, %v3727_v26  ;;  %v8182_v30 = vadd.f32 %v3844_v14, %v7853_v61  ;;  %v6620_v26 = vld [vmem:[#allocation2 + $0x70] sm:$0xff]   ;;  %v6503_v54 = vld [vmem:[#allocation2 + $0xd8] sm:$0xf0]  ;;  %v6504_v14 = vld [vmem:[#allocation2 + $0xd8] sm:$0xe]  ;;  %v8198_v36 = vpop.f32.mrf.mxu1 }
 0x43b   : > { %v2577_v62 = vshll.u32 %v6620_v26, 16  ;;  %8959 = vst [vmem:[#allocation4_spill] sm:$0xff] %v8198_v36  ;;  %v6505_v13 = vor.u32 %v6504_v14, %v6503_v54  ;;  %v2455_v14 = vunpack.c.l.b16 %v1381_v5  ;;  %v6621_v5 = vld [vmem:[#allocation2 + $0xe0] sm:$0xff]  }
 0x43d   : > { %v2579_v42 = vrot.slane %v2577_v62, 1  ;;  %v2306_v58 = vrot.slane %v6505_v13, 1  ;;  %v8217_v13 = vpack.c.b16 %v2455_v14, %v2455_v14 }
 0x43e   : > { %3886 = vmatmul.bf16.gmra.mxu3 %v2305_v29  ;;  %4044 = vmatmul.bf16.gmra.mxu2 %v2573_v46  ;;  %v2575_v29 = vshrl.u32 %v6620_v26, 16 }
 0x440   : > { %v2580_v35 = vor.u32 %v2579_v42, %v2575_v29  ;;  %v6506_v29 = vld [vmem:[#allocation2 + $0x50] sm:$0xf0] }
 0x441   : > { %v3818_v17 = vpop.f32.mrf.mxu2  ;;  %v3847_v19 = vpop.f32.mrf.mxu3 }
 0x442   : > { %v8192_v61 = vadd.f32 %v3818_v17, %v3730_v1  ;;  %v8195_v15 = vadd.f32 %v3847_v19, %v8958_v12  ;;  %v2307_v1 = vrot.slane %v8961_v20, 1  ;;  %v2584_v17 = vrot.slane %v2582_v32, 1  ;;  %v8213_v26 = vpop.f32.mrf.mxu1  ;;  %v8963_v32 = vld [vmem:[#allocation23_spill] sm:$0xff] }
 0x443   : > { %8962 = vst [vmem:[#allocation3_spill] sm:$0xff] %v8213_v26 }
 0x444   : > { %v2308_v62 = vsel %vm1805_vm7, %v2306_v58, %v2307_v1  ;;  %v2585_v54 = vsel %vm1548_vm6, %v2580_v35, %v2584_v17 }
 0x449   : > { %v3820_v46 = vpop.f32.mrf.mxu2  ;;  %v3849_v59 = vpop.f32.mrf.mxu3 }
 0x44a   : > { %v8203_v19 = vadd.f32 %v3820_v46, %v3732_v0  ;;  %v8206_v12 = vadd.f32 %v3849_v59, %v7883_v18  ;;  %v3922_v18 = vadd.f32 %v8963_v32, %v8119_v44  ;;  %v2589_v0 = vshll.u32 %v6621_v5, 16  ;;  %v6507_v46 = vld [vmem:[#allocation2 + $0x50] sm:$0xe]  ;;  %v8964_v44 = vld [vmem:[#allocation7_spill] sm:$0xff]  ;;  %v8228_v32 = vpop.f32.mrf.mxu1 }
 0x44b   : > { %v2594_v59 = vshll.u32 %v8217_v13, 16  ;;  %v6508_v1 = vor.u32 %v6507_v46, %v6506_v29  ;;  %v3924_v17 = vadd.f32 %v8964_v44, %v8130_v56  ;;  %8965 = vst [vmem:[#allocation20_spill] sm:$0xff] %v8228_v32  ;;  %v3927_v46 = vadd.f32 %v8966_v48, %v8143_v39 }
 0x44c   : > { %v2591_v20 = vrot.slane %v2589_v0, 1 }
 0x44d   : > { %v2309_v0 = vrot.slane %v6508_v1, 1  ;;  %v6622_v1 = vld [vmem:[#allocation2 + $0xa8] sm:$0xff]  }
 0x44e   : > { %3891 = vmatmul.bf16.gmra.mxu3 %v2308_v62  ;;  %4049 = vmatmul.bf16.gmra.mxu2 %v2585_v54  ;;  %v2587_v62 = vshrl.u32 %v6621_v5, 16 }
 0x44f   : > { %v2311_v29 = vsel %vm1805_vm7, %v2309_v0, %v2310_v52  ;;  %v2599_v0 = vshrl.u32 %v6622_v1, 16 }
 0x450   : > { %v2592_v26 = vor.u32 %v2591_v20, %v2587_v62  ;;  %v8246_v20 = vld [vmem:[#allocation2 + $0x40] sm:$0xff]   ;;  %v2601_v62 = vshll.u32 %v6622_v1, 16 }
 0x451   : > { %v3852_v3 = vpop.f32.mrf.mxu3  ;;  %v4010_v42 = vpop.f32.mrf.mxu2  ;;  %3995 = vmatmul.bf16.gmra.mxu1 %v8246_v20 }
 0x452   : > { %v8220_v58 = vadd.f32 %v3852_v3, %v7902_v27  ;;  %v8222_v35 = vadd.f32 %v4010_v42, %v3922_v18  ;;  %v2596_v27 = vrot.slane %v2594_v59, 1  ;;  %v1382_v42 = vld [vmem:[#allocation2 + $0x88] sm:$0x1]  ;;  %v2603_v52 = vrot.slane %v2601_v62, 1 }
 0x453   : > { %v2456_v5 = vunpack.c.l.b16 %v1382_v42  ;;  %v8968_v42 = vld [vmem:[#allocation16_spill] sm:$0xff] }
 0x454   : > { %v2597_v56 = vsel %vm1548_vm6, %v2592_v26, %v2596_v27  ;;  %v8249_v26 = vpop.f32.mrf.mxu1 }
 0x455   : > { %v8239_v32 = vpack.c.b16 %v2456_v5, %v2456_v5  ;;  %8967 = vst [vmem:[#allocation10_spill] sm:$0xff] %v8249_v26  ;;  %v2313_v5 = vrot.slane %v7932_v23, 1  ;;  %v2604_v26 = vor.u32 %v2603_v52, %v2599_v0  ;;  %v5880_v23 = vld [vmem:[%s8822_s5 + $0x8] sm:$0xff] }
 0x456   : > { %4301 = vmatpush.bf16.msrb.mxu0 %v5880_v23 }
 0x457   : > { %v2606_v39 = vshll.u32 %v8239_v32, 16 }
 0x459   : > { %v3854_v54 = vpop.f32.mrf.mxu3  ;;  %v4012_v14 = vpop.f32.mrf.mxu2  ;;  %v2608_v48 = vrot.slane %v2606_v39, 1 }
 0x45a   : > { %v8231_v18 = vadd.f32 %v3854_v54, %v7919_v55  ;;  %v8233_v3 = vadd.f32 %v4012_v14, %v3924_v17  ;;  %v6509_v54 = vld [vmem:[#allocation2 + $0xb8] sm:$0xf0]  ;;  %v6510_v14 = vld [vmem:[#allocation2 + $0xb8] sm:$0xe] }
 0x45b   : > { %v6511_v27 = vor.u32 %v6510_v14, %v6509_v54  ;;  %v2609_v54 = vsel %vm1548_vm6, %v2604_v26, %v2608_v48 }
 0x45d   : > { %v2312_v36 = vrot.slane %v6511_v27, 1  ;;  %v6512_v27 = vld [vmem:[#allocation2 + $0x100] sm:$0xf0] }
 0x45e   : > { %3896 = vmatmul.bf16.gmra.mxu3 %v2311_v29  ;;  %4054 = vmatmul.bf16.gmra.mxu2 %v2597_v56 }
 0x45f   : > { %v2314_v62 = vsel %vm1805_vm7, %v2312_v36, %v2313_v5 }
 0x461   : > { %v3857_v59 = vpop.f32.mrf.mxu3  ;;  %v4015_v44 = vpop.f32.mrf.mxu2 }
 0x462   : > { %v8242_v55 = vadd.f32 %v3857_v59, %v7937_v7  ;;  %v8244_v17 = vadd.f32 %v4015_v44, %v3927_v46  ;;  %v3929_v7 = vadd.f32 %v8968_v42, %v8157_v16  ;;  %v1383_v44 = vld [vmem:[#allocation2 + $0xc0] sm:$0x1]  ;;  %v8262_v16 = vpop.f32.mrf.mxu1  ;;  %v6513_v42 = vld [vmem:[#allocation2 + $0x100] sm:$0xe] }
 0x463   : > { %v2457_v14 = vunpack.c.l.b16 %v1383_v44 }
 0x465   : > { %v8269_v52 = vpack.c.b16 %v2457_v14, %v2457_v14 }
 0x469   : > { %v3859_v29 = vpop.f32.mrf.mxu3  ;;  %v4017_v56 = vpop.f32.mrf.mxu2 }
 0x46a   : > { %v8256_v46 = vadd.f32 %v3859_v29, %v7952_v11  ;;  %v8258_v59 = vadd.f32 %v4017_v56, %v3929_v7  ;;  %v3932_v11 = vadd.f32 %v8019_v38, %v8173_v33  ;;  %v6623_v7 = vld [vmem:[#allocation2 + $0xd8] sm:$0xff]   ;;  %v6514_v29 = vor.u32 %v6513_v42, %v6512_v27  ;;  %v8277_v48 = vpop.f32.mrf.mxu1 }
 0x46b   : > { %v2613_v0 = vshll.u32 %v6623_v7, 16  ;;  %v2618_v56 = vshll.u32 %v8269_v52, 16  ;;  %8969 = vst [vmem:[#allocation21_spill] sm:$0xff] %v8277_v48  ;;  %v3934_v38 = vadd.f32 %v8039_v28, %v8182_v30  ;;  %v2611_v33 = vshrl.u32 %v6623_v7, 16 }
 0x46c   : > { %v3937_v28 = vadd.f32 %v8121_v37, %v8195_v15  ;;  %v3939_v37 = vadd.f32 %v8134_v49, %v8206_v12 }
 0x46d   : > { %v2615_v5 = vrot.slane %v2613_v0, 1  ;;  %v2620_v14 = vrot.slane %v2618_v56, 1 }
 0x46e   : > { %3901 = vmatmul.bf16.gmra.mxu3 %v2314_v62  ;;  %4059 = vmatmul.bf16.gmra.mxu2 %v2609_v54  ;;  %v2316_v54 = vrot.slane %v7963_v22, 1 }
 0x471   : > { %v3862_v1 = vpop.f32.mrf.mxu3  ;;  %v4020_v39 = vpop.f32.mrf.mxu2 }
 0x472   : > { %v8272_v36 = vadd.f32 %v3862_v1, %v7970_v21  ;;  %v8274_v26 = vadd.f32 %v4020_v39, %v3932_v11  ;;  %v2315_v21 = vrot.slane %v6514_v29, 1  ;;  %v1384_v1 = vld [vmem:[#allocation2 + $0xf0] sm:$0x1]  ;;  %v2616_v39 = vor.u32 %v2615_v5, %v2611_v33  ;;  %v8298_v33 = vpop.f32.mrf.mxu1 }
 0x473   : > { %v2458_v0 = vunpack.c.l.b16 %v1384_v1  ;;  %v6624_v5 = vld [vmem:[#allocation2 + $0x50] sm:$0xff]   ;;  %8971 = vst [vmem:[#allocation24_spill] sm:$0xff] %v8298_v33 }
 0x474   : > { %v2317_v27 = vsel %vm1805_vm7, %v2315_v21, %v2316_v54  ;;  %v2621_v42 = vsel %vm1548_vm6, %v2616_v39, %v2620_v14  ;;  %v2623_v15 = vshrl.u32 %v6624_v5, 16 }
 0x475   : > { %v8291_v7 = vpack.c.b16 %v2458_v0, %v2458_v0 }
 0x477   : > { %v2630_v21 = vshll.u32 %v8291_v7, 16 }
 0x479   : > { %v3864_v44 = vpop.f32.mrf.mxu3  ;;  %v4022_v62 = vpop.f32.mrf.mxu2 }
 0x47a   : > { %v8283_v23 = vadd.f32 %v3864_v44, %v7981_v6  ;;  %v8285_v11 = vadd.f32 %v4022_v62, %v3934_v38  ;;  %v8970_v6 = vld [vmem:[#allocation19_spill] sm:$0xff]  ;;  %v2625_v38 = vshll.u32 %v6624_v5, 16  ;;  %v6515_v44 = vld [vmem:[#allocation2 + $0x108] sm:$0xf0]  ;;  %v6516_v62 = vld [vmem:[#allocation2 + $0x108] sm:$0xe]  ;;  %v8309_v48 = vpop.f32.mrf.mxu1 }
 0x47b   : > { %v6517_v14 = vor.u32 %v6516_v62, %v6515_v44  ;;  %8973 = vst [vmem:[#allocation25_spill] sm:$0xff] %v8309_v48  ;;  %v8974_v62 = vld [vmem:[#allocation6_spill] sm:$0xff] }
 0x47c   : > { %v2627_v54 = vrot.slane %v2625_v38, 1 }
 0x47d   : > { %v2734_v33 = vrot.slane %v6517_v14, 1 }
 0x47e   : > { %3906 = vmatmul.bf16.gmra.mxu3 %v2317_v27  ;;  %4064 = vmatmul.bf16.gmra.mxu2 %v2621_v42  ;;  %v2632_v27 = vrot.slane %v2630_v21, 1  ;;  %v8972_v42 = vld [vmem:[#allocation13_spill] sm:$0xff]  ;;  %v6625_v21 = vld [vmem:[#allocation2 + $0xb8] sm:$0xff]  }
 0x47f   : > { %v2735_v0 = vrot.slane %v8972_v42, 1 }
 0x481   : > { %v3867_v30 = vpop.f32.mrf.mxu3  ;;  %v4025_v22 = vpop.f32.mrf.mxu2  ;;  %v2736_v49 = vsel %vm1805_vm7, %v2734_v33, %v2735_v0  ;;  %v2635_v33 = vshrl.u32 %v6625_v21, 16 }
 0x482   : > { %v8294_v29 = vadd.f32 %v3867_v30, %v8970_v6  ;;  %v8296_v56 = vadd.f32 %v4025_v22, %v3937_v28  ;;  %v1385_v22 = vld [vmem:[#allocation2 + $0x28] sm:$0x1]  ;;  %v2628_v6 = vor.u32 %v2627_v54, %v2623_v15  ;;  %v6519_v54 = vld [vmem:[#allocation2 + $0x30] sm:$0xe] }
 0x483   : > { %v2459_v12 = vunpack.c.l.b16 %v1385_v22  ;;  %v8977_v22 = vld [vmem:[#allocation14_spill] sm:$0xff] }
 0x484   : > { %v2633_v38 = vsel %vm1548_vm6, %v2628_v6, %v2632_v27  ;;  %v2738_v6 = vrot.slane %v8977_v22, 1 }
 0x485   : > { %v8313_v44 = vpack.c.b16 %v2459_v12, %v2459_v12 }
 0x487   : > { %v2642_v14 = vshll.u32 %v8313_v44, 16 }
 0x489   : > { %v3869_v1 = vpop.f32.mrf.mxu3  ;;  %v4027_v39 = vpop.f32.mrf.mxu2  ;;  %v2644_v0 = vrot.slane %v2642_v14, 1  ;;  %v8979_v14 = vld [vmem:[#allocation22_spill] sm:$0xff] }
 0x48a   : > { %v8305_v28 = vadd.f32 %v3869_v1, %v8003_v4  ;;  %v8307_v30 = vadd.f32 %v4027_v39, %v3939_v37  ;;  %v2637_v37 = vshll.u32 %v6625_v21, 16  ;;  %v6518_v1 = vld [vmem:[#allocation2 + $0x30] sm:$0xf0]  ;;  %v8319_v39 = vpop.f32.mrf.mxu1  ;;  %v2649_v21 = vshll.u32 %v8034_v2, 16 }
 0x48b   : > { %8976 = vst [vmem:[#allocation29_spill] sm:$0xff] %v8319_v39  ;;  %v6520_v27 = vor.u32 %v6519_v54, %v6518_v1 }
 0x48c   : > { %v2639_v15 = vrot.slane %v2637_v37, 1 }
 0x48e   : > { %4069 = vmatmul.bf16.gmra.mxu2 %v2633_v38  ;;  %4098 = vmatmul.bf16.vlgmr.msrb.gmra.mxu3 %v2736_v49  ;;  %v1386_v49 = vld [vmem:[#allocation2] sm:$0x1]  ;;  %v2640_v12 = vor.u32 %v2639_v15, %v2635_v33  ;;  %v6522_v15 = vld [vmem:[#allocation2 + $0x80] sm:$0xe]  ;;  %v2651_v33 = vrot.slane %v2649_v21, 1  ;;  %v2661_v21 = vshll.u32 %v8246_v20, 16 }
 0x491   : > { %v3872_v5 = vpop.f32.mrf.mxu3 }
 0x492   : > { %v8316_v4 = vadd.f32 %v3872_v5, %v8974_v62  ;;  %v2737_v5 = vrot.slane %v6520_v27, 1  ;;  %v2645_v62 = vsel %vm1548_vm6, %v2640_v12, %v2644_v0  ;;  %v8327_v37 = vpop.f32.mrf.mxu1  ;;  %v2647_v27 = vshrl.u32 %v8034_v2, 16 }
 0x493   : > { %8978 = vst [vmem:[#allocation26_spill] sm:$0xff] %v8327_v37 }
 0x494   : > { %8975 = vst [vmem:[#allocation37_spill] sm:$0xff] %v8316_v4  ;;  %v2739_v48 = vsel %vm1805_vm7, %v2737_v5, %v2738_v6  ;;  %v2460_v4 = vunpack.c.l.b16 %v1386_v49  ;;  %v1387_v6 = vld [vmem:[#allocation2 + $0xe8] sm:$0x1]  ;;  %v8980_v5 = vld [vmem:[#allocation15_spill] sm:$0xff] }
 0x496   : > { %v8330_v54 = vpack.c.b16 %v2460_v4, %v2460_v4 }
 0x498   : > { %v2654_v0 = vshll.u32 %v8330_v54, 16 }
 0x499   : > { %v3874_v42 = vpop.f32.mrf.mxu3 }
 0x49a   : > { %v8323_v38 = vadd.f32 %v3874_v42, %v8030_v50  ;;  %v6521_v42 = vld [vmem:[#allocation2 + $0x80] sm:$0xf0]  ;;  %v2656_v12 = vrot.slane %v2654_v0, 1  ;;  %v8341_v37 = vpop.f32.mrf.mxu1  ;;  %v2663_v0 = vrot.slane %v2661_v21, 1 }
 0x49b   : > { %v6523_v22 = vor.u32 %v6522_v15, %v6521_v42 }
 0x49e   : > { %4074 = vmatmul.bf16.gmra.mxu2 %v2645_v62  ;;  %4103 = vmatmul.bf16.gmra.mxu3 %v2739_v48  ;;  %v2652_v48 = vor.u32 %v2651_v33, %v2647_v27  ;;  %v2741_v62 = vrot.slane %v8980_v5, 1  ;;  %v2659_v33 = vshrl.u32 %v8246_v20, 16 }
 0x4a0   : > { %v2657_v39 = vsel %vm1548_vm6, %v2652_v48, %v2656_v12 }
 0x4a1   : > { %v3877_v1 = vpop.f32.mrf.mxu3 }
 0x4a2   : > { %v8333_v50 = vadd.f32 %v3877_v1, %v8979_v14  ;;  %v2740_v1 = vrot.slane %v6523_v22, 1  ;;  %v2461_v14 = vunpack.c.l.b16 %v1387_v6  ;;  %v6524_v6 = vld [vmem:[#allocation2 + $0x118] sm:$0xf0]  ;;  %v8356_v48 = vpop.f32.mrf.mxu1 }
 0x4a4   : > { %v2742_v2 = vsel %vm1805_vm7, %v2740_v1, %v2741_v62  ;;  %v8346_v42 = vpack.c.b16 %v2461_v14, %v2461_v14 }
 0x4a6   : > { %v2666_v22 = vshll.u32 %v8346_v42, 16 }
 0x4a8   : > { %v2668_v12 = vrot.slane %v2666_v22, 1 }
 0x4a9   : > { %v3879_v49 = vpop.f32.mrf.mxu3 }
 0x4aa   : > { %v8339_v4 = vadd.f32 %v3879_v49, %v8060_v51  ;;  %v5879_v51 = vld [vmem:[%s8822_s5] sm:$0xff]  ;;  %v2664_v49 = vor.u32 %v2663_v0, %v2659_v33  ;;  %v8364_v21 = vpop.f32.mrf.mxu1  ;;  %v6527_v33 = vld [vmem:[#allocation2 + $0xf8] sm:$0xf0]  ;;  %v6528_v0 = vld [vmem:[#allocation2 + $0xf8] sm:$0xe] }
 0x4ab   : > { %4302 = vmatpush.bf16.msrb.mxu0 %v5879_v51 }
 0x4ac   : > { %v2669_v14 = vsel %vm1548_vm6, %v2664_v49, %v2668_v12 }
 0x4ae   : > { %4079 = vmatmul.bf16.gmra.mxu2 %v2657_v39  ;;  %4108 = vmatmul.bf16.gmra.mxu3 %v2742_v2  ;;  %v6525_v39 = vld [vmem:[#allocation2 + $0x118] sm:$0xe] }
 0x4af   : > { %v6526_v5 = vor.u32 %v6525_v39, %v6524_v6  ;;  %v2747_v6 = vrot.slane %v8091_v53, 1 }
 0x4b1   : > { %v3882_v15 = vpop.f32.mrf.mxu3  ;;  %v2743_v20 = vrot.slane %v6526_v5, 1 }
 0x4b2   : > { %v8349_v27 = vadd.f32 %v3882_v15, %v8074_v25  ;;  %v2744_v25 = vrot.slane %v8069_v41, 1  ;;  %v6529_v41 = vor.u32 %v6528_v0, %v6527_v33  ;;  %v8369_v22 = vpop.f32.mrf.mxu1 }
 0x4b4   : > { %v2745_v2 = vsel %vm1805_vm7, %v2743_v20, %v2744_v25  ;;  %v2746_v49 = vrot.slane %v6529_v41, 1  ;;  %v6531_v20 = vld [vmem:[#allocation2 + $0x8] sm:$0xe] }
 0x4b6   : > { %v2748_v12 = vsel %vm1805_vm7, %v2746_v49, %v2747_v6  ;;  %v6533_v6 = vld [vmem:[#allocation2 + $0x20] sm:$0xf0]  ;;  %v6534_v49 = vld [vmem:[#allocation2 + $0x20] sm:$0xe] }
 0x4b9   : > { %v3884_v62 = vpop.f32.mrf.mxu3 }
 0x4ba   : > { %v8360_v1 = vadd.f32 %v3884_v62, %v8085_v24  ;;  %v8380_v25 = vpop.f32.mrf.mxu1 }
 0x4be   : > { %4084 = vmatmul.bf16.gmra.mxu2 %v2669_v14  ;;  %4113 = vmatmul.bf16.gmra.mxu3 %v2745_v2  ;;  %v6530_v14 = vld [vmem:[#allocation2 + $0x8] sm:$0xf0] }
 0x4bf   : > { %v6532_v53 = vor.u32 %v6531_v20, %v6530_v14 }
 0x4c1   : > { %v3887_v15 = vpop.f32.mrf.mxu3  ;;  %v2749_v33 = vrot.slane %v6532_v53, 1 }
 0x4c2   : > { %v8367_v51 = vadd.f32 %v3887_v15, %v8096_v9  ;;  %v5805_v9 = vld [vmem:[%s6797_s16 + $0x110] sm:$0xff]  ;;  %v8387_v0 = vpop.f32.mrf.mxu1 }
 0x4c3   : > { %5382 = vmatmul.msk.bf16.gmra.mxu0 %vm591_vm1, %v5805_v9  ;;  %8981 = vst [vmem:[#allocation27_spill] sm:$0xff] %v8387_v0  ;;  %v2753_v9 = vrot.slane %v8138_v47, 1 }
 0x4c9   : > { %v3889_v24 = vpop.f32.mrf.mxu3 }
 0x4ca   : > { %v8373_v39 = vadd.f32 %v3889_v24, %v8105_v40  ;;  %v2750_v40 = vrot.slane %v8114_v63, 1  ;;  %v8395_v63 = vpop.f32.mrf.mxu1 }
 0x4cb   : > { %8982 = vst [vmem:[#allocation28_spill] sm:$0xff] %v8395_v63 }
 0x4ce   : > { %4118 = vmatmul.bf16.gmra.mxu3 %v2748_v12  ;;  %v5806_v12 = vld [vmem:[%s6797_s16 + $0x118] sm:$0xff] }
 0x4d1   : > { %v3892_v5 = vpop.f32.mrf.mxu3 }
 0x4d2   : > { %v8377_v62 = vadd.f32 %v3892_v5, %v8116_v57  ;;  %v2751_v57 = vsel %vm1805_vm7, %v2749_v33, %v2750_v40 }
 0x4d3   : > { %5383 = vmatmul.msk.bf16.gmra.mxu0 %vm591_vm1, %v5806_v12  ;;  %v8404_v12 = vpop.f32.mrf.mxu1 }
 0x4d4   : > { %8984 = vst [vmem:[#allocation44_spill] sm:$0xff] %v8404_v12 }
 0x4d9   : > { %v3894_v2 = vpop.f32.mrf.mxu3 }
 0x4da   : > { %v8385_v15 = vadd.f32 %v3894_v2, %v8127_v8  ;;  %v6535_v8 = vor.u32 %v6534_v49, %v6533_v6  ;;  %v5705_v2 = vld [vmem:[%s6797_s16 + $0x14] sm:$0xf] }
 0x4dc   : > { %v2752_v20 = vrot.slane %v6535_v8, 1 }
 0x4de   : > { %4123 = vmatmul.bf16.gmra.mxu3 %v2751_v57  ;;  %v2754_v53 = vsel %vm1805_vm7, %v2752_v20, %v2753_v9  ;;  %v4446_v57 = vshll.u32 %v5705_v2, 16  ;;  %v6536_v20 = vld [vmem:[#allocation2 + $0x90] sm:$0xf0] }
 0x4e0   : > { %v4448_v63 = vrot.slane %v4446_v57, 5 }
 0x4e1   : > { %v3897_v41 = vpop.f32.mrf.mxu3 }
 0x4e2   : > { %v8391_v24 = vadd.f32 %v3897_v41, %v8140_v10  ;;  %v5704_v10 = vld [vmem:[%s6797_s16 + $0x10] sm:$0xf]  ;;  %v4450_v41 = vshrl.u32 %v5705_v2, 16 }
 0x4e3   : > { %v4437_v40 = vshrl.u32 %v5704_v10, 16  ;;  %v4440_v33 = vshll.u32 %v5704_v10, 16 }
 0x4e4   : > { %v4452_v47 = vrot.slane %v4450_v41, 4 }
 0x4e5   : > { %v4439_v6 = vrot.slane %v4437_v40, 4  ;;  %v4442_v49 = vrot.slane %v4440_v33, 5 }
 0x4e6   : > { %v4453_v9 = vor.u32 %v4452_v47, %v4448_v63 }
 0x4e7   : > { %v4443_v8 = vor.u32 %v4442_v49, %v4439_v6  ;;  %v8418_v49 = vpop.f32.mrf.mxu1 }
 0x4e8   : > { %v4454_v2 = vrot.slane %v4453_v9, 4  ;;  %8987 = vst [vmem:[#allocation31_spill] sm:$0xff] %v8418_v49 }
 0x4e9   : > { %v3899_v5 = vpop.f32.mrf.mxu3  ;;  %v4444_v10 = vrot.slane %v4443_v8, 4 }
 0x4ea   : > { %v8399_v14 = vadd.f32 %v3899_v5, %v8154_v45  ;;  %v5706_v45 = vld [vmem:[%s6797_s16 + $0x18] sm:$0x1] }
 0x4ec   : > { %8983 = vst [vmem:[#allocation30_spill] sm:$0xff] %v8399_v14  ;;  %v6537_v14 = vld [vmem:[#allocation2 + $0x90] sm:$0xe] }
 0x4ee   : > { %4128 = vmatmul.bf16.gmra.mxu3 %v2754_v53  ;;  %v4456_v53 = vshll.u32 %v5706_v45, 16  ;;  %v2756_v45 = vrot.slane %v8166_v43, 1 }
 0x4f0   : > { %v4458_v33 = vrot.slane %v4456_v53, 5 }
 0x4f1   : > { %v3902_v0 = vpop.f32.mrf.mxu3 }
 0x4f2   : > { %v8408_v5 = vadd.f32 %v3902_v0, %v8170_v34  ;;  %v4449_v34 = vsel %vm8410_vm10, %v4444_v10, %v4448_v63  ;;  %v6538_v0 = vor.u32 %v6537_v14, %v6536_v20  ;;  %v4459_v57 = vsel %vm8410_vm10, %v4454_v2, %v4458_v33  ;;  %v5707_v14 = vld [vmem:[%s6797_s16 + $0x20] sm:$0xf]  ;;  %v5708_v20 = vld [vmem:[%s6797_s16 + $0x24] sm:$0xf] }
 0x4f3   : > { %v4825_v41 = vunpack.c.l.b16 %v4449_v34  ;;  %v4826_v6 = vunpack.c.l.b16 %v4459_v57  ;;  %v4461_v53 = vshrl.u32 %v5707_v14, 16  ;;  %v4464_v10 = vshll.u32 %v5707_v14, 16 }
 0x4f4   : > { %v2755_v12 = vrot.slane %v6538_v0, 1  ;;  %v4470_v2 = vshll.u32 %v5708_v20, 16  ;;  %v4474_v33 = vshrl.u32 %v5708_v20, 16 }
 0x4f5   : > { %v4857_v9 = vpack.c.b16 %v4826_v6, %v4825_v41  ;;  %v4463_v34 = vrot.slane %v4461_v53, 4  ;;  %v4466_v57 = vrot.slane %v4464_v10, 5  ;;  %v5709_v41 = vld [vmem:[%s6797_s16 + $0x28] sm:$0x1] }
 0x4f6   : > { %v2757_v63 = vsel %vm1805_vm7, %v2755_v12, %v2756_v45  ;;  %v4472_v43 = vrot.slane %v4470_v2, 5  ;;  %v4476_v49 = vrot.slane %v4474_v33, 4  ;;  %v6539_v45 = vld [vmem:[#allocation2 + $0x70] sm:$0xf0] }
 0x4f7   : > { %5752 = vmatmul.msk.bf16.vlgmr.msrb.gmra.mxu1 %vm591_vm1, %v4857_v9  ;;  %v4467_v6 = vor.u32 %v4466_v57, %v4463_v34  ;;  %v2759_v57 = vrot.slane %v8190_v31, 1 }
 0x4f8   : > { %v4477_v9 = vor.u32 %v4476_v49, %v4472_v43 }
 0x4f9   : > { %v3904_v47 = vpop.f32.mrf.mxu3  ;;  %v4468_v14 = vrot.slane %v4467_v6, 4 }
 0x4fa   : > { %v8422_v8 = vadd.f32 %v3904_v47, %v8179_v60  ;;  %v3996_v47 = vpop.f32.mrf.mxu1  ;;  %v4478_v20 = vrot.slane %v4477_v9, 4 }
 0x4fb   : > { %v4473_v10 = vsel %vm8410_vm10, %v4468_v14, %v4472_v43  ;;  %v5710_v43 = vld [vmem:[%s6797_s16 + $0x30] sm:$0xf] }
 0x4fc   : > { %8988 = vst [vmem:[#allocation32_spill] sm:$0xff] %v8422_v8  ;;  %v4480_v8 = vshll.u32 %v5709_v41, 16  ;;  %v4485_v6 = vshrl.u32 %v5710_v43, 16  ;;  %v4488_v9 = vshll.u32 %v5710_v43, 16 }
 0x4fe   : > { %4133 = vmatmul.bf16.gmra.mxu3 %v2757_v63  ;;  %v6540_v63 = vld [vmem:[#allocation2 + $0x70] sm:$0xe]  ;;  %v4482_v53 = vrot.slane %v4480_v8, 5  ;;  %v4487_v14 = vrot.slane %v4485_v6, 4 }
 0x4ff   : > { %v6541_v2 = vor.u32 %v6540_v63, %v6539_v45 }
 0x500   : > { %v4483_v33 = vsel %vm8410_vm10, %v4478_v20, %v4482_v53  ;;  %v4490_v20 = vrot.slane %v4488_v9, 5 }
 0x501   : > { %v3907_v60 = vpop.f32.mrf.mxu3  ;;  %v4828_v34 = vunpack.c.l.b16 %v4483_v33  ;;  %v2758_v41 = vrot.slane %v6541_v2, 1 }
 0x502   : > { %v3908_v0 = vadd.f32 %v3907_v60, %v8192_v61  ;;  %v4827_v61 = vunpack.c.l.b16 %v4473_v10  ;;  %v5712_v10 = vld [vmem:[%s6797_s16 + $0x38] sm:$0x1]  ;;  %v4491_v33 = vor.u32 %v4490_v20, %v4487_v14  ;;  %v2762_v14 = vrot.slane %v8217_v13, 1 }
 0x503   : > { %v2760_v8 = vsel %vm1805_vm7, %v2758_v41, %v2759_v57  ;;  %v4504_v2 = vshll.u32 %v5712_v10, 16 }
 0x504   : > { %v8430_v12 = vadd.f32 %v3996_v47, %v3908_v0  ;;  %v4858_v47 = vpack.c.b16 %v4828_v34, %v4827_v61  ;;  %v5711_v0 = vld [vmem:[%s6797_s16 + $0x34] sm:$0xf]  ;;  %v6542_v34 = vld [vmem:[#allocation2 + $0xe0] sm:$0xf0] }
 0x505   : > { %v4494_v45 = vshll.u32 %v5711_v0, 16  ;;  %v4498_v63 = vshrl.u32 %v5711_v0, 16  ;;  %v4506_v41 = vrot.slane %v4504_v2, 5  ;;  %v5713_v2 = vld [vmem:[%s6797_s16 + $0x40] sm:$0xf] }
 0x507   : > { %5753 = vmatmul.msk.bf16.gmra.mxu1 %vm591_vm1, %v4858_v47  ;;  %v4496_v31 = vrot.slane %v4494_v45, 5  ;;  %v4500_v53 = vrot.slane %v4498_v63, 4  ;;  %v4492_v47 = vrot.slane %v4491_v33, 4 }
 0x509   : > { %v3909_v49 = vpop.f32.mrf.mxu3  ;;  %v4501_v61 = vor.u32 %v4500_v53, %v4496_v31 }
 0x50a   : > { %v8438_v60 = vadd.f32 %v3909_v49, %v8203_v19  ;;  %v6543_v49 = vld [vmem:[#allocation2 + $0xe0] sm:$0xe] }
 0x50b   : > { %v4502_v57 = vrot.slane %v4501_v61, 4  ;;  %v6544_v43 = vor.u32 %v6543_v49, %v6542_v34  ;;  %v5714_v34 = vld [vmem:[%s6797_s16 + $0x44] sm:$0xf]  ;;  %v8456_v49 = vpop.f32.mrf.mxu2 }
 0x50c   : > { %v4518_v13 = vshll.u32 %v5714_v34, 16 }
 0x50d   : > { %v4507_v0 = vsel %vm8410_vm10, %v4502_v57, %v4506_v41  ;;  %v2761_v10 = vrot.slane %v6544_v43, 1  ;;  %v4522_v57 = vshrl.u32 %v5714_v34, 16 }
 0x50e   : > { %4138 = vmatmul.bf16.gmra.mxu3 %v2760_v8  ;;  %v4497_v8 = vsel %vm8410_vm10, %v4492_v47, %v4496_v31  ;;  %v4830_v45 = vunpack.c.l.b16 %v4507_v0  ;;  %v4512_v47 = vshll.u32 %v5713_v2, 16  ;;  %v5715_v0 = vld [vmem:[%s6797_s16 + $0x48] sm:$0x1] }
 0x50f   : > { %v4829_v6 = vunpack.c.l.b16 %v4497_v8  ;;  %v2763_v31 = vsel %vm1805_vm7, %v2761_v10, %v2762_v14  ;;  %v4520_v8 = vrot.slane %v4518_v13, 5  ;;  %v6545_v14 = vld [vmem:[#allocation2 + $0xa8] sm:$0xf0] }
 0x510   : > { %v4514_v41 = vrot.slane %v4512_v47, 5 }
 0x511   : > { %v4099_v19 = vpop.f32.mrf.mxu3  ;;  %v4859_v53 = vpack.c.b16 %v4830_v45, %v4829_v6  ;;  %v4524_v6 = vrot.slane %v4522_v57, 4  ;;  %v4528_v45 = vshll.u32 %v5715_v0, 16  ;;  %v2765_v57 = vrot.slane %v8239_v32, 1 }
 0x512   : > { %v4100_v9 = vadd.f32 %v4099_v19, %v8222_v35  ;;  %v4509_v19 = vshrl.u32 %v5713_v2, 16 }
 0x513   : > { %v4530_v10 = vrot.slane %v4528_v45, 5  ;;  %v5716_v45 = vld [vmem:[%s6797_s16 + $0x50] sm:$0xf] }
 0x514   : > { %v4179_v33 = vmax.f32 %v4100_v9, 0.0 }
 0x517   : > { %5754 = vmatmul.msk.bf16.gmra.mxu1 %vm591_vm1, %v4859_v53 }
 0x519   : > { %v4101_v63 = vpop.f32.mrf.mxu3 }
 0x51a   : > { %v4102_v20 = vadd.f32 %v4101_v63, %v8233_v3  ;;  %v4511_v3 = vrot.slane %v4509_v19, 4  ;;  %v4525_v63 = vor.u32 %v4524_v6, %v4520_v8 }
 0x51c   : > { %v4180_v61 = vmax.f32 %v4102_v20, 0.0  ;;  %v4515_v9 = vor.u32 %v4514_v41, %v4511_v3  ;;  %v6546_v20 = vld [vmem:[#allocation2 + $0xa8] sm:$0xe] }
 0x51e   : > { %v4211_v35 = vpack.c.bf16 %v4180_v61, %v4179_v33  ;;  %4143 = vmatmul.bf16.gmra.mxu3 %v2763_v31  ;;  %v4516_v53 = vrot.slane %v4515_v9, 4  ;;  %v4526_v33 = vrot.slane %v4525_v63, 4  ;;  %v6547_v31 = vor.u32 %v6546_v20, %v6545_v14  ;;  %v5717_v63 = vld [vmem:[%s6797_s16 + $0x54] sm:$0xf] }
 0x51f   : > { %v4542_v20 = vshll.u32 %v5717_v63, 16 }
 0x520   : > { %4303 = vmatmul.bf16.vlgmr.msrb.gmra.mxu0 %v4211_v35  ;;  %v4521_v61 = vsel %vm8410_vm10, %v4516_v53, %v4520_v8  ;;  %v4531_v2 = vsel %vm8410_vm10, %v4526_v33, %v4530_v10  ;;  %v8463_v35 = vpop.f32.mrf.mxu2  ;;  %v2764_v0 = vrot.slane %v6547_v31, 1  ;;  %v4546_v53 = vshrl.u32 %v5717_v63, 16 }
 0x521   : > { %v4104_v43 = vpop.f32.mrf.mxu3  ;;  %v4831_v34 = vunpack.c.l.b16 %v4521_v61  ;;  %v4832_v47 = vunpack.c.l.b16 %v4531_v2  ;;  %v4544_v10 = vrot.slane %v4542_v20, 5  ;;  %v5718_v61 = vld [vmem:[%s6797_s16 + $0x58] sm:$0x1] }
 0x522   : > { %v4105_v19 = vadd.f32 %v4104_v43, %v8244_v17  ;;  %v2766_v9 = vsel %vm1805_vm7, %v2764_v0, %v2765_v57  ;;  %v4533_v17 = vshrl.u32 %v5716_v45, 16  ;;  %v4536_v43 = vshll.u32 %v5716_v45, 16  ;;  %v6549_v57 = vld [vmem:[#allocation2 + $0xd8] sm:$0xe] }
 0x523   : > { %v4860_v41 = vpack.c.b16 %v4832_v47, %v4831_v34  ;;  %v4548_v31 = vrot.slane %v4546_v53, 4 }
 0x524   : > { %v4181_v8 = vmax.f32 %v4105_v19, 0.0  ;;  %v4535_v32 = vrot.slane %v4533_v17, 4  ;;  %v4552_v19 = vshll.u32 %v5718_v61, 16 }
 0x525   : > { %v4549_v47 = vor.u32 %v4548_v31, %v4544_v10 }
 0x527   : > { %5755 = vmatmul.msk.bf16.gmra.mxu1 %vm591_vm1, %v4860_v41  ;;  %v4554_v41 = vrot.slane %v4552_v19, 5  ;;  %v4550_v0 = vrot.slane %v4549_v47, 4  ;;  %v5720_v19 = vld [vmem:[%s6797_s16 + $0x64] sm:$0xf] }
 0x528   : > { %v8473_v2 = vpop.f32.mrf.mxu2 }
 0x529   : > { %v4106_v13 = vpop.f32.mrf.mxu3 }
 0x52a   : > { %v4107_v3 = vadd.f32 %v4106_v13, %v8258_v59  ;;  %v4538_v59 = vrot.slane %v4536_v43, 5  ;;  %v6548_v13 = vld [vmem:[#allocation2 + $0xd8] sm:$0xf0]  ;;  %v2768_v43 = vrot.slane %v8269_v52, 1  ;;  %v4566_v52 = vshll.u32 %v5720_v19, 16 }
 0x52c   : > { %v4182_v6 = vmax.f32 %v4107_v3, 0.0  ;;  %v4539_v34 = vor.u32 %v4538_v59, %v4535_v32 }
 0x52e   : > { %4148 = vmatmul.bf16.gmra.mxu3 %v2766_v9  ;;  %v4212_v14 = vpack.c.bf16 %v4182_v6, %v4181_v8  ;;  %v4540_v3 = vrot.slane %v4539_v34, 4  ;;  %v6550_v6 = vor.u32 %v6549_v57, %v6548_v13  ;;  %v4555_v9 = vsel %vm8410_vm10, %v4550_v0, %v4554_v41  ;;  %v5719_v34 = vld [vmem:[%s6797_s16 + $0x60] sm:$0xf]  ;;  %v5721_v0 = vld [vmem:[%s6797_s16 + $0x68] sm:$0x1] }
 0x52f   : > { %v4560_v47 = vshll.u32 %v5719_v34, 16  ;;  %v4570_v13 = vshrl.u32 %v5720_v19, 16 }
 0x530   : > { %4308 = vmatmul.bf16.gmra.mxu0 %v4212_v14  ;;  %v4545_v8 = vsel %vm8410_vm10, %v4540_v3, %v4544_v10  ;;  %v4834_v14 = vunpack.c.l.b16 %v4555_v9  ;;  %v2767_v32 = vrot.slane %v6550_v6, 1  ;;  %v8482_v59 = vpop.f32.mrf.mxu2  ;;  %v4568_v3 = vrot.slane %v4566_v52, 5 }
 0x531   : > { %v4109_v33 = vpop.f32.mrf.mxu3  ;;  %v4833_v45 = vunpack.c.l.b16 %v4545_v8  ;;  %v4562_v57 = vrot.slane %v4560_v47, 5  ;;  %v4572_v8 = vrot.slane %v4570_v13, 4  ;;  %v4576_v9 = vshll.u32 %v5721_v0, 16  ;;  %v5722_v0 = vld [vmem:[%s6797_s16 + $0x70] sm:$0xf] }
 0x532   : > { %v4110_v63 = vadd.f32 %v4109_v33, %v8274_v26  ;;  %v2769_v31 = vsel %vm1805_vm7, %v2767_v32, %v2768_v43  ;;  %v4557_v33 = vshrl.u32 %v5719_v34, 16 }
 0x533   : > { %v4861_v53 = vpack.c.b16 %v4834_v14, %v4833_v45  ;;  %v4573_v45 = vor.u32 %v4572_v8, %v4568_v3  ;;  %v6552_v14 = vld [vmem:[#allocation2 + $0x50] sm:$0xe]  ;;  %v4578_v43 = vrot.slane %v4576_v9, 5  ;;  %v5723_v8 = vld [vmem:[%s6797_s16 + $0x74] sm:$0xf] }
 0x534   : > { %v4183_v10 = vmax.f32 %v4110_v63, 0.0  ;;  %v6551_v63 = vld [vmem:[#allocation2 + $0x50] sm:$0xf0]  ;;  %v4590_v9 = vshll.u32 %v5723_v8, 16 }
 0x537   : > { %5756 = vmatmul.msk.bf16.gmra.mxu1 %vm591_vm1, %v4861_v53 }
 0x538   : > { %v8489_v53 = vpop.f32.mrf.mxu2 }
 0x539   : > { %v4111_v17 = vpop.f32.mrf.mxu3 }
 0x53a   : > { %v4112_v20 = vadd.f32 %v4111_v17, %v8285_v11  ;;  %v4559_v11 = vrot.slane %v4557_v33, 4  ;;  %v2771_v33 = vrot.slane %v8291_v7, 1 }
 0x53c   : > { %v4184_v61 = vmax.f32 %v4112_v20, 0.0  ;;  %v4563_v6 = vor.u32 %v4562_v57, %v4559_v11  ;;  %v4574_v20 = vrot.slane %v4573_v45, 4  ;;  %v4594_v45 = vshrl.u32 %v5723_v8, 16 }
 0x53e   : > { %4153 = vmatmul.bf16.gmra.mxu3 %v2769_v31  ;;  %v4213_v26 = vpack.c.bf16 %v4184_v61, %v4183_v10  ;;  %v4564_v17 = vrot.slane %v4563_v6, 4  ;;  %v6553_v10 = vor.u32 %v6552_v14, %v6551_v63  ;;  %v4579_v61 = vsel %vm8410_vm10, %v4574_v20, %v4578_v43  ;;  %v5724_v20 = vld [vmem:[%s6797_s16 + $0x78] sm:$0x1] }
 0x53f   : > { %v4836_v19 = vunpack.c.l.b16 %v4579_v61  ;;  %v4592_v14 = vrot.slane %v4590_v9, 5  ;;  %v4600_v61 = vshll.u32 %v5724_v20, 16 }
 0x540   : > { %4313 = vmatmul.bf16.gmra.mxu0 %v4213_v26  ;;  %v4569_v32 = vsel %vm8410_vm10, %v4564_v17, %v4568_v3  ;;  %v2770_v13 = vrot.slane %v6553_v10, 1  ;;  %v8502_v7 = vpop.f32.mrf.mxu2  ;;  %v883_v43 = vpop.f32.mrf.mxu0 }
 0x541   : > { %v4114_v41 = vpop.f32.mrf.mxu3  ;;  %v4835_v31 = vunpack.c.l.b16 %v4569_v32  ;;  %v4596_v32 = vrot.slane %v4594_v45, 4 }
 0x542   : > { %v4115_v34 = vadd.f32 %v4114_v41, %v8296_v56  ;;  %v2772_v3 = vsel %vm1805_vm7, %v2770_v13, %v2771_v33  ;;  %v4581_v56 = vshrl.u32 %v5722_v0, 16  ;;  %v4584_v41 = vshll.u32 %v5722_v0, 16  ;;  %v6555_v33 = vld [vmem:[#allocation2 + $0xb8] sm:$0xe] }
 0x543   : > { %v4862_v52 = vpack.c.b16 %v4836_v19, %v4835_v31  ;;  %v4597_v31 = vor.u32 %v4596_v32, %v4592_v14 }
 0x544   : > { %v4185_v11 = vmax.f32 %v4115_v34, 0.0  ;;  %v4586_v63 = vrot.slane %v4584_v41, 5  ;;  %v8989_v34 = vld [vmem:[#allocation17_spill] sm:$0xff] }
 0x545   : > { %v3942_v19 = vadd.f32 %v8989_v34, %v8220_v58  ;;  %v4598_v13 = vrot.slane %v4597_v31, 4 }
 0x547   : > { %5757 = vmatmul.msk.bf16.gmra.mxu1 %vm591_vm1, %v4862_v52  ;;  %v4602_v52 = vrot.slane %v4600_v61, 5  ;;  %v5725_v61 = vld [vmem:[%s6797_s16 + $0x80] sm:$0xf] }
 0x548   : > { %v4605_v31 = vshrl.u32 %v5725_v61, 16  ;;  %v4608_v34 = vshll.u32 %v5725_v61, 16 }
 0x549   : > { %v4116_v26 = vpop.f32.mrf.mxu3 }
 0x54a   : > { %v4117_v47 = vadd.f32 %v4116_v26, %v8307_v30  ;;  %v4583_v30 = vrot.slane %v4581_v56, 4  ;;  %v6554_v26 = vld [vmem:[#allocation2 + $0xb8] sm:$0xf0] }
 0x54b   : > { %v6556_v8 = vor.u32 %v6555_v33, %v6554_v26  ;;  %v4607_v26 = vrot.slane %v4605_v31, 4 }
 0x54c   : > { %v4186_v57 = vmax.f32 %v4117_v47, 0.0  ;;  %v4587_v10 = vor.u32 %v4586_v63, %v4583_v30  ;;  %v885_v30 = vpop.f32.mrf.mxu0  ;;  %v8516_v63 = vpop.f32.mrf.mxu2 }
 0x54e   : > { %4158 = vmatmul.bf16.gmra.mxu3 %v2772_v3  ;;  %v4214_v6 = vpack.c.bf16 %v4186_v57, %v4185_v11  ;;  %v4588_v47 = vrot.slane %v4587_v10, 4  ;;  %v4031_v11 = vadd.f32 %v8456_v49, %v3942_v19  ;;  %v8990_v57 = vld [vmem:[#allocation8_spill] sm:$0xff]  ;;  %v2774_v49 = vrot.slane %v8313_v44, 1 }
 0x54f   : > { %v3944_v3 = vadd.f32 %v8990_v57, %v8231_v18  ;;  %v6557_v57 = vld [vmem:[#allocation2 + $0x100] sm:$0xf0] }
 0x550   : > { %4318 = vmatmul.bf16.gmra.mxu0 %v4214_v6  ;;  %v4593_v0 = vsel %vm8410_vm10, %v4588_v47, %v4592_v14  ;;  %v4603_v6 = vsel %vm8410_vm10, %v4598_v13, %v4602_v52  ;;  %v2773_v14 = vrot.slane %v6556_v8, 1  ;;  %v5727_v47 = vld [vmem:[%s6797_s16 + $0x88] sm:$0x1]  ;;  %v4610_v52 = vrot.slane %v4608_v34, 5 }
 0x551   : > { %v4119_v17 = vpop.f32.mrf.mxu3  ;;  %v4837_v56 = vunpack.c.l.b16 %v4593_v0  ;;  %v4033_v58 = vadd.f32 %v8463_v35, %v3944_v3  ;;  %v4838_v9 = vunpack.c.l.b16 %v4603_v6  ;;  %v5726_v35 = vld [vmem:[%s6797_s16 + $0x84] sm:$0xf]  ;;  %v6558_v3 = vld [vmem:[#allocation2 + $0x100] sm:$0xe]  ;;  %v4624_v0 = vshll.u32 %v5727_v47, 16 }
 0x552   : > { %v4120_v41 = vadd.f32 %v4119_v17, %v4031_v11  ;;  %v2775_v10 = vsel %vm1805_vm7, %v2773_v14, %v2774_v49  ;;  %v4614_v44 = vshll.u32 %v5726_v35, 16  ;;  %v4618_v19 = vshrl.u32 %v5726_v35, 16  ;;  %v8992_v14 = vld [vmem:[#allocation4_spill] sm:$0xff] }
 0x553   : > { %v4863_v43 = vpack.c.b16 %v4838_v9, %v4837_v56  ;;  %v4611_v6 = vor.u32 %v4610_v52, %v4607_v26  ;;  %v6559_v49 = vor.u32 %v6558_v3, %v6557_v57 }
 0x554   : > { %v4187_v20 = vmax.f32 %v4120_v41, 0.0  ;;  %v4616_v13 = vrot.slane %v4614_v44, 5  ;;  %v4620_v11 = vrot.slane %v4618_v19, 4  ;;  %v888_v8 = vpop.f32.mrf.mxu0  ;;  %v8525_v9 = vpop.f32.mrf.mxu2 }
 0x555   : > { %v4612_v30 = vrot.slane %v4611_v6, 4  ;;  %v2776_v34 = vrot.slane %v6559_v49, 1  ;;  %v6561_v6 = vld [vmem:[#allocation2 + $0x40] sm:$0xe] }
 0x556   : > { %v4621_v56 = vor.u32 %v4620_v11, %v4616_v13  ;;  %v5729_v11 = vld [vmem:[%s6797_s16 + $0x94] sm:$0xf] }
 0x557   : > { %5758 = vmatmul.msk.bf16.gmra.mxu1 %vm591_vm1, %v4863_v43  ;;  %v4642_v8 = vshrl.u32 %v5729_v11, 16 }
 0x559   : > { %v4121_v45 = vpop.f32.mrf.mxu3 }
 0x55a   : > { %v4122_v18 = vadd.f32 %v4121_v45, %v4033_v58  ;;  %v8991_v58 = vld [vmem:[#allocation18_spill] sm:$0xff]  ;;  %v4626_v45 = vrot.slane %v4624_v0, 5  ;;  %v4638_v0 = vshll.u32 %v5729_v11, 16 }
 0x55b   : > { %v3947_v41 = vadd.f32 %v8991_v58, %v8242_v55 }
 0x55c   : > { %v4188_v32 = vmax.f32 %v4122_v18, 0.0  ;;  %v4622_v18 = vrot.slane %v4621_v56, 4 }
 0x55d   : > { %v4036_v43 = vadd.f32 %v8473_v2, %v3947_v41  ;;  %v2777_v2 = vrot.slane %v8330_v54, 1  ;;  %v6560_v54 = vld [vmem:[#allocation2 + $0x40] sm:$0xf0]  ;;  %v4640_v41 = vrot.slane %v4638_v0, 5 }
 0x55e   : > { %v4215_v17 = vpack.c.bf16 %v4188_v32, %v4187_v20  ;;  %4163 = vmatmul.bf16.gmra.mxu3 %v2775_v10  ;;  %v3949_v20 = vadd.f32 %v8992_v14, %v8256_v46  ;;  %v4617_v32 = vsel %vm8410_vm10, %v4612_v30, %v4616_v13  ;;  %v4627_v10 = vsel %vm8410_vm10, %v4622_v18, %v4626_v45  ;;  %v890_v46 = vpop.f32.mrf.mxu0  ;;  %v5728_v13 = vld [vmem:[%s6797_s16 + $0x90] sm:$0xf]  ;;  %v8542_v45 = vpop.f32.mrf.mxu1  ;;  %v5730_v30 = vld [vmem:[%s6797_s16 + $0x98] sm:$0x1] }
 0x55f   : > { %v4839_v35 = vunpack.c.l.b16 %v4617_v32  ;;  %v2778_v52 = vsel %vm1805_vm7, %v2776_v34, %v2777_v2  ;;  %v4629_v57 = vshrl.u32 %v5728_v13, 16  ;;  %v4632_v3 = vshll.u32 %v5728_v13, 16  ;;  %v8994_v34 = vld [vmem:[#allocation20_spill] sm:$0xff] }
 0x560   : > { %4323 = vmatmul.bf16.gmra.mxu0 %v4215_v17  ;;  %v4038_v55 = vadd.f32 %v8482_v59, %v3949_v20  ;;  %v4840_v17 = vunpack.c.l.b16 %v4627_v10  ;;  %v8540_v59 = vpop.f32.mrf.mxu2  ;;  %v4644_v18 = vrot.slane %v4642_v8, 4  ;;  %v4648_v14 = vshll.u32 %v5730_v30, 16  ;;  %v8993_v10 = vld [vmem:[#allocation3_spill] sm:$0xff] }
 0x561   : > { %v4124_v33 = vpop.f32.mrf.mxu3  ;;  %v4631_v56 = vrot.slane %v4629_v57, 4  ;;  %v4634_v58 = vrot.slane %v4632_v3, 5  ;;  %v6562_v20 = vor.u32 %v6561_v6, %v6560_v54  ;;  %v3954_v2 = vadd.f32 %v8994_v34, %v8283_v23  ;;  %v5731_v54 = vld [vmem:[%s6797_s16 + $0xa0] sm:$0xf]  ;;  %v5732_v8 = vld [vmem:[%s6797_s16 + $0xa4] sm:$0xf] }
 0x562   : > { %v4125_v61 = vadd.f32 %v4124_v33, %v4036_v43  ;;  %v4864_v19 = vpack.c.b16 %v4840_v17, %v4839_v35  ;;  %v4645_v32 = vor.u32 %v4644_v18, %v4640_v41  ;;  %v4650_v35 = vrot.slane %v4648_v14, 5 }
 0x563   : > { %v4635_v43 = vor.u32 %v4634_v58, %v4631_v56  ;;  %v2780_v46 = vrot.slane %v8346_v42, 1  ;;  %v4656_v56 = vshll.u32 %v5731_v54, 16  ;;  %v4662_v58 = vshll.u32 %v5732_v8, 16 }
 0x564   : > { %v4189_v26 = vmax.f32 %v4125_v61, 0.0  ;;  %v4646_v17 = vrot.slane %v4645_v32, 4 }
 0x565   : > { %v4636_v61 = vrot.slane %v4635_v43, 4  ;;  %v4658_v30 = vrot.slane %v4656_v56, 5  ;;  %v4664_v18 = vrot.slane %v4662_v58, 5 }
 0x567   : > { %5759 = vmatmul.msk.bf16.gmra.mxu1 %vm591_vm1, %v4864_v19  ;;  %v2779_v19 = vrot.slane %v6562_v20, 1  ;;  %v5733_v20 = vld [vmem:[%s6797_s16 + $0xa8] sm:$0x1] }
 0x569   : > { %v4126_v31 = vpop.f32.mrf.mxu3  ;;  %v2781_v3 = vsel %vm1805_vm7, %v2779_v19, %v2780_v46  ;;  %v3959_v46 = vadd.f32 %v8262_v16, %v8305_v28 }
 0x56a   : > { %v4127_v44 = vadd.f32 %v4126_v31, %v4038_v55  ;;  %v3952_v55 = vadd.f32 %v8993_v10, %v8272_v36 }
 0x56c   : > { %v4190_v47 = vmax.f32 %v4127_v44, 0.0  ;;  %v4041_v31 = vadd.f32 %v8489_v53, %v3952_v55  ;;  %v4641_v44 = vsel %vm8410_vm10, %v4636_v61, %v4640_v41  ;;  %v4666_v41 = vshrl.u32 %v5732_v8, 16 }
 0x56d   : > { %v4841_v36 = vunpack.c.l.b16 %v4641_v44  ;;  %v4672_v61 = vshll.u32 %v5733_v20, 16 }
 0x56e   : > { %v4216_v33 = vpack.c.bf16 %v4190_v47, %v4189_v26  ;;  %4168 = vmatmul.bf16.gmra.mxu3 %v2778_v52  ;;  %v4651_v26 = vsel %vm8410_vm10, %v4646_v17, %v4650_v35  ;;  %v4043_v47 = vadd.f32 %v8502_v7, %v3954_v2  ;;  %v8556_v52 = vpop.f32.mrf.mxu2  ;;  %v4653_v7 = vshrl.u32 %v5731_v54, 16  ;;  %v8995_v17 = vld [vmem:[#allocation10_spill] sm:$0xff] }
 0x56f   : > { %v4842_v13 = vunpack.c.l.b16 %v4651_v26  ;;  %v4668_v32 = vrot.slane %v4666_v41, 4  ;;  %v4674_v2 = vrot.slane %v4672_v61, 5  ;;  %v8996_v61 = vld [vmem:[#allocation37_spill] sm:$0xff] }
 0x570   : > { %4328 = vmatmul.bf16.gmra.mxu0 %v4216_v33 }
 0x571   : > { %v4129_v49 = vpop.f32.mrf.mxu3  ;;  %v4865_v57 = vpack.c.b16 %v4842_v13, %v4841_v36  ;;  %v4669_v35 = vor.u32 %v4668_v32, %v4664_v18 }
 0x572   : > { %v4130_v53 = vadd.f32 %v4129_v49, %v4041_v31  ;;  %v4655_v49 = vrot.slane %v4653_v7, 4  ;;  %v3957_v31 = vadd.f32 %v8995_v17, %v8294_v29 }
 0x573   : > { %v4670_v44 = vrot.slane %v4669_v35, 4  ;;  %v8997_v35 = vld [vmem:[#allocation21_spill] sm:$0xff] }
 0x574   : > { %v8558_v23 = vpop.f32.mrf.mxu1  ;;  %v4191_v0 = vmax.f32 %v4130_v53, 0.0  ;;  %v4659_v55 = vor.u32 %v4658_v30, %v4655_v49  ;;  %v4046_v19 = vadd.f32 %v8516_v63, %v3957_v31  ;;  %v4048_v53 = vadd.f32 %v8525_v9, %v3959_v46  ;;  %v5736_v30 = vld [vmem:[%s6797_s16 + $0xb8] sm:$0x1] }
 0x575   : > { %v4675_v36 = vsel %vm8410_vm10, %v4670_v44, %v4674_v2  ;;  %v4696_v32 = vshll.u32 %v5736_v30, 16  ;;  %v3962_v17 = vadd.f32 %v8997_v35, %v8996_v61 }
 0x576   : > { %v8567_v10 = vpop.f32.mrf.mxu2  ;;  %v4660_v34 = vrot.slane %v4659_v55, 4  ;;  %v4844_v13 = vunpack.c.l.b16 %v4675_v36 }
 0x577   : > { %5760 = vmatmul.msk.bf16.gmra.mxu1 %vm591_vm1, %v4865_v57  ;;  %v4051_v44 = vadd.f32 %v8540_v59, %v3962_v17 }
 0x578   : > { %v4665_v26 = vsel %vm8410_vm10, %v4660_v34, %v4664_v18  ;;  %v4698_v34 = vrot.slane %v4696_v32, 5 }
 0x579   : > { %v4131_v11 = vpop.f32.mrf.mxu3 }
 0x57a   : > { %v4132_v33 = vadd.f32 %v4131_v11, %v4043_v47  ;;  %v4843_v47 = vunpack.c.l.b16 %v4665_v26 }
 0x57c   : > { %v4192_v42 = vmax.f32 %v4132_v33, 0.0  ;;  %v8564_v14 = vpop.f32.mrf.mxu1  ;;  %v4866_v57 = vpack.c.b16 %v4844_v13, %v4843_v47 }
 0x57e   : > { %v4217_v6 = vpack.c.bf16 %v4192_v42, %v4191_v0  ;;  %4173 = vmatmul.bf16.gmra.mxu3 %v2781_v3  ;;  %v8581_v3 = vpop.f32.mrf.mxu2  ;;  %v5734_v0 = vld [vmem:[%s6797_s16 + $0xb0] sm:$0xf]  ;;  %v5735_v42 = vld [vmem:[%s6797_s16 + $0xb4] sm:$0xf] }
 0x57f   : > { %v4677_v8 = vshrl.u32 %v5734_v0, 16  ;;  %v4686_v9 = vshll.u32 %v5735_v42, 16  ;;  %v4690_v7 = vshrl.u32 %v5735_v42, 16  ;;  %v5737_v42 = vld [vmem:[%s6797_s16 + $0xc0] sm:$0xf] }
 0x580   : > { %4333 = vmatmul.bf16.gmra.mxu0 %v4217_v6  ;;  %v4680_v6 = vshll.u32 %v5734_v0, 16 }
 0x581   : > { %v4134_v43 = vpop.f32.mrf.mxu3  ;;  %v4679_v56 = vrot.slane %v4677_v8, 4  ;;  %v4688_v18 = vrot.slane %v4686_v9, 5  ;;  %v8609_v8 = vld [vmem:[%s8825_s8] ss:$0 sm:$0xff]  ;;  %v4701_v9 = vshrl.u32 %v5737_v42, 16 }
 0x582   : > { %v4135_v29 = vadd.f32 %v4134_v43, %v4046_v19  ;;  %v4682_v58 = vrot.slane %v4680_v6, 5  ;;  %v4692_v43 = vrot.slane %v4690_v7, 4  ;;  %v8998_v19 = vld [vmem:[#allocation24_spill] sm:$0xff]  ;;  %v8614_v6 = vld [vmem:[%s8823_s6] ss:$0 sm:$0xff]  ;;  %v4704_v7 = vshll.u32 %v5737_v42, 16 }
 0x583   : > { %v3964_v46 = vadd.f32 %v8998_v19, %v8323_v38  ;;  %v4703_v30 = vrot.slane %v4701_v9, 4  ;;  %v4934_v35 = vadd.f32 %v8609_v8, %v8558_v23  ;;  %v4936_v23 = vadd.f32 %v8609_v8, %v8564_v14 }
 0x584   : > { %v8579_v33 = vpop.f32.mrf.mxu1  ;;  %v4193_v16 = vmax.f32 %v4135_v29, 0.0  ;;  %v4683_v20 = vor.u32 %v4682_v58, %v4679_v56  ;;  %v4693_v55 = vor.u32 %v4692_v43, %v4688_v18  ;;  %v4706_v32 = vrot.slane %v4704_v7, 5 }
 0x585   : > { %v4053_v29 = vadd.f32 %v8556_v52, %v3964_v46 }
 0x586   : > { %v4684_v31 = vrot.slane %v4683_v20, 4  ;;  %v4694_v2 = vrot.slane %v4693_v55, 4  ;;  %v8594_v26 = vpop.f32.mrf.mxu2  ;;  %v5739_v20 = vld [vmem:[%s6797_s16 + $0xc8] sm:$0x1] }
 0x587   : > { %5761 = vmatmul.msk.bf16.gmra.mxu1 %vm591_vm1, %v4866_v57 }
 0x588   : > { %v4689_v36 = vsel %vm8410_vm10, %v4684_v31, %v4688_v18  ;;  %v4699_v47 = vsel %vm8410_vm10, %v4694_v2, %v4698_v34  ;;  %v4720_v31 = vshll.u32 %v5739_v20, 16  ;;  %v4707_v34 = vor.u32 %v4706_v32, %v4703_v30  ;;  %v5740_v20 = vld [vmem:[%s6797_s16 + $0xd0] sm:$0xf]  ;;  %v5741_v32 = vld [vmem:[%s6797_s16 + $0xd4] sm:$0xf] }
 0x589   : > { %v4136_v11 = vpop.f32.mrf.mxu3 }
 0x58a   : > { %v4137_v63 = vadd.f32 %v4136_v11, %v4048_v53  ;;  %v4845_v53 = vunpack.c.l.b16 %v4689_v36  ;;  %v4846_v11 = vunpack.c.l.b16 %v4699_v47  ;;  %v4722_v46 = vrot.slane %v4720_v31, 5  ;;  %v9000_v36 = vld [vmem:[#allocation29_spill] sm:$0xff] }
 0x58b   : > { %v3969_v47 = vadd.f32 %v9000_v36, %v8339_v4  ;;  %v4738_v31 = vshrl.u32 %v5741_v32, 16 }
 0x58c   : > { %v4194_v28 = vmax.f32 %v4137_v63, 0.0  ;;  %v8586_v49 = vpop.f32.mrf.mxu1  ;;  %v4867_v38 = vpack.c.b16 %v4846_v11, %v4845_v53 }
 0x58e   : > { %v4218_v54 = vpack.c.bf16 %v4194_v28, %v4193_v16 }
 0x590   : > { %4338 = vmatmul.bf16.gmra.mxu0 %v4218_v54  ;;  %v5738_v54 = vld [vmem:[%s6797_s16 + $0xc4] sm:$0xf] }
 0x591   : > { %v4139_v41 = vpop.f32.mrf.mxu3  ;;  %v4710_v56 = vshll.u32 %v5738_v54, 16  ;;  %v4714_v58 = vshrl.u32 %v5738_v54, 16 }
 0x592   : > { %v4140_v13 = vadd.f32 %v4139_v41, %v4051_v44  ;;  %v8616_v41 = vpop.f32.mrf.mxu2  ;;  %v8999_v44 = vld [vmem:[#allocation25_spill] sm:$0xff] }
 0x593   : > { %v4712_v55 = vrot.slane %v4710_v56, 5  ;;  %v4716_v61 = vrot.slane %v4714_v58, 4  ;;  %v3967_v19 = vadd.f32 %v8999_v44, %v8333_v50 }
 0x594   : > { %v8601_v59 = vpop.f32.mrf.mxu1  ;;  %v4195_v16 = vmax.f32 %v4140_v13, 0.0 }
 0x595   : > { %v4717_v2 = vor.u32 %v4716_v61, %v4712_v55  ;;  %v4056_v11 = vadd.f32 %v8567_v10, %v3967_v19  ;;  %v4725_v61 = vshrl.u32 %v5740_v20, 16  ;;  %v5742_v19 = vld [vmem:[%s6797_s16 + $0xd8] sm:$0x1] }
 0x597   : > { %5762 = vmatmul.msk.bf16.gmra.mxu1 %vm591_vm1, %v4867_v38  ;;  %v4718_v13 = vrot.slane %v4717_v2, 4  ;;  %v4058_v38 = vadd.f32 %v8581_v3, %v3969_v47  ;;  %v4740_v47 = vrot.slane %v4738_v31, 4 }
 0x599   : > { %v4141_v63 = vpop.f32.mrf.mxu3 }
 0x59a   : > { %v4142_v57 = vadd.f32 %v4141_v63, %v4053_v29  ;;  %v4708_v29 = vrot.slane %v4707_v34, 4  ;;  %v8640_v14 = vpop.f32.mrf.mxu2  ;;  %v4727_v34 = vrot.slane %v4725_v61, 4 }
 0x59c   : > { %v4196_v28 = vmax.f32 %v4142_v57, 0.0  ;;  %v8618_v43 = vpop.f32.mrf.mxu1  ;;  %v4713_v50 = vsel %vm8410_vm10, %v4708_v29, %v4712_v55 }
 0x59d   : > { %v4304_v0 = vpop.f32.mrf.mxu0 }
 0x59e   : > { %v4219_v52 = vpack.c.bf16 %v4196_v28, %v4195_v16  ;;  %v4305_v17 = vadd.f32 %v8614_v6, %v4304_v0  ;;  %v4723_v16 = vsel %vm8410_vm10, %v4718_v13, %v4722_v46  ;;  %v4847_v0 = vunpack.c.l.b16 %v4713_v50 }
 0x59f   : > { %v4848_v10 = vunpack.c.l.b16 %v4723_v16  ;;  %v4744_v13 = vshll.u32 %v5742_v19, 16  ;;  %v3974_v16 = vadd.f32 %v8341_v37, %v8360_v1 }
 0x5a0   : > { %4343 = vmatmul.bf16.gmra.mxu0 %v4219_v52  ;;  %v5013_v63 = vadd.f32 %v4934_v35, %v4305_v17  ;;  %v4728_v35 = vshll.u32 %v5740_v20, 16  ;;  %v4734_v17 = vshll.u32 %v5741_v32, 16 }
 0x5a1   : > { %v4144_v18 = vpop.f32.mrf.mxu3  ;;  %v4868_v7 = vpack.c.b16 %v4848_v10, %v4847_v0  ;;  %v4746_v50 = vrot.slane %v4744_v13, 5  ;;  %v5745_v13 = vld [vmem:[%s6797_s16 + $0xe8] sm:$0x1] }
 0x5a2   : > { %v4145_v4 = vadd.f32 %v4144_v18, %v4056_v11  ;;  %v5045_v52 = vmax.f32 %v5013_v63, 0.0  ;;  %v4730_v46 = vrot.slane %v4728_v35, 5  ;;  %v4736_v36 = vrot.slane %v4734_v17, 5  ;;  %v5743_v35 = vld [vmem:[%s6797_s16 + $0xe0] sm:$0xf] }
 0x5a3   : > { %v5744_v17 = vld [vmem:[%s6797_s16 + $0xe4] sm:$0xf]  ;;  %v4752_v19 = vshll.u32 %v5743_v35, 16 }
 0x5a4   : > { %v8638_v54 = vpop.f32.mrf.mxu1  ;;  %v4197_v56 = vmax.f32 %v4145_v4, 0.0  ;;  %v4731_v11 = vor.u32 %v4730_v46, %v4727_v34  ;;  %v4741_v63 = vor.u32 %v4740_v47, %v4736_v36  ;;  %v4758_v46 = vshll.u32 %v5744_v17, 16 }
 0x5a5   : > { %v4306_v53 = vpop.f32.mrf.mxu0 }
 0x5a6   : > { %v4307_v57 = vadd.f32 %v8614_v6, %v4306_v53  ;;  %v4939_v53 = vadd.f32 %v8609_v8, %v8579_v33  ;;  %v4742_v0 = vrot.slane %v4741_v63, 4  ;;  %v4941_v33 = vadd.f32 %v8609_v8, %v8586_v49 }
 0x5a7   : > { %5763 = vmatmul.msk.bf16.gmra.mxu1 %vm591_vm1, %v4868_v7  ;;  %v4760_v63 = vrot.slane %v4758_v46, 5 }
 0x5a8   : > { %v5014_v28 = vadd.f32 %v4936_v23, %v4307_v57  ;;  %v9001_v23 = vld [vmem:[#allocation26_spill] sm:$0xff] }
 0x5a9   : > { %v4146_v42 = vpop.f32.mrf.mxu3  ;;  %v3972_v57 = vadd.f32 %v9001_v23, %v8349_v27 }
 0x5aa   : > { %v5046_v3 = vmax.f32 %v5014_v28, 0.0  ;;  %v4147_v9 = vadd.f32 %v4146_v42, %v4058_v38  ;;  %v4067_v38 = vpop.f32.mrf.mxu2  ;;  %v4732_v28 = vrot.slane %v4731_v11, 4  ;;  %v4754_v11 = vrot.slane %v4752_v19, 5 }
 0x5ab   : > { %v4061_v10 = vadd.f32 %v8594_v26, %v3972_v57  ;;  %v4944_v57 = vadd.f32 %v8609_v8, %v8601_v59  ;;  %v4946_v59 = vadd.f32 %v8609_v8, %v8618_v43 }
 0x5ac   : > { %v6262_v58 = vpack.c.bf16 %v5046_v3, %v5045_v52  ;;  %v4198_v30 = vmax.f32 %v4147_v9, 0.0  ;;  %v8651_v44 = vpop.f32.mrf.mxu1  ;;  %v4063_v3 = vadd.f32 %v8616_v41, %v3974_v16  ;;  %v4737_v27 = vsel %vm8410_vm10, %v4732_v28, %v4736_v36 }
 0x5ad   : > { %v4309_v18 = vpop.f32.mrf.mxu0  ;;  %v4747_v9 = vsel %vm8410_vm10, %v4742_v0, %v4746_v50  ;;  %v4849_v7 = vunpack.c.l.b16 %v4737_v27  ;;  %v4762_v36 = vshrl.u32 %v5744_v17, 16  ;;  %v4768_v16 = vshll.u32 %v5745_v13, 16  ;;  %v5748_v13 = vld [vmem:[%s6797_s16 + $0xf8] sm:$0x1] }
 0x5ae   : > { %6263 = vst [vmem:[%s8645_s15] sm:$0xff] %v6262_v58   ;;  %v4220_v55 = vpack.c.bf16 %v4198_v30, %v4197_v56  ;;  %v4310_v29 = vadd.f32 %v8614_v6, %v4309_v18  ;;  %v4850_v26 = vunpack.c.l.b16 %v4747_v9  ;;  %v3977_v0 = vadd.f32 %v8356_v48, %v8367_v51 }
 0x5af   : > { %v4764_v23 = vrot.slane %v4762_v36, 4 }
 0x5b0   : > { %4348 = vmatmul.bf16.gmra.mxu0 %v4220_v55  ;;  %v5015_v42 = vadd.f32 %v4939_v53, %v4310_v29  ;;  %v4869_v41 = vpack.c.b16 %v4850_v26, %v4849_v7  ;;  %v4066_v27 = vadd.f32 %v8640_v14, %v3977_v0 }
 0x5b1   : > { %v4149_v2 = vpop.f32.mrf.mxu3  ;;  %v4765_v28 = vor.u32 %v4764_v23, %v4760_v63 }
 0x5b2   : > { %v4150_v37 = vadd.f32 %v4149_v2, %v4061_v10  ;;  %v5047_v49 = vmax.f32 %v5015_v42, 0.0  ;;  %v8675_v31 = vpop.f32.mrf.mxu2  ;;  %v4749_v2 = vshrl.u32 %v5743_v35, 16  ;;  %v4770_v10 = vrot.slane %v4768_v16, 5  ;;  %v5747_v35 = vld [vmem:[%s6797_s16 + $0xf4] sm:$0xf] }
 0x5b3   : > { %v3979_v42 = vadd.f32 %v8364_v21, %v8373_v39  ;;  %v4782_v19 = vshll.u32 %v5747_v35, 16  ;;  %v4786_v46 = vshrl.u32 %v5747_v35, 16  ;;  %v4792_v16 = vshll.u32 %v5748_v13, 16 }
 0x5b4   : > { %v8670_v58 = vpop.f32.mrf.mxu1  ;;  %v4199_v20 = vmax.f32 %v4150_v37, 0.0  ;;  %v4751_v47 = vrot.slane %v4749_v2, 4 }
 0x5b5   : > { %v4311_v4 = vpop.f32.mrf.mxu0  ;;  %v4788_v23 = vrot.slane %v4786_v46, 4  ;;  %v4954_v13 = vadd.f32 %v8609_v8, %v8670_v58 }
 0x5b6   : > { %v4312_v52 = vadd.f32 %v8614_v6, %v4311_v4  ;;  %v4755_v4 = vor.u32 %v4754_v11, %v4751_v47 }
 0x5b7   : > { %5764 = vmatmul.msk.bf16.gmra.mxu1 %vm591_vm1, %v4869_v41 }
 0x5b8   : > { %v5016_v1 = vadd.f32 %v4941_v33, %v4312_v52  ;;  %v4756_v52 = vrot.slane %v4755_v4, 4 }
 0x5b9   : > { %v4151_v56 = vpop.f32.mrf.mxu3 }
 0x5ba   : > { %v5048_v30 = vmax.f32 %v5016_v1, 0.0  ;;  %v4152_v18 = vadd.f32 %v4151_v56, %v4063_v3  ;;  %v4766_v3 = vrot.slane %v4765_v28, 4  ;;  %v4068_v1 = vadd.f32 %v4067_v38, %v3979_v42  ;;  %v4072_v51 = vpop.f32.mrf.mxu2 }
 0x5bb   : > { %v4761_v7 = vsel %vm8410_vm10, %v4756_v52, %v4760_v63  ;;  %v4784_v63 = vrot.slane %v4782_v19, 5  ;;  %v4794_v42 = vrot.slane %v4792_v16, 5  ;;  %v5751_v19 = vld [vmem:[%s6797_s16 + $0x108] sm:$0x1] }
 0x5bc   : > { %v6267_v32 = vpack.c.bf16 %v5048_v30, %v5047_v49  ;;  %v4200_v55 = vmax.f32 %v4152_v18, 0.0  ;;  %v8678_v29 = vpop.f32.mrf.mxu1  ;;  %v4771_v48 = vsel %vm8410_vm10, %v4766_v3, %v4770_v10  ;;  %v4851_v14 = vunpack.c.l.b16 %v4761_v7 }
 0x5bd   : > { %v4314_v61 = vpop.f32.mrf.mxu0  ;;  %v4852_v26 = vunpack.c.l.b16 %v4771_v48  ;;  %v4789_v0 = vor.u32 %v4788_v23, %v4784_v63  ;;  %v3982_v10 = vadd.f32 %v8369_v22, %v8377_v62  ;;  %v4956_v58 = vadd.f32 %v8609_v8, %v8678_v29 }
 0x5be   : > { %6563 = vst [vmem:[%s8645_s15 + $0x8] sm:$0xff] %v6267_v32   ;;  %v4221_v34 = vpack.c.bf16 %v4200_v55, %v4199_v20  ;;  %v4315_v50 = vadd.f32 %v8614_v6, %v4314_v61  ;;  %v5746_v61 = vld [vmem:[%s6797_s16 + $0xf0] sm:$0xf] }
 0x5bf   : > { %v4870_v18 = vpack.c.b16 %v4852_v26, %v4851_v14  ;;  %v4776_v2 = vshll.u32 %v5746_v61, 16 }
 0x5c0   : > { %4353 = vmatmul.bf16.gmra.mxu0 %v4221_v34  ;;  %v5017_v9 = vadd.f32 %v4944_v57, %v4315_v50  ;;  %v4773_v34 = vshrl.u32 %v5746_v61, 16  ;;  %v4949_v57 = vadd.f32 %v8609_v8, %v8638_v54  ;;  %v4951_v54 = vadd.f32 %v8609_v8, %v8651_v44 }
 0x5c1   : > { %v4154_v53 = vpop.f32.mrf.mxu3  ;;  %v4778_v11 = vrot.slane %v4776_v2, 5 }
 0x5c2   : > { %v4155_v21 = vadd.f32 %v4154_v53, %v4066_v27  ;;  %v5049_v43 = vmax.f32 %v5017_v9, 0.0  ;;  %v4775_v36 = vrot.slane %v4773_v34, 4  ;;  %v4075_v4 = vpop.f32.mrf.mxu2  ;;  %v4790_v27 = vrot.slane %v4789_v0, 4  ;;  %v9003_v0 = vld [vmem:[#allocation30_spill] sm:$0xff] }
 0x5c3   : > { %v4071_v9 = vadd.f32 %v8675_v31, %v3982_v10  ;;  %v9004_v10 = vld [vmem:[#allocation28_spill] sm:$0xff] }
 0x5c4   : > { %v8696_v49 = vpop.f32.mrf.mxu1  ;;  %v4201_v41 = vmax.f32 %v4155_v21, 0.0  ;;  %v4779_v28 = vor.u32 %v4778_v11, %v4775_v36  ;;  %v4795_v22 = vsel %vm8410_vm10, %v4790_v27, %v4794_v42  ;;  %v3989_v42 = vadd.f32 %v9004_v10, %v9003_v0 }
 0x5c5   : > { %v4316_v33 = vpop.f32.mrf.mxu0  ;;  %v4854_v31 = vunpack.c.l.b16 %v4795_v22 }
 0x5c6   : > { %v4317_v37 = vadd.f32 %v8614_v6, %v4316_v33  ;;  %v3984_v33 = vadd.f32 %v8380_v25, %v8385_v15  ;;  %v4780_v3 = vrot.slane %v4779_v28, 4 }
 0x5c7   : > { %5765 = vmatmul.msk.bf16.gmra.mxu1 %vm591_vm1, %v4870_v18  ;;  %v5749_v18 = vld [vmem:[%s6797_s16 + $0x100] sm:$0xf] }
 0x5c8   : > { %v5018_v39 = vadd.f32 %v4946_v59, %v4317_v37  ;;  %v4785_v7 = vsel %vm8410_vm10, %v4780_v3, %v4784_v63  ;;  %v4816_v63 = vshll.u32 %v5751_v19, 16 }
 0x5c9   : > { %v4156_v56 = vpop.f32.mrf.mxu3  ;;  %v4853_v15 = vunpack.c.l.b16 %v4785_v7 }
 0x5ca   : > { %v5050_v30 = vmax.f32 %v5018_v39, 0.0  ;;  %v4157_v38 = vadd.f32 %v4156_v56, %v4068_v1  ;;  %v4073_v1 = vadd.f32 %v4072_v51, %v3984_v33  ;;  %v4818_v28 = vrot.slane %v4816_v63, 5 }
 0x5cb   : > { %v4871_v51 = vpack.c.b16 %v4854_v31, %v4853_v15 }
 0x5cc   : > { %v6272_v20 = vpack.c.bf16 %v5050_v30, %v5049_v43  ;;  %v4202_v32 = vmax.f32 %v4157_v38, 0.0  ;;  %v8702_v53 = vpop.f32.mrf.mxu1  ;;  %v4077_v30 = vpop.f32.mrf.mxu2 }
 0x5cd   : > { %v4319_v55 = vpop.f32.mrf.mxu0  ;;  %v4961_v19 = vadd.f32 %v8609_v8, %v8702_v53 }
 0x5ce   : > { %6564 = vst [vmem:[%s8645_s15 + $0x10] sm:$0xff] %v6272_v20   ;;  %v4222_v17 = vpack.c.bf16 %v4202_v32, %v4201_v41  ;;  %v4320_v50 = vadd.f32 %v8614_v6, %v4319_v55  ;;  %v5750_v41 = vld [vmem:[%s6797_s16 + $0x104] sm:$0xf]  ;;  %v4797_v32 = vshrl.u32 %v5749_v18, 16  ;;  %v4800_v55 = vshll.u32 %v5749_v18, 16 }
 0x5cf   : > { %v4806_v61 = vshll.u32 %v5750_v41, 16  ;;  %v4810_v35 = vshrl.u32 %v5750_v41, 16  ;;  %v9005_v41 = vld [vmem:[#allocation44_spill] sm:$0xff] }
 0x5d0   : > { %4358 = vmatmul.bf16.gmra.mxu0 %v4222_v17  ;;  %v5019_v59 = vadd.f32 %v4949_v57, %v4320_v50  ;;  %v4799_v17 = vrot.slane %v4797_v32, 4  ;;  %v4802_v46 = vrot.slane %v4800_v55, 5  ;;  %v9002_v50 = vld [vmem:[#allocation27_spill] sm:$0xff]  ;;  %v9006_v32 = vld [vmem:[#allocation32_spill] sm:$0xff] }
 0x5d1   : > { %v4159_v47 = vpop.f32.mrf.mxu3  ;;  %v4808_v36 = vrot.slane %v4806_v61, 5  ;;  %v3987_v16 = vadd.f32 %v9002_v50, %v8391_v24  ;;  %v9007_v55 = vld [vmem:[#allocation31_spill] sm:$0xff] }
 0x5d2   : > { %v4160_v62 = vadd.f32 %v4159_v47, %v4071_v9  ;;  %v5051_v44 = vmax.f32 %v5019_v59, 0.0  ;;  %v4812_v47 = vrot.slane %v4810_v35, 4  ;;  %v4803_v23 = vor.u32 %v4802_v46, %v4799_v17 }
 0x5d3   : > { %v4076_v27 = vadd.f32 %v4075_v4, %v3987_v16  ;;  %v3994_v61 = vadd.f32 %v9007_v55, %v9006_v32 }
 0x5d4   : > { %v8720_v21 = vpop.f32.mrf.mxu1  ;;  %v4203_v26 = vmax.f32 %v4160_v62, 0.0  ;;  %v4813_v57 = vor.u32 %v4812_v47, %v4808_v36 }
 0x5d5   : > { %v4321_v52 = vpop.f32.mrf.mxu0  ;;  %v4964_v53 = vadd.f32 %v8609_v8, %v8720_v21 }
 0x5d6   : > { %v4322_v37 = vadd.f32 %v8614_v6, %v4321_v52  ;;  %v4804_v52 = vrot.slane %v4803_v23, 4  ;;  %v4814_v3 = vrot.slane %v4813_v57, 4 }
 0x5d7   : > { %5766 = vmatmul.msk.bf16.gmra.mxu1 %vm591_vm1, %v4871_v51 }
 0x5d8   : > { %v5020_v25 = vadd.f32 %v4951_v54, %v4322_v37  ;;  %v4078_v54 = vadd.f32 %v4077_v30, %v3989_v42  ;;  %v4080_v37 = vpop.f32.mrf.mxu2  ;;  %v4819_v24 = vsel %vm8410_vm10, %v4814_v3, %v4818_v28  ;;  %v4959_v30 = vadd.f32 %v8609_v8, %v8696_v49 }
 0x5d9   : > { %v4161_v48 = vpop.f32.mrf.mxu3 }
 0x5da   : > { %v5052_v39 = vmax.f32 %v5020_v25, 0.0  ;;  %v4162_v14 = vadd.f32 %v4161_v48, %v4073_v1  ;;  %v4809_v1 = vsel %vm8410_vm10, %v4804_v52, %v4808_v36  ;;  %v4856_v25 = vunpack.c.l.b16 %v4819_v24 }
 0x5db   : > { %v4855_v62 = vunpack.c.l.b16 %v4809_v1  ;;  %v3999_v52 = vadd.f32 %v8542_v45, %v8438_v60 }
 0x5dc   : > { %v6277_v56 = vpack.c.bf16 %v5052_v39, %v5051_v44  ;;  %v4204_v43 = vmax.f32 %v4162_v14, 0.0  ;;  %v8726_v2 = vpop.f32.mrf.mxu1 }
 0x5dd   : > { %v4324_v38 = vpop.f32.mrf.mxu0  ;;  %v4872_v44 = vpack.c.b16 %v4856_v25, %v4855_v62 }
 0x5de   : > { %6565 = vst [vmem:[%s8645_s15 + $0x18] sm:$0xff] %v6277_v56   ;;  %v4223_v20 = vpack.c.bf16 %v4204_v43, %v4203_v26  ;;  %v4325_v11 = vadd.f32 %v8614_v6, %v4324_v38 }
 0x5e0   : > { %4363 = vmatmul.bf16.gmra.mxu0 %v4223_v20  ;;  %v5021_v9 = vadd.f32 %v4954_v13, %v4325_v11  ;;  %v4082_v56 = vpop.f32.mrf.mxu2  ;;  %v3992_v20 = vadd.f32 %v9005_v41, %v8408_v5 }
 0x5e1   : > { %v4164_v34 = vpop.f32.mrf.mxu3  ;;  %v4083_v36 = vadd.f32 %v4082_v56, %v3994_v61 }
 0x5e2   : > { %v4165_v7 = vadd.f32 %v4164_v34, %v4076_v27  ;;  %v5053_v31 = vmax.f32 %v5021_v9, 0.0  ;;  %v4081_v17 = vadd.f32 %v4080_v37, %v3992_v20 }
 0x5e4   : > { %v8743_v15 = vpop.f32.mrf.mxu1  ;;  %v4205_v39 = vmax.f32 %v4165_v7, 0.0 }
 0x5e5   : > { %v4326_v33 = vpop.f32.mrf.mxu0 }
 0x5e6   : > { %v4327_v59 = vadd.f32 %v8614_v6, %v4326_v33 }
 0x5e7   : > { %5767 = vmatmul.msk.bf16.gmra.mxu1 %vm591_vm1, %v4872_v44 }
 0x5e8   : > { %v5022_v22 = vadd.f32 %v4956_v58, %v4327_v59  ;;  %v4085_v5 = vpop.f32.mrf.mxu2  ;;  %v4966_v59 = vadd.f32 %v8609_v8, %v8726_v2  ;;  %v4969_v2 = vadd.f32 %v8609_v8, %v8743_v15 }
 0x5e9   : > { %v4166_v4 = vpop.f32.mrf.mxu3  ;;  %v4086_v9 = vadd.f32 %v4085_v5, %v8430_v12 }
 0x5ea   : > { %v5054_v29 = vmax.f32 %v5022_v22, 0.0  ;;  %v4167_v48 = vadd.f32 %v4166_v4, %v4078_v54 }
 0x5ec   : > { %v6282_v14 = vpack.c.bf16 %v5054_v29, %v5053_v31  ;;  %v4206_v51 = vmax.f32 %v4167_v48, 0.0  ;;  %v4970_v18 = vpop.f32.mrf.mxu1 }
 0x5ed   : > { %v4329_v26 = vpop.f32.mrf.mxu0 }
 0x5ee   : > { %6566 = vst [vmem:[%s8645_s15 + $0x20] sm:$0xff] %v6282_v14   ;;  %v4224_v40 = vpack.c.bf16 %v4206_v51, %v4205_v39  ;;  %v4330_v38 = vadd.f32 %v8614_v6, %v4329_v26  ;;  %v4971_v14 = vadd.f32 %v8609_v8, %v4970_v18 }
 0x5f0   : > { %4368 = vmatmul.bf16.gmra.mxu0 %v4224_v40  ;;  %v5023_v34 = vadd.f32 %v4959_v30, %v4330_v38  ;;  %v4087_v3 = vpop.f32.mrf.mxu2 }
 0x5f1   : > { %v4169_v43 = vpop.f32.mrf.mxu3  ;;  %v4088_v1 = vadd.f32 %v4087_v3, %v3999_v52 }
 0x5f2   : > { %v4170_v49 = vadd.f32 %v4169_v43, %v4081_v17  ;;  %v5055_v11 = vmax.f32 %v5023_v34, 0.0 }
 0x5f4   : > { %v4207_v57 = vmax.f32 %v4170_v49, 0.0  ;;  %v4973_v0 = vpop.f32.mrf.mxu1 }
 0x5f5   : > { %v4331_v35 = vpop.f32.mrf.mxu0  ;;  %v4974_v41 = vadd.f32 %v8609_v8, %v4973_v0 }
 0x5f6   : > { %v4332_v46 = vadd.f32 %v8614_v6, %v4331_v35 }
 0x5f8   : > { %v5024_v47 = vadd.f32 %v4961_v19, %v4332_v46 }
 0x5f9   : > { %v4171_v13 = vpop.f32.mrf.mxu3 }
 0x5fa   : > { %v5056_v63 = vmax.f32 %v5024_v47, 0.0  ;;  %v4172_v23 = vadd.f32 %v4171_v13, %v4083_v36 }
 0x5fc   : > { %v6287_v50 = vpack.c.bf16 %v5056_v63, %v5055_v11  ;;  %v4208_v16 = vmax.f32 %v4172_v23, 0.0  ;;  %v4975_v37 = vpop.f32.mrf.mxu1 }
 0x5fd   : > { %v4334_v28 = vpop.f32.mrf.mxu0  ;;  %v4976_v61 = vadd.f32 %v8609_v8, %v4975_v37 }
 0x5fe   : > { %6567 = vst [vmem:[%s8645_s15 + $0x28] sm:$0xff] %v6287_v50   ;;  %v4225_v10 = vpack.c.bf16 %v4208_v16, %v4207_v57  ;;  %v4335_v33 = vadd.f32 %v8614_v6, %v4334_v28 }
 0x600   : > { %4373 = vmatmul.bf16.gmra.mxu0 %v4225_v10  ;;  %v5025_v58 = vadd.f32 %v4964_v53, %v4335_v33 }
 0x601   : > { %v4174_v42 = vpop.f32.mrf.mxu3 }
 0x602   : > { %v4175_v24 = vadd.f32 %v4174_v42, %v4086_v9  ;;  %v5057_v22 = vmax.f32 %v5025_v58, 0.0 }
 0x604   : > { %v4209_v60 = vmax.f32 %v4175_v24, 0.0  ;;  %v4978_v29 = vpop.f32.mrf.mxu1 }
 0x605   : > { %v4336_v27 = vpop.f32.mrf.mxu0  ;;  %v4979_v49 = vadd.f32 %v8609_v8, %v4978_v29 }
 0x606   : > { %v4337_v54 = vadd.f32 %v8614_v6, %v4336_v27 }
 0x608   : > { %v5026_v21 = vadd.f32 %v4966_v59, %v4337_v54 }
 0x609   : > { %v4176_v7 = vpop.f32.mrf.mxu3 }
 0x60a   : > { %v5058_v62 = vmax.f32 %v5026_v21, 0.0  ;;  %v4177_v25 = vadd.f32 %v4176_v7, %v4088_v1 }
 0x60c   : > { %v6292_v45 = vpack.c.bf16 %v5058_v62, %v5057_v22  ;;  %v4210_v4 = vmax.f32 %v4177_v25, 0.0  ;;  %v4980_v43 = vpop.f32.mrf.mxu1 }
 0x60d   : > { %v4339_v31 = vpop.f32.mrf.mxu0  ;;  %v4981_v63 = vadd.f32 %v8609_v8, %v4980_v43 }
 0x60e   : > { %6568 = vst [vmem:[%s8645_s15 + $0x30] sm:$0xff] %v6292_v45   ;;  %v4226_v12 = vpack.c.bf16 %v4210_v4, %v4209_v60  ;;  %v4340_v48 = vadd.f32 %v8614_v6, %v4339_v31 }
 0x610   : > { %4378 = vmatmul.bf16.gmra.mxu0 %v4226_v12  ;;  %v5027_v39 = vadd.f32 %v4969_v2, %v4340_v48 }
 0x612   : > { %v5059_v40 = vmax.f32 %v5027_v39, 0.0 }
 0x614   : > { %v4983_v32 = vpop.f32.mrf.mxu1 }
 0x615   : > { %v4341_v44 = vpop.f32.mrf.mxu0  ;;  %v4984_v10 = vadd.f32 %v8609_v8, %v4983_v32 }
 0x616   : > { %v4342_v51 = vadd.f32 %v8614_v6, %v4341_v44 }
 0x618   : > { %v5028_v26 = vadd.f32 %v4971_v14, %v4342_v51 }
 0x61a   : > { %v5060_v56 = vmax.f32 %v5028_v26, 0.0 }
 0x61c   : > { %v6297_v30 = vpack.c.bf16 %v5060_v56, %v5059_v40  ;;  %v4985_v36 = vpop.f32.mrf.mxu1 }
 0x61d   : > { %v4344_v38 = vpop.f32.mrf.mxu0  ;;  %v4986_v3 = vadd.f32 %v8609_v8, %v4985_v36 }
 0x61e   : > { %6569 = vst [vmem:[%s8645_s15 + $0x38] sm:$0xff] %v6297_v30   ;;  %v4345_v15 = vadd.f32 %v8614_v6, %v4344_v38 }
 0x620   : > { %v5029_v55 = vadd.f32 %v4974_v41, %v4345_v15 }
 0x622   : > { %v5061_v17 = vmax.f32 %v5029_v55, 0.0 }
 0x624   : > { %v4988_v57 = vpop.f32.mrf.mxu1 }
 0x625   : > { %v4346_v20 = vpop.f32.mrf.mxu0  ;;  %v4989_v24 = vadd.f32 %v8609_v8, %v4988_v57 }
 0x626   : > { %v4347_v18 = vadd.f32 %v8614_v6, %v4346_v20 }
 0x628   : > { %v5030_v35 = vadd.f32 %v4976_v61, %v4347_v18 }
 0x62a   : > { %v5062_v34 = vmax.f32 %v5030_v35, 0.0 }
 0x62c   : > { %v6302_v19 = vpack.c.bf16 %v5062_v34, %v5061_v17  ;;  %v4990_v53 = vpop.f32.mrf.mxu1 }
 0x62d   : > { %v4349_v46 = vpop.f32.mrf.mxu0  ;;  %v4991_v62 = vadd.f32 %v8609_v8, %v4990_v53 }
 0x62e   : > { %6570 = vst [vmem:[%s8645_s15 + $0x40] sm:$0xff] %v6302_v19   ;;  %v4350_v47 = vadd.f32 %v8614_v6, %v4349_v46 }
 0x630   : > { %v5031_v11 = vadd.f32 %v4979_v49, %v4350_v47 }
 0x632   : > { %v5063_v50 = vmax.f32 %v5031_v11, 0.0 }
 0x634   : > { %v4993_v1 = vpop.f32.mrf.mxu1 }
 0x635   : > { %v4351_v13 = vpop.f32.mrf.mxu0  ;;  %v4994_v48 = vadd.f32 %v8609_v8, %v4993_v1 }
 0x636   : > { %v4352_v23 = vadd.f32 %v8614_v6, %v4351_v13 }
 0x638   : > { %v5032_v5 = vadd.f32 %v4981_v63, %v4352_v23 }
 0x63a   : > { %v5064_v16 = vmax.f32 %v5032_v5, 0.0 }
 0x63c   : > { %v6307_v28 = vpack.c.bf16 %v5064_v16, %v5063_v50  ;;  %v4995_v60 = vpop.f32.mrf.mxu1 }
 0x63d   : > { %v4354_v0 = vpop.f32.mrf.mxu0  ;;  %v4996_v51 = vadd.f32 %v8609_v8, %v4995_v60 }
 0x63e   : > { %6571 = vst [vmem:[%s8645_s15 + $0x48] sm:$0xff] %v6307_v28   ;;  %v4355_v42 = vadd.f32 %v8614_v6, %v4354_v0 }
 0x640   : > { %v5033_v52 = vadd.f32 %v4984_v10, %v4355_v42 }
 0x642   : > { %v5065_v58 = vmax.f32 %v5033_v52, 0.0 }
 0x644   : > { %v4998_v2 = vpop.f32.mrf.mxu1 }
 0x645   : > { %v4356_v33 = vpop.f32.mrf.mxu0  ;;  %v4999_v15 = vadd.f32 %v8609_v8, %v4998_v2 }
 0x646   : > { %v4357_v27 = vadd.f32 %v8614_v6, %v4356_v33 }
 0x648   : > { %v5034_v9 = vadd.f32 %v4986_v3, %v4357_v27 }
 0x64a   : > { %v5066_v59 = vmax.f32 %v5034_v9, 0.0 }
 0x64c   : > { %v6312_v54 = vpack.c.bf16 %v5066_v59, %v5065_v58  ;;  %v5000_v30 = vpop.f32.mrf.mxu1 }
 0x64d   : > { %v4359_v37 = vpop.f32.mrf.mxu0  ;;  %v5001_v18 = vadd.f32 %v8609_v8, %v5000_v30 }
 0x64e   : > { %6572 = vst [vmem:[%s8645_s15 + $0x50] sm:$0xff] %v6312_v54   ;;  %v4360_v21 = vadd.f32 %v8614_v6, %v4359_v37 }
 0x650   : > { %v5035_v22 = vadd.f32 %v4989_v24, %v4360_v21 }
 0x652   : > { %v5067_v4 = vmax.f32 %v5035_v22, 0.0 }
 0x654   : > { %v5003_v55 = vpop.f32.mrf.mxu1 }
 0x655   : > { %v4361_v7 = vpop.f32.mrf.mxu0  ;;  %v5004_v47 = vadd.f32 %v8609_v8, %v5003_v55 }
 0x656   : > { %v4362_v25 = vadd.f32 %v8614_v6, %v4361_v7 }
 0x658   : > { %v5036_v45 = vadd.f32 %v4991_v62, %v4362_v25 }
 0x65a   : > { %v5068_v31 = vmax.f32 %v5036_v45, 0.0 }
 0x65c   : > { %v6317_v12 = vpack.c.bf16 %v5068_v31, %v5067_v4  ;;  %v5005_v49 = vpop.f32.mrf.mxu1 }
 0x65d   : > { %v4364_v29 = vpop.f32.mrf.mxu0  ;;  %v5006_v23 = vadd.f32 %v8609_v8, %v5005_v49 }
 0x65e   : > { %6573 = vst [vmem:[%s8645_s15 + $0x58] sm:$0xff] %v6317_v12   ;;  %v4365_v44 = vadd.f32 %v8614_v6, %v4364_v29 }
 0x660   : > { %v5037_v14 = vadd.f32 %v4994_v48, %v4365_v44 }
 0x662   : > { %v5069_v56 = vmax.f32 %v5037_v14, 0.0 }
 0x664   : > { %v5008_v50 = vpop.f32.mrf.mxu1 }
 0x665   : > { %v4366_v39 = vpop.f32.mrf.mxu0  ;;  %v5009_v42 = vadd.f32 %v8609_v8, %v5008_v50 }
 0x666   : > { %v4367_v26 = vadd.f32 %v8614_v6, %v4366_v39 }
 0x668   : > { %v5038_v40 = vadd.f32 %v4996_v51, %v4367_v26 }
 0x66a   : > { %v5070_v43 = vmax.f32 %v5038_v40, 0.0 }
 0x66c   : > { %v6322_v38 = vpack.c.bf16 %v5070_v43, %v5069_v56  ;;  %v5010_v33 = vpop.f32.mrf.mxu1 }
 0x66d   : > { %v4369_v41 = vpop.f32.mrf.mxu0  ;;  %v5011_v27 = vadd.f32 %v8609_v8, %v5010_v33 }
 0x66e   : > { %6574 = vst [vmem:[%s8645_s15 + $0x60] sm:$0xff] %v6322_v38   ;;  %v4370_v20 = vadd.f32 %v8614_v6, %v4369_v41 }
 0x670   : > { %v5039_v61 = vadd.f32 %v4999_v15, %v4370_v20 }
 0x672   : > { %v5071_v34 = vmax.f32 %v5039_v61, 0.0 }
 0x675   : > { %v4371_v32 = vpop.f32.mrf.mxu0 }
 0x676   : > { %v4372_v35 = vadd.f32 %v8614_v6, %v4371_v32 }
 0x678   : > { %v5040_v17 = vadd.f32 %v5001_v18, %v4372_v35 }
 0x67a   : > { %v5072_v19 = vmax.f32 %v5040_v17, 0.0 }
 0x67c   : > { %v6327_v46 = vpack.c.bf16 %v5072_v19, %v5071_v34 }
 0x67d   : > { %v4374_v36 = vpop.f32.mrf.mxu0 }
 0x67e   : > { %6575 = vst [vmem:[%s8645_s15 + $0x68] sm:$0xff] %v6327_v46   ;;  %v4375_v13 = vadd.f32 %v8614_v6, %v4374_v36 }
 0x680   : > { %v5041_v63 = vadd.f32 %v5004_v47, %v4375_v13 }
 0x682   : > { %v5073_v16 = vmax.f32 %v5041_v63, 0.0 }
 0x685   : > { %v4376_v11 = vpop.f32.mrf.mxu0 }
 0x686   : > { %v4377_v5 = vadd.f32 %v8614_v6, %v4376_v11 }
 0x688   : > { %v5042_v57 = vadd.f32 %v5006_v23, %v4377_v5 }
 0x68a   : > { %v5074_v28 = vmax.f32 %v5042_v57, 0.0 }
 0x68c   : > { %v6332_v0 = vpack.c.bf16 %v5074_v28, %v5073_v16 }
 0x68d   : > { %v4379_v10 = vpop.f32.mrf.mxu0 }
 0x68e   : > { %6576 = vst [vmem:[%s8645_s15 + $0x70] sm:$0xff] %v6332_v0   ;;  %v4380_v53 = vadd.f32 %v8614_v6, %v4379_v10 }
 0x690   : > { %v5043_v3 = vadd.f32 %v5009_v42, %v4380_v53 }
 0x692   : > { %v5075_v59 = vmax.f32 %v5043_v3, 0.0 }
 0x695   : > { %v4381_v52 = vpop.f32.mrf.mxu0 }
 0x696   : > { %v4382_v9 = vadd.f32 %v8614_v6, %v4381_v52 }
 0x698   : > { %v5044_v58 = vadd.f32 %v5011_v27, %v4382_v9 }
 0x69a   : > { %v5076_v54 = vmax.f32 %v5044_v58, 0.0 }
 0x69c   : > { %v6337_v37 = vpack.c.bf16 %v5076_v54, %v5075_v59 }
 0x69e   : > { %6577 = vst [vmem:[%s8645_s15 + $0x78] sm:$0xff] %v6337_v37  }
 0x69f PF: > { %s19_s30 = sadd.s32 1, %s6725_s30  }
 0x6a0   : > { %p16_p4 = scmp.ge.s32.totalorder %s19_s30, 4  }
 0x6a2   :  { %18 = sbr.rel (!%p16_p4) target bundleno = 1 (0x1), region = 89 }

</bundles_post_ra>
